<compile_context>
chip_gen: v7x
topology: tpu7x:2x2x1
jax: 0.10.0
libtpu: 0.0.40
codegen_flags: <defaults>
</compile_context>

<pallas_src>
import functools

import numpy as np

import jax
import jax.numpy as jnp
from jax import lax
from jax.experimental import pallas as pl
from jax.experimental.pallas import tpu as pltpu


_UNROLL_MAX_STEPS = 32     # fully unroll the serial recurrences up to this T
_FORI_UNROLL = 4           # partial unroll for the fori_loop fallback (long T)
_SPLIT_WHH_MIN_ROWS = 128  # rows >= this: two per-direction recurrent matmuls


def _gru_gates(gi, gh, h_prev, hidden):
    """One GRU cell update from gate pre-activations (torch order r|z|n).

    gi = x_t @ W_ih + b_ih, gh = h_{t-1} @ W_hh + b_hh, both (rows, 3*hidden)
    in f32.  At production hidden=256 the gate slices are 128-lane aligned.
    """
    r = jax.nn.sigmoid(gi[:, :hidden] + gh[:, :hidden])
    z = jax.nn.sigmoid(gi[:, hidden:2 * hidden] + gh[:, hidden:2 * hidden])
    n = jnp.tanh(gi[:, 2 * hidden:] + r * gh[:, 2 * hidden:])
    return (1.0 - z) * n + z * h_prev


def _tarn_kernel(x_ref,
                 wih_ref, whh_ref, bih_ref, bhh_ref,
                 waln_ref, baln_ref,
                 dwih_ref, dwhh_ref, dbih_ref, dbhh_ref,
                 fcw_ref, fcb_ref,
                 o_ref,
                 gi_ref, f_ref, gdml_ref,
                 *, ts_chunk, eps, compute_dtype):
    """Fused TARN forward: BiGRU (Q & S) + attention + EucCos + dml GRU + FC.

    Grid = (batch blocks, time chunks).  Every grid step projects one time
    chunk of the stacked [Q | S] input into gi scratch; the serial phases
    (recurrence, attention, dml GRU, FC) run once per batch block at the last
    time chunk via pl.when.
    """
    tc, rows, d_in = x_ref.shape          # rows = 2*bb : [query | support]
    bb = rows // 2
    h6 = wih_ref.shape[1]
    H = h6 // 6
    H3 = 3 * H
    E = 2 * H
    Hd = dwhh_ref.shape[0]
    Hd3 = 3 * Hd
    T = gi_ref.shape[0]
    cd = compute_dtype
    f32 = jnp.float32

    t_idx = pl.program_id(1)
    n_t = pl.num_programs(1)

    # ------------------------------------------------------------- phase 1
    # Stacked (Q|S) input projection for this time chunk: one
    # (tc*rows, Din) @ (Din, 6H) MXU matmul (fwd gates in [:3H], bwd in [3H:]),
    # written as a single full-slab time-major store into gi scratch.
    t0 = pl.multiple_of(t_idx * tc, tc)
    g = jnp.dot(x_ref[...].reshape(tc * rows, d_in), wih_ref[...],
                preferred_element_type=f32) + bih_ref[...]
    gi_ref[pl.ds(t0, tc), :, :] = g.reshape(tc, rows, h6).astype(gi_ref.dtype)

    # Phases 2-6: only once the whole sequence has been projected.
    @pl.when(t_idx == n_t - 1)
    def _tail():
        # --------------------------------------------------------- phase 2
        # Joint fwd/bwd recurrence over the stacked (Q | S) rows, writing each
        # step's hidden state as a time-major, sublane/lane-dense slab.
        whh = whh_ref[...]                # compute_dtype (pre-cast in wrapper)
        bhh = bhh_ref[...]                # f32

        split_whh = rows >= _SPLIT_WHH_MIN_ROWS
        if split_whh:
            # Two (rows, H) @ (H, 3H) matmuls: half the MACs of the
            # block-diagonal form and no per-step lane concat.
            whh_f, whh_b = whh[:H, :H3], whh[H:, H3:]
            bhh_f, bhh_b = bhh[:, :H3], bhh[:, H3:]

        def bigru_step(i, h):
            gi_f = gi_ref[i, :, :H3].astype(f32)
            gi_b = gi_ref[T - 1 - i, :, H3:].astype(f32)
            if split_whh:
                h_f, h_b = h
                gh_f = jnp.dot(h_f.astype(cd), whh_f,
                               preferred_element_type=f32) + bhh_f
                gh_b = jnp.dot(h_b.astype(cd), whh_b,
                               preferred_element_type=f32) + bhh_b
                nh_f = _gru_gates(gi_f, gh_f, h_f, H)
                nh_b = _gru_gates(gi_b, gh_b, h_b, H)
                new_h = (nh_f, nh_b)
            else:
                gh = jnp.dot(h.astype(cd), whh,
                             preferred_element_type=f32) + bhh
                nh_f = _gru_gates(gi_f, gh[:, :H3], h[:, :H], H)
                nh_b = _gru_gates(gi_b, gh[:, H3:], h[:, H:], H)
                new_h = jnp.concatenate([nh_f, nh_b], axis=-1)
            f_ref[i, :, :H] = nh_f.astype(f_ref.dtype)           # fwd @ time i
            f_ref[T - 1 - i, :, H:] = nh_b.astype(f_ref.dtype)   # bwd @ T-1-i
            return new_h

        if split_whh:
            h0 = (jnp.zeros((rows, H), f32), jnp.zeros((rows, H), f32))
        else:
            h0 = jnp.zeros((rows, E), f32)
        if T <= _UNROLL_MAX_STEPS:
            h = h0
            for i in range(T):
                h = bigru_step(i, h)
        else:
            lax.fori_loop(0, T, bigru_step, h0, unroll=_FORI_UNROLL)

        # --------------------------------------------------------- phase 3
        # Attention alignment, tiled over the support time axis.  softmax is
        # along the query axis (torch softmax(dim=-1)) so each support chunk
        # normalizes independently; Hm accumulates over chunks.
        q_store = f_ref[:, :bb, :]        # (T, bb, E) read from scratch ref
        q_cd = q_store.astype(cd)
        w_aln = waln_ref[...]             # compute_dtype (pre-cast in wrapper)
        b_aln = baln_ref[...]             # (1, E) f32

        hm = jnp.zeros((bb, T, E), f32)
        for ci in range(T // ts_chunk):   # static chunk loop (small count)
            s0 = ci * ts_chunk
            s_cd = f_ref[s0:s0 + ts_chunk, bb:, :].astype(cd)    # (tsc, bb, E)
            sw = (jnp.dot(s_cd.reshape(ts_chunk * bb, E), w_aln,
                          preferred_element_type=f32)
                  .reshape(ts_chunk, bb, E) + b_aln)
            scores = jnp.einsum('sbf,qbf->bsq', sw.astype(cd), q_cd,
                                preferred_element_type=f32)      # (bb,tsc,Tq)
            scores = jnp.exp(scores - jnp.max(scores, axis=-1, keepdims=True))
            scores = scores * pl.reciprocal(
                jnp.sum(scores, axis=-1, keepdims=True), approx=True)
            hm = hm + jnp.einsum('bsq,sbe->bqe', scores.astype(cd), s_cd,
                                 preferred_element_type=f32)
        hm = jnp.transpose(hm, (1, 0, 2))  # single relayout -> (T, bb, E)

        # --------------------------------------------------------- phase 4
        # EucCos features in time-major layout (feeds phase 5 directly).
        qf = q_store.astype(f32)
        dot_qh = jnp.sum(qf * hm, axis=-1)      # (T, bb)
        nq2 = jnp.sum(qf * qf, axis=-1)
        nh2 = jnp.sum(hm * hm, axis=-1)
        # cosine with per-norm eps clamp (matches torch); divides on the EUP.
        cos = (dot_qh * lax.rsqrt(jnp.maximum(nq2, eps * eps))
               * lax.rsqrt(jnp.maximum(nh2, eps * eps)))
        euc = jnp.sqrt(jnp.maximum(nq2 + nh2 - 2.0 * dot_qh, 0.0))

        # --------------------------------------------------------- phase 5
        # dml GRU over the 2-feature sequence [cos, euc]; the input projection
        # is two broadcast multiplies (no K=2 matmul), stored time-major.
        dwih = dwih_ref[...]                     # (2, 3*Hd) f32
        gdml_ref[...] = (cos[:, :, None] * dwih[0:1].reshape(1, 1, Hd3)
                         + euc[:, :, None] * dwih[1:2].reshape(1, 1, Hd3)
                         + dbih_ref[...].reshape(1, 1, Hd3)
                         ).astype(gdml_ref.dtype)

        dwhh = dwhh_ref[...]                     # compute_dtype
        dbhh = dbhh_ref[...]

        def dml_step(t, hd):
            gh = jnp.dot(hd.astype(cd), dwhh,
                         preferred_element_type=f32) + dbhh
            return _gru_gates(gdml_ref[t].astype(f32), gh, hd, Hd)

        hd = jnp.zeros((bb, Hd), f32)
        if T <= _UNROLL_MAX_STEPS:
            for t in range(T):
                hd = dml_step(t, hd)
        else:
            hd = lax.fori_loop(0, T, dml_step, hd, unroll=_FORI_UNROLL)

        # --------------------------------------------------------- phase 6
        logits = (jnp.sum(hd * fcw_ref[...], axis=-1, keepdims=True)
                  + fcb_ref[...])
        o_ref[...] = jax.nn.sigmoid(logits)      # (bb, 1)


def _fuse_bigru_params(p, hidden):
    """Pack the two GRU directions: fused (Din, 6H) input weight and a
    block-diagonal (2H, 6H) recurrent weight (the kernel slices the diagonal
    blocks back out when it runs the split per-direction matmuls)."""
    H = hidden
    zeros = jnp.zeros((H, 3 * H), jnp.float32)
    return {
        'wih6': jnp.concatenate([p['wih_f'], p['wih_b']], axis=1),
        'bih6': jnp.concatenate([p['bih_f'], p['bih_b']], axis=1),
        'whh6': jnp.concatenate(
            [jnp.concatenate([p['whh_f'], zeros], axis=1),
             jnp.concatenate([zeros, p['whh_b']], axis=1)], axis=0),
        'bhh6': jnp.concatenate([p['bhh_f'], p['bhh_b']], axis=1),
    }


def _pick_chunk(total, cap):
    """Largest divisor of `total` that is <= cap (>= 1)."""
    c = max(1, min(int(total), int(cap)))
    while total % c:
        c -= 1
    return c


def tarn_forward(params, c3d_feat_Q, lns_Q, c3d_feat_S, lns_S,
                 feats_hidden, dml_hidden, *,
                 batch_block=None, time_block=None, support_block=None,
                 compute_dtype=jnp.float32):
    """Fused TARN forward.

    compute_dtype=jnp.bfloat16 runs all large matmuls with bf16 inputs and f32
    accumulation and stores the big gi/f/gdml scratch in bf16 (recommended on
    v6e/v7x at production shapes); hidden states and gate math stay f32.
    """
    # TODO(synk): variable-length masking (lns_Q, lns_S) is not implemented;
    # every sequence is assumed to use its full padded length.
    del lns_Q, lns_S
    B, Tq, d_in = c3d_feat_Q.shape
    Bs, Ts, d_in_s = c3d_feat_S.shape
    assert B == Bs and d_in == d_in_s
    # TODO(synk): Tq != Ts needs padding + masking before the fused Q|S batch
    # recurrence; equal (full) lengths are assumed here.
    assert Tq == Ts
    T, H, Hd = Tq, feats_hidden, dml_hidden

    # Batch block: rows = 2*bb per kernel step.  Heuristic targets rows >= 256
    # (fills the 256-wide MXU M dimension on v6e/v7x) while keeping >= 2 grid
    # steps so the "parallel" batch axis shards across v7x's two TensorCores.
    if batch_block is None:
        bb = B
        if B % 8 == 0:
            for cand in (256, 128):
                if B % cand == 0 and B // cand >= 2:
                    bb = cand
                    break
    else:
        bb = batch_block
    assert B % bb == 0 and (bb == B or bb % 8 == 0), \
        "batch_block must equal B or be a multiple of 8 (TPU sublane tiling)"
    nB = B // bb

    # Time chunk for the streamed phase-1 projection (bounds resident x block)
    # and support chunk for the tiled attention scores.
    t_chunk = _pick_chunk(T, 64 if time_block is None else time_block)
    ts_chunk = _pick_chunk(T, 128 if support_block is None else support_block)

    cd = compute_dtype
    storage_dtype = cd          # gi / f / gdml scratch dtype

    fused = _fuse_bigru_params(params, H)
    # Pre-cast the big matmul operands once in the wrapper (halves resident
    # VMEM / DMA for them in bf16 and removes per-grid-step in-kernel casts).
    wih6 = fused['wih6'].astype(cd)          # (Din, 6H)
    whh6 = fused['whh6'].astype(cd)          # (2H, 6H)
    w_aln = params['w_align'].astype(cd)     # (E, E)
    dwhh = params['dwhh'].astype(cd)         # (Hd, 3Hd)

    # Stack query & support batches so each grid block reads ONE contiguous
    # (t_chunk, 2*bb, Din) slab whose rows are [Q block rows | S block rows]
    # (time-major).  Pure layout plumbing; removes the in-kernel concat and
    # the strided gi rearrangement stores entirely.
    xq_tm = jnp.transpose(c3d_feat_Q, (1, 0, 2)).reshape(T, nB, 1, bb, d_in)
    xs_tm = jnp.transpose(c3d_feat_S, (1, 0, 2)).reshape(T, nB, 1, bb, d_in)
    x_all = jnp.concatenate([xq_tm, xs_tm], axis=2).reshape(T, 2 * B, d_in)
    x_all = x_all.astype(cd)

    weights = (wih6, whh6, fused['bih6'], fused['bhh6'],
               w_aln, params['bias_align'],
               params['dwih'], dwhh, params['dbih'], params['dbhh'],
               params['fcw'], params['fcb'])

    def resident_spec(arr):
        # Constant index_map keeps weights VMEM-resident across grid steps.
        # TODO(synk): add pipeline_mode=pl.Buffered(1) here (single-buffered
        # resident weights) to reclaim ~1x wih6 of VMEM on v7x.
        n = arr.ndim
        return pl.BlockSpec(arr.shape, lambda i, t, _n=n: (0,) * _n)

    in_specs = ([pl.BlockSpec((t_chunk, 2 * bb, d_in), lambda i, t: (t, i, 0))]
                + [resident_spec(w) for w in weights])

    scratch_shapes = [
        pltpu.VMEM((T, 2 * bb, 6 * H), storage_dtype),   # gi: gate pre-acts
        pltpu.VMEM((T, 2 * bb, 2 * H), storage_dtype),   # f : BiGRU outputs
        pltpu.VMEM((T, bb, 3 * Hd), storage_dtype),      # dml gate pre-acts
    ]

    # Explicit VMEM budget from the real block + scratch sum (double-buffered
    # inputs).  Note: at production shapes on v7x (64 MiB physical) this must
    # land <= ~56 MiB -> use compute_dtype=bf16 and a smaller time_block.
    def _nbytes(shape, dtype):
        n = 1
        for s in shape:
            n *= int(s)
        return n * np.dtype(dtype).itemsize

    est = 2 * _nbytes((t_chunk, 2 * bb, d_in), cd)
    est += sum(2 * int(w.size) * np.dtype(w.dtype).itemsize for w in weights)
    est += 2 * _nbytes((bb, 1), jnp.float32)
    est += _nbytes((T, 2 * bb, 6 * H), storage_dtype)
    est += _nbytes((T, 2 * bb, 2 * H), storage_dtype)
    est += _nbytes((T, bb, 3 * Hd), storage_dtype)
    vmem_limit = int(min(max(est + (16 << 20), 32 << 20), 100 << 20))

    kernel = functools.partial(_tarn_kernel, ts_chunk=ts_chunk, eps=1e-6,
                               compute_dtype=cd)

    return pl.pallas_call(
        kernel,
        out_shape=jax.ShapeDtypeStruct((B, 1), jnp.float32),
        grid=(nB, T // t_chunk),
        in_specs=in_specs,
        out_specs=pl.BlockSpec((bb, 1), lambda i, t: (i, 0)),
        scratch_shapes=scratch_shapes,
        compiler_params=pltpu.CompilerParams(
            # batch blocks are independent -> megacore on v7x; time chunks
            # carry the gi scratch -> arbitrary.
            dimension_semantics=("parallel", "arbitrary"),
            vmem_limit_bytes=vmem_limit),
    )(x_all, *weights)


def init_params(key, input_size, feats_hidden, dml_hidden):
    e = 2 * feats_hidden
    ks = jax.random.split(key, 12)

    def u(k, shape, fan):
        bound = 1.0 / float(jnp.sqrt(fan))
        return jax.random.uniform(k, shape, jnp.float32, -bound, bound)

    return {
        # bidirectional feats GRU (weights stored [in, 3H], gate order r|z|n)
        'wih_f': u(ks[0], (input_size, 3 * feats_hidden), feats_hidden),
        'whh_f': u(ks[1], (feats_hidden, 3 * feats_hidden), feats_hidden),
        'bih_f': u(ks[2], (1, 3 * feats_hidden), feats_hidden),
        'bhh_f': u(ks[3], (1, 3 * feats_hidden), feats_hidden),
        'wih_b': u(ks[4], (input_size, 3 * feats_hidden), feats_hidden),
        'whh_b': u(ks[5], (feats_hidden, 3 * feats_hidden), feats_hidden),
        'bih_b': u(ks[6], (1, 3 * feats_hidden), feats_hidden),
        'bhh_b': u(ks[7], (1, 3 * feats_hidden), feats_hidden),
        # attention projection W = Linear(e, e, bias=False), pre-transposed,
        # plus the additive bias parameter (initialized to ones in the module)
        'w_align': u(ks[8], (e, e), e),
        'bias_align': jnp.ones((1, e), jnp.float32),
        # dml GRU (input size d = 2 for sim_type == 'EucCos')
        'dwih': u(ks[9], (2, 3 * dml_hidden), dml_hidden),
        'dwhh': u(ks[10], (dml_hidden, 3 * dml_hidden), dml_hidden),
        'dbih': jnp.zeros((1, 3 * dml_hidden), jnp.float32),
        'dbhh': jnp.zeros((1, 3 * dml_hidden), jnp.float32),
        # dml_fc: Linear(dml_hidden, 1); weight stored as (1, Hd)
        'fcw': u(ks[11], (1, dml_hidden), dml_hidden),
        'fcb': jnp.zeros((1, 1), jnp.float32),
    }


if __name__ == "__main__":
    B, Tq, Ts = 2, 8, 8
    input_size, feats_hidden, dml_hidden = 32, 16, 16

    key = jax.random.PRNGKey(0)
    kp, kq, ksup = jax.random.split(key, 3)
    params = init_params(kp, input_size, feats_hidden, dml_hidden)

    c3d_feat_Q = jax.random.normal(kq, (B, Tq, input_size), jnp.float32)
    c3d_feat_S = jax.random.normal(ksup, (B, Ts, input_size), jnp.float32)
    lns_Q = [Tq] * B
    lns_S = [Ts] * B

    q_kc = tarn_forward(params, c3d_feat_Q, lns_Q, c3d_feat_S, lns_S,
                        feats_hidden, dml_hidden)
    q_kc = jax.block_until_ready(q_kc)

    assert q_kc.shape == (B, 1), q_kc.shape
    assert bool(jnp.all(jnp.isfinite(q_kc)))
    assert bool(jnp.all((q_kc > 0.0) & (q_kc < 1.0)))   # sigmoid output range
    print("KERNEL_OK")
</pallas_src>

<mosaic_0001>
module attributes {stable_mosaic.version = 11 : i64} {
  func.func @_tarn_kernel(%arg0: i32, %arg1: i32, %arg2: memref<8x4x32xf32, #tpu.memory_space<vmem>>, %arg3: memref<32x96xf32, #tpu.memory_space<vmem>>, %arg4: memref<32x96xf32, #tpu.memory_space<vmem>>, %arg5: memref<1x96xf32, #tpu.memory_space<vmem>>, %arg6: memref<1x96xf32, #tpu.memory_space<vmem>>, %arg7: memref<32x32xf32, #tpu.memory_space<vmem>>, %arg8: memref<1x32xf32, #tpu.memory_space<vmem>>, %arg9: memref<2x48xf32, #tpu.memory_space<vmem>>, %arg10: memref<16x48xf32, #tpu.memory_space<vmem>>, %arg11: memref<1x48xf32, #tpu.memory_space<vmem>>, %arg12: memref<1x48xf32, #tpu.memory_space<vmem>>, %arg13: memref<1x16xf32, #tpu.memory_space<vmem>>, %arg14: memref<1x1xf32, #tpu.memory_space<vmem>>, %arg15: memref<2x1xf32, #tpu.memory_space<vmem>>, %arg16: memref<8x4x96xf32, #tpu.memory_space<vmem>>, %arg17: memref<8x4x32xf32, #tpu.memory_space<vmem>>, %arg18: memref<8x2x48xf32, #tpu.memory_space<vmem>>) attributes {dimension_semantics = [#tpu.dimension_semantics<parallel>, #tpu.dimension_semantics<arbitrary>], iteration_bounds = array<i64: 1, 1>, scalar_prefetch = 0 : i64, scratch_operands = 3 : i64, tpu.core_type = #tpu.core_type<tc>, window_params = [{transform_indices = @transform_0, window_bounds = array<i64: 8, 4, 32>}, {pipeline_mode = #tpu.pipeline_mode<synchronous>, transform_indices = @transform_1, window_bounds = array<i64: 32, 96>}, {pipeline_mode = #tpu.pipeline_mode<synchronous>, transform_indices = @transform_2, window_bounds = array<i64: 32, 96>}, {pipeline_mode = #tpu.pipeline_mode<synchronous>, transform_indices = @transform_3, window_bounds = array<i64: 1, 96>}, {pipeline_mode = #tpu.pipeline_mode<synchronous>, transform_indices = @transform_4, window_bounds = array<i64: 1, 96>}, {pipeline_mode = #tpu.pipeline_mode<synchronous>, transform_indices = @transform_5, window_bounds = array<i64: 32, 32>}, {pipeline_mode = #tpu.pipeline_mode<synchronous>, transform_indices = @transform_6, window_bounds = array<i64: 1, 32>}, {pipeline_mode = #tpu.pipeline_mode<synchronous>, transform_indices = @transform_7, window_bounds = array<i64: 2, 48>}, {pipeline_mode = #tpu.pipeline_mode<synchronous>, transform_indices = @transform_8, window_bounds = array<i64: 16, 48>}, {pipeline_mode = #tpu.pipeline_mode<synchronous>, transform_indices = @transform_9, window_bounds = array<i64: 1, 48>}, {pipeline_mode = #tpu.pipeline_mode<synchronous>, transform_indices = @transform_10, window_bounds = array<i64: 1, 48>}, {pipeline_mode = #tpu.pipeline_mode<synchronous>, transform_indices = @transform_11, window_bounds = array<i64: 1, 16>}, {pipeline_mode = #tpu.pipeline_mode<synchronous>, transform_indices = @transform_12, window_bounds = array<i64: 1, 1>}, {transform_indices = @transform_13, window_bounds = array<i64: 2, 1>}]} {
    %c8_i32 = arith.constant 8 : i32
    %0 = arith.muli %arg1, %c8_i32 : i32
    %1 = tpu.assume_multiple %0, 8 : i32
    %c0 = arith.constant 0 : index
    %c0_0 = arith.constant 0 : index
    %c0_1 = arith.constant 0 : index
    %2 = vector.load %arg2[%c0, %c0_0, %c0_1] : memref<8x4x32xf32, #tpu.memory_space<vmem>>, vector<8x4x32xf32>
    %3 = vector.shape_cast %2 : vector<8x4x32xf32> to vector<32x32xf32>
    %c0_2 = arith.constant 0 : index
    %c0_3 = arith.constant 0 : index
    %4 = vector.load %arg3[%c0_2, %c0_3] : memref<32x96xf32, #tpu.memory_space<vmem>>, vector<32x96xf32>
    %cst = arith.constant dense<0.000000e+00> : vector<32x96xf32>
    %5 = tpu.matmul %3, %4, %cst {dimension_numbers = #tpu.dot_dimension_numbers<[1], [0], [0], [1], [0, 0, 1, 1], [], []>} : vector<32x32xf32>, vector<32x96xf32>, vector<32x96xf32> -> vector<32x96xf32>
    %c0_4 = arith.constant 0 : index
    %c0_5 = arith.constant 0 : index
    %6 = vector.load %arg5[%c0_4, %c0_5] : memref<1x96xf32, #tpu.memory_space<vmem>>, vector<1x96xf32>
    %7 = vector.broadcast %6 : vector<1x96xf32> to vector<32x96xf32>
    %8 = arith.addf %5, %7 : vector<32x96xf32>
    %9 = vector.shape_cast %8 : vector<32x96xf32> to vector<8x4x96xf32>
    %10 = arith.index_cast %1 : i32 to index
    %c0_6 = arith.constant 0 : index
    %c0_7 = arith.constant 0 : index
    %11 = vector.load %arg16[%10, %c0_6, %c0_7] : memref<8x4x96xf32, #tpu.memory_space<vmem>>, vector<8x4x96xf32>
    tpu.vector_store %arg16[%10, %c0_6, %c0_7], %9 {strides = array<i32>} : memref<8x4x96xf32, #tpu.memory_space<vmem>>, vector<8x4x96xf32>,
    %c0_i32 = arith.constant 0 : i32
    %12 = arith.cmpi eq, %arg1, %c0_i32 : i32
    %13 = arith.extui %12 : i1 to i32
    %c0_i32_8 = arith.constant 0 : i32
    %14 = arith.cmpi ne, %13, %c0_i32_8 : i32
    scf.if %14 {
      %c0_9 = arith.constant 0 : index
      %c0_10 = arith.constant 0 : index
      %15 = vector.load %arg4[%c0_9, %c0_10] : memref<32x96xf32, #tpu.memory_space<vmem>>, vector<32x96xf32>
      %c0_11 = arith.constant 0 : index
      %c0_12 = arith.constant 0 : index
      %16 = vector.load %arg6[%c0_11, %c0_12] : memref<1x96xf32, #tpu.memory_space<vmem>>, vector<1x96xf32>
      %cst_13 = arith.constant 0.000000e+00 : f32
      %17 = vector.broadcast %cst_13 : f32 to vector<4x32xf32>
      %c0_14 = arith.constant 0 : index
      %c0_15 = arith.constant 0 : index
      %c0_16 = arith.constant 0 : index
      %18 = vector.load %arg16[%c0_14, %c0_15, %c0_16] : memref<8x4x96xf32, #tpu.memory_space<vmem>>, vector<1x4x48xf32>
      %19 = vector.shape_cast %18 : vector<1x4x48xf32> to vector<4x48xf32>
      %c7 = arith.constant 7 : index
      %c0_17 = arith.constant 0 : index
      %c48 = arith.constant 48 : index
      %20 = vector.load %arg16[%c7, %c0_17, %c48] : memref<8x4x96xf32, #tpu.memory_space<vmem>>, vector<1x4x48xf32>
      %21 = vector.shape_cast %20 : vector<1x4x48xf32> to vector<4x48xf32>
      %cst_18 = arith.constant dense<0.000000e+00> : vector<4x96xf32>
      %22 = tpu.matmul %17, %15, %cst_18 {dimension_numbers = #tpu.dot_dimension_numbers<[1], [0], [0], [1], [0, 0, 1, 1], [], []>} : vector<4x32xf32>, vector<32x96xf32>, vector<4x96xf32> -> vector<4x96xf32>
      %23 = vector.broadcast %16 : vector<1x96xf32> to vector<4x96xf32>
      %24 = arith.addf %22, %23 : vector<4x96xf32>
      %25 = vector.extract_strided_slice %24 {offsets = [0, 0], sizes = [4, 48], strides = [1, 1]} : vector<4x96xf32> to vector<4x48xf32>
      %26 = vector.extract_strided_slice %17 {offsets = [0, 0], sizes = [4, 16], strides = [1, 1]} : vector<4x32xf32> to vector<4x16xf32>
      %27 = vector.extract_strided_slice %19 {offsets = [0, 0], sizes = [4, 16], strides = [1, 1]} : vector<4x48xf32> to vector<4x16xf32>
      %28 = vector.extract_strided_slice %25 {offsets = [0, 0], sizes = [4, 16], strides = [1, 1]} : vector<4x48xf32> to vector<4x16xf32>
      %29 = arith.addf %27, %28 : vector<4x16xf32>
      %30 = arith.negf %29 : vector<4x16xf32>
      %31 = math.exp %30 : vector<4x16xf32>
      %cst_19 = arith.constant 1.000000e+00 : f32
      %32 = vector.broadcast %cst_19 : f32 to vector<4x16xf32>
      %33 = arith.addf %32, %31 : vector<4x16xf32>
      %34 = arith.divf %32, %33 : vector<4x16xf32>
      %35 = vector.extract_strided_slice %19 {offsets = [0, 16], sizes = [4, 16], strides = [1, 1]} : vector<4x48xf32> to vector<4x16xf32>
      %36 = vector.extract_strided_slice %25 {offsets = [0, 16], sizes = [4, 16], strides = [1, 1]} : vector<4x48xf32> to vector<4x16xf32>
      %37 = arith.addf %35, %36 : vector<4x16xf32>
      %38 = arith.negf %37 : vector<4x16xf32>
      %39 = math.exp %38 : vector<4x16xf32>
      %cst_20 = arith.constant 1.000000e+00 : f32
      %40 = vector.broadcast %cst_20 : f32 to vector<4x16xf32>
      %41 = arith.addf %40, %39 : vector<4x16xf32>
      %42 = arith.divf %40, %41 : vector<4x16xf32>
      %43 = vector.extract_strided_slice %19 {offsets = [0, 32], sizes = [4, 16], strides = [1, 1]} : vector<4x48xf32> to vector<4x16xf32>
      %44 = vector.extract_strided_slice %25 {offsets = [0, 32], sizes = [4, 16], strides = [1, 1]} : vector<4x48xf32> to vector<4x16xf32>
      %45 = arith.mulf %34, %44 : vector<4x16xf32>
      %46 = arith.addf %43, %45 : vector<4x16xf32>
      %47 = math.tanh %46 : vector<4x16xf32>
      %cst_21 = arith.constant 1.000000e+00 : f32
      %48 = vector.broadcast %cst_21 : f32 to vector<4x16xf32>
      %49 = arith.subf %48, %42 : vector<4x16xf32>
      %50 = arith.mulf %49, %47 : vector<4x16xf32>
      %51 = arith.mulf %42, %26 : vector<4x16xf32>
      %52 = arith.addf %50, %51 : vector<4x16xf32>
      %53 = vector.extract_strided_slice %24 {offsets = [0, 48], sizes = [4, 48], strides = [1, 1]} : vector<4x96xf32> to vector<4x48xf32>
      %54 = vector.extract_strided_slice %17 {offsets = [0, 16], sizes = [4, 16], strides = [1, 1]} : vector<4x32xf32> to vector<4x16xf32>
      %55 = vector.extract_strided_slice %21 {offsets = [0, 0], sizes = [4, 16], strides = [1, 1]} : vector<4x48xf32> to vector<4x16xf32>
      %56 = vector.extract_strided_slice %53 {offsets = [0, 0], sizes = [4, 16], strides = [1, 1]} : vector<4x48xf32> to vector<4x16xf32>
      %57 = arith.addf %55, %56 : vector<4x16xf32>
      %58 = arith.negf %57 : vector<4x16xf32>
      %59 = math.exp %58 : vector<4x16xf32>
      %cst_22 = arith.constant 1.000000e+00 : f32
      %60 = vector.broadcast %cst_22 : f32 to vector<4x16xf32>
      %61 = arith.addf %60, %59 : vector<4x16xf32>
      %62 = arith.divf %60, %61 : vector<4x16xf32>
      %63 = vector.extract_strided_slice %21 {offsets = [0, 16], sizes = [4, 16], strides = [1, 1]} : vector<4x48xf32> to vector<4x16xf32>
      %64 = vector.extract_strided_slice %53 {offsets = [0, 16], sizes = [4, 16], strides = [1, 1]} : vector<4x48xf32> to vector<4x16xf32>
      %65 = arith.addf %63, %64 : vector<4x16xf32>
      %66 = arith.negf %65 : vector<4x16xf32>
      %67 = math.exp %66 : vector<4x16xf32>
      %cst_23 = arith.constant 1.000000e+00 : f32
      %68 = vector.broadcast %cst_23 : f32 to vector<4x16xf32>
      %69 = arith.addf %68, %67 : vector<4x16xf32>
      %70 = arith.divf %68, %69 : vector<4x16xf32>
      %71 = vector.extract_strided_slice %21 {offsets = [0, 32], sizes = [4, 16], strides = [1, 1]} : vector<4x48xf32> to vector<4x16xf32>
      %72 = vector.extract_strided_slice %53 {offsets = [0, 32], sizes = [4, 16], strides = [1, 1]} : vector<4x48xf32> to vector<4x16xf32>
      %73 = arith.mulf %62, %72 : vector<4x16xf32>
      %74 = arith.addf %71, %73 : vector<4x16xf32>
      %75 = math.tanh %74 : vector<4x16xf32>
      %cst_24 = arith.constant 1.000000e+00 : f32
      %76 = vector.broadcast %cst_24 : f32 to vector<4x16xf32>
      %77 = arith.subf %76, %70 : vector<4x16xf32>
      %78 = arith.mulf %77, %75 : vector<4x16xf32>
      %79 = arith.mulf %70, %54 : vector<4x16xf32>
      %80 = arith.addf %78, %79 : vector<4x16xf32>
      %81 = tpu.concatenate %52, %80 in 1 : vector<4x16xf32>, vector<4x16xf32> -> vector<4x32xf32>
      %c0_25 = arith.constant 0 : index
      %c0_26 = arith.constant 0 : index
      %c0_27 = arith.constant 0 : index
      %82 = vector.load %arg17[%c0_25, %c0_26, %c0_27] : memref<8x4x32xf32, #tpu.memory_space<vmem>>, vector<1x4x16xf32>
      %83 = vector.shape_cast %82 : vector<1x4x16xf32> to vector<4x16xf32>
      %84 = vector.shape_cast %52 : vector<4x16xf32> to vector<1x4x16xf32>
      tpu.vector_store %arg17[%c0_25, %c0_26, %c0_27], %84 {strides = array<i32>} : memref<8x4x32xf32, #tpu.memory_space<vmem>>, vector<1x4x16xf32>,
      %c7_28 = arith.constant 7 : index
      %c0_29 = arith.constant 0 : index
      %c16 = arith.constant 16 : index
      %85 = vector.load %arg17[%c7_28, %c0_29, %c16] : memref<8x4x32xf32, #tpu.memory_space<vmem>>, vector<1x4x16xf32>
      %86 = vector.shape_cast %85 : vector<1x4x16xf32> to vector<4x16xf32>
      %87 = vector.shape_cast %80 : vector<4x16xf32> to vector<1x4x16xf32>
      tpu.vector_store %arg17[%c7_28, %c0_29, %c16], %87 {strides = array<i32>} : memref<8x4x32xf32, #tpu.memory_space<vmem>>, vector<1x4x16xf32>,
      %c1 = arith.constant 1 : index
      %c0_30 = arith.constant 0 : index
      %c0_31 = arith.constant 0 : index
      %88 = vector.load %arg16[%c1, %c0_30, %c0_31] : memref<8x4x96xf32, #tpu.memory_space<vmem>>, vector<1x4x48xf32>
      %89 = vector.shape_cast %88 : vector<1x4x48xf32> to vector<4x48xf32>
      %c6 = arith.constant 6 : index
      %c0_32 = arith.constant 0 : index
      %c48_33 = arith.constant 48 : index
      %90 = vector.load %arg16[%c6, %c0_32, %c48_33] : memref<8x4x96xf32, #tpu.memory_space<vmem>>, vector<1x4x48xf32>
      %91 = vector.shape_cast %90 : vector<1x4x48xf32> to vector<4x48xf32>
      %cst_34 = arith.constant dense<0.000000e+00> : vector<4x96xf32>
      %92 = tpu.matmul %81, %15, %cst_34 {dimension_numbers = #tpu.dot_dimension_numbers<[1], [0], [0], [1], [0, 0, 1, 1], [], []>} : vector<4x32xf32>, vector<32x96xf32>, vector<4x96xf32> -> vector<4x96xf32>
      %93 = vector.broadcast %16 : vector<1x96xf32> to vector<4x96xf32>
      %94 = arith.addf %92, %93 : vector<4x96xf32>
      %95 = vector.extract_strided_slice %94 {offsets = [0, 0], sizes = [4, 48], strides = [1, 1]} : vector<4x96xf32> to vector<4x48xf32>
      %96 = vector.extract_strided_slice %81 {offsets = [0, 0], sizes = [4, 16], strides = [1, 1]} : vector<4x32xf32> to vector<4x16xf32>
      %97 = vector.extract_strided_slice %89 {offsets = [0, 0], sizes = [4, 16], strides = [1, 1]} : vector<4x48xf32> to vector<4x16xf32>
      %98 = vector.extract_strided_slice %95 {offsets = [0, 0], sizes = [4, 16], strides = [1, 1]} : vector<4x48xf32> to vector<4x16xf32>
      %99 = arith.addf %97, %98 : vector<4x16xf32>
      %100 = arith.negf %99 : vector<4x16xf32>
      %101 = math.exp %100 : vector<4x16xf32>
      %cst_35 = arith.constant 1.000000e+00 : f32
      %102 = vector.broadcast %cst_35 : f32 to vector<4x16xf32>
      %103 = arith.addf %102, %101 : vector<4x16xf32>
      %104 = arith.divf %102, %103 : vector<4x16xf32>
      %105 = vector.extract_strided_slice %89 {offsets = [0, 16], sizes = [4, 16], strides = [1, 1]} : vector<4x48xf32> to vector<4x16xf32>
      %106 = vector.extract_strided_slice %95 {offsets = [0, 16], sizes = [4, 16], strides = [1, 1]} : vector<4x48xf32> to vector<4x16xf32>
      %107 = arith.addf %105, %106 : vector<4x16xf32>
      %108 = arith.negf %107 : vector<4x16xf32>
      %109 = math.exp %108 : vector<4x16xf32>
      %cst_36 = arith.constant 1.000000e+00 : f32
      %110 = vector.broadcast %cst_36 : f32 to vector<4x16xf32>
      %111 = arith.addf %110, %109 : vector<4x16xf32>
      %112 = arith.divf %110, %111 : vector<4x16xf32>
      %113 = vector.extract_strided_slice %89 {offsets = [0, 32], sizes = [4, 16], strides = [1, 1]} : vector<4x48xf32> to vector<4x16xf32>
      %114 = vector.extract_strided_slice %95 {offsets = [0, 32], sizes = [4, 16], strides = [1, 1]} : vector<4x48xf32> to vector<4x16xf32>
      %115 = arith.mulf %104, %114 : vector<4x16xf32>
      %116 = arith.addf %113, %115 : vector<4x16xf32>
      %117 = math.tanh %116 : vector<4x16xf32>
      %cst_37 = arith.constant 1.000000e+00 : f32
      %118 = vector.broadcast %cst_37 : f32 to vector<4x16xf32>
      %119 = arith.subf %118, %112 : vector<4x16xf32>
      %120 = arith.mulf %119, %117 : vector<4x16xf32>
      %121 = arith.mulf %112, %96 : vector<4x16xf32>
      %122 = arith.addf %120, %121 : vector<4x16xf32>
      %123 = vector.extract_strided_slice %94 {offsets = [0, 48], sizes = [4, 48], strides = [1, 1]} : vector<4x96xf32> to vector<4x48xf32>
      %124 = vector.extract_strided_slice %81 {offsets = [0, 16], sizes = [4, 16], strides = [1, 1]} : vector<4x32xf32> to vector<4x16xf32>
      %125 = vector.extract_strided_slice %91 {offsets = [0, 0], sizes = [4, 16], strides = [1, 1]} : vector<4x48xf32> to vector<4x16xf32>
      %126 = vector.extract_strided_slice %123 {offsets = [0, 0], sizes = [4, 16], strides = [1, 1]} : vector<4x48xf32> to vector<4x16xf32>
      %127 = arith.addf %125, %126 : vector<4x16xf32>
      %128 = arith.negf %127 : vector<4x16xf32>
      %129 = math.exp %128 : vector<4x16xf32>
      %cst_38 = arith.constant 1.000000e+00 : f32
      %130 = vector.broadcast %cst_38 : f32 to vector<4x16xf32>
      %131 = arith.addf %130, %129 : vector<4x16xf32>
      %132 = arith.divf %130, %131 : vector<4x16xf32>
      %133 = vector.extract_strided_slice %91 {offsets = [0, 16], sizes = [4, 16], strides = [1, 1]} : vector<4x48xf32> to vector<4x16xf32>
      %134 = vector.extract_strided_slice %123 {offsets = [0, 16], sizes = [4, 16], strides = [1, 1]} : vector<4x48xf32> to vector<4x16xf32>
      %135 = arith.addf %133, %134 : vector<4x16xf32>
      %136 = arith.negf %135 : vector<4x16xf32>
      %137 = math.exp %136 : vector<4x16xf32>
      %cst_39 = arith.constant 1.000000e+00 : f32
      %138 = vector.broadcast %cst_39 : f32 to vector<4x16xf32>
      %139 = arith.addf %138, %137 : vector<4x16xf32>
      %140 = arith.divf %138, %139 : vector<4x16xf32>
      %141 = vector.extract_strided_slice %91 {offsets = [0, 32], sizes = [4, 16], strides = [1, 1]} : vector<4x48xf32> to vector<4x16xf32>
      %142 = vector.extract_strided_slice %123 {offsets = [0, 32], sizes = [4, 16], strides = [1, 1]} : vector<4x48xf32> to vector<4x16xf32>
      %143 = arith.mulf %132, %142 : vector<4x16xf32>
      %144 = arith.addf %141, %143 : vector<4x16xf32>
      %145 = math.tanh %144 : vector<4x16xf32>
      %cst_40 = arith.constant 1.000000e+00 : f32
      %146 = vector.broadcast %cst_40 : f32 to vector<4x16xf32>
      %147 = arith.subf %146, %140 : vector<4x16xf32>
      %148 = arith.mulf %147, %145 : vector<4x16xf32>
      %149 = arith.mulf %140, %124 : vector<4x16xf32>
      %150 = arith.addf %148, %149 : vector<4x16xf32>
      %151 = tpu.concatenate %122, %150 in 1 : vector<4x16xf32>, vector<4x16xf32> -> vector<4x32xf32>
      %c1_41 = arith.constant 1 : index
      %c0_42 = arith.constant 0 : index
      %c0_43 = arith.constant 0 : index
      %152 = vector.load %arg17[%c1_41, %c0_42, %c0_43] : memref<8x4x32xf32, #tpu.memory_space<vmem>>, vector<1x4x16xf32>
      %153 = vector.shape_cast %152 : vector<1x4x16xf32> to vector<4x16xf32>
      %154 = vector.shape_cast %122 : vector<4x16xf32> to vector<1x4x16xf32>
      tpu.vector_store %arg17[%c1_41, %c0_42, %c0_43], %154 {strides = array<i32>} : memref<8x4x32xf32, #tpu.memory_space<vmem>>, vector<1x4x16xf32>,
      %c6_44 = arith.constant 6 : index
      %c0_45 = arith.constant 0 : index
      %c16_46 = arith.constant 16 : index
      %155 = vector.load %arg17[%c6_44, %c0_45, %c16_46] : memref<8x4x32xf32, #tpu.memory_space<vmem>>, vector<1x4x16xf32>
      %156 = vector.shape_cast %155 : vector<1x4x16xf32> to vector<4x16xf32>
      %157 = vector.shape_cast %150 : vector<4x16xf32> to vector<1x4x16xf32>
      tpu.vector_store %arg17[%c6_44, %c0_45, %c16_46], %157 {strides = array<i32>} : memref<8x4x32xf32, #tpu.memory_space<vmem>>, vector<1x4x16xf32>,
      %c2 = arith.constant 2 : index
      %c0_47 = arith.constant 0 : index
      %c0_48 = arith.constant 0 : index
      %158 = vector.load %arg16[%c2, %c0_47, %c0_48] : memref<8x4x96xf32, #tpu.memory_space<vmem>>, vector<1x4x48xf32>
      %159 = vector.shape_cast %158 : vector<1x4x48xf32> to vector<4x48xf32>
      %c5 = arith.constant 5 : index
      %c0_49 = arith.constant 0 : index
      %c48_50 = arith.constant 48 : index
      %160 = vector.load %arg16[%c5, %c0_49, %c48_50] : memref<8x4x96xf32, #tpu.memory_space<vmem>>, vector<1x4x48xf32>
      %161 = vector.shape_cast %160 : vector<1x4x48xf32> to vector<4x48xf32>
      %cst_51 = arith.constant dense<0.000000e+00> : vector<4x96xf32>
      %162 = tpu.matmul %151, %15, %cst_51 {dimension_numbers = #tpu.dot_dimension_numbers<[1], [0], [0], [1], [0, 0, 1, 1], [], []>} : vector<4x32xf32>, vector<32x96xf32>, vector<4x96xf32> -> vector<4x96xf32>
      %163 = vector.broadcast %16 : vector<1x96xf32> to vector<4x96xf32>
      %164 = arith.addf %162, %163 : vector<4x96xf32>
      %165 = vector.extract_strided_slice %164 {offsets = [0, 0], sizes = [4, 48], strides = [1, 1]} : vector<4x96xf32> to vector<4x48xf32>
      %166 = vector.extract_strided_slice %151 {offsets = [0, 0], sizes = [4, 16], strides = [1, 1]} : vector<4x32xf32> to vector<4x16xf32>
      %167 = vector.extract_strided_slice %159 {offsets = [0, 0], sizes = [4, 16], strides = [1, 1]} : vector<4x48xf32> to vector<4x16xf32>
      %168 = vector.extract_strided_slice %165 {offsets = [0, 0], sizes = [4, 16], strides = [1, 1]} : vector<4x48xf32> to vector<4x16xf32>
      %169 = arith.addf %167, %168 : vector<4x16xf32>
      %170 = arith.negf %169 : vector<4x16xf32>
      %171 = math.exp %170 : vector<4x16xf32>
      %cst_52 = arith.constant 1.000000e+00 : f32
      %172 = vector.broadcast %cst_52 : f32 to vector<4x16xf32>
      %173 = arith.addf %172, %171 : vector<4x16xf32>
      %174 = arith.divf %172, %173 : vector<4x16xf32>
      %175 = vector.extract_strided_slice %159 {offsets = [0, 16], sizes = [4, 16], strides = [1, 1]} : vector<4x48xf32> to vector<4x16xf32>
      %176 = vector.extract_strided_slice %165 {offsets = [0, 16], sizes = [4, 16], strides = [1, 1]} : vector<4x48xf32> to vector<4x16xf32>
      %177 = arith.addf %175, %176 : vector<4x16xf32>
      %178 = arith.negf %177 : vector<4x16xf32>
      %179 = math.exp %178 : vector<4x16xf32>
      %cst_53 = arith.constant 1.000000e+00 : f32
      %180 = vector.broadcast %cst_53 : f32 to vector<4x16xf32>
      %181 = arith.addf %180, %179 : vector<4x16xf32>
      %182 = arith.divf %180, %181 : vector<4x16xf32>
      %183 = vector.extract_strided_slice %159 {offsets = [0, 32], sizes = [4, 16], strides = [1, 1]} : vector<4x48xf32> to vector<4x16xf32>
      %184 = vector.extract_strided_slice %165 {offsets = [0, 32], sizes = [4, 16], strides = [1, 1]} : vector<4x48xf32> to vector<4x16xf32>
      %185 = arith.mulf %174, %184 : vector<4x16xf32>
      %186 = arith.addf %183, %185 : vector<4x16xf32>
      %187 = math.tanh %186 : vector<4x16xf32>
      %cst_54 = arith.constant 1.000000e+00 : f32
      %188 = vector.broadcast %cst_54 : f32 to vector<4x16xf32>
      %189 = arith.subf %188, %182 : vector<4x16xf32>
      %190 = arith.mulf %189, %187 : vector<4x16xf32>
      %191 = arith.mulf %182, %166 : vector<4x16xf32>
      %192 = arith.addf %190, %191 : vector<4x16xf32>
      %193 = vector.extract_strided_slice %164 {offsets = [0, 48], sizes = [4, 48], strides = [1, 1]} : vector<4x96xf32> to vector<4x48xf32>
      %194 = vector.extract_strided_slice %151 {offsets = [0, 16], sizes = [4, 16], strides = [1, 1]} : vector<4x32xf32> to vector<4x16xf32>
      %195 = vector.extract_strided_slice %161 {offsets = [0, 0], sizes = [4, 16], strides = [1, 1]} : vector<4x48xf32> to vector<4x16xf32>
      %196 = vector.extract_strided_slice %193 {offsets = [0, 0], sizes = [4, 16], strides = [1, 1]} : vector<4x48xf32> to vector<4x16xf32>
      %197 = arith.addf %195, %196 : vector<4x16xf32>
      %198 = arith.negf %197 : vector<4x16xf32>
      %199 = math.exp %198 : vector<4x16xf32>
      %cst_55 = arith.constant 1.000000e+00 : f32
      %200 = vector.broadcast %cst_55 : f32 to vector<4x16xf32>
      %201 = arith.addf %200, %199 : vector<4x16xf32>
      %202 = arith.divf %200, %201 : vector<4x16xf32>
      %203 = vector.extract_strided_slice %161 {offsets = [0, 16], sizes = [4, 16], strides = [1, 1]} : vector<4x48xf32> to vector<4x16xf32>
      %204 = vector.extract_strided_slice %193 {offsets = [0, 16], sizes = [4, 16], strides = [1, 1]} : vector<4x48xf32> to vector<4x16xf32>
      %205 = arith.addf %203, %204 : vector<4x16xf32>
      %206 = arith.negf %205 : vector<4x16xf32>
      %207 = math.exp %206 : vector<4x16xf32>
      %cst_56 = arith.constant 1.000000e+00 : f32
      %208 = vector.broadcast %cst_56 : f32 to vector<4x16xf32>
      %209 = arith.addf %208, %207 : vector<4x16xf32>
      %210 = arith.divf %208, %209 : vector<4x16xf32>
      %211 = vector.extract_strided_slice %161 {offsets = [0, 32], sizes = [4, 16], strides = [1, 1]} : vector<4x48xf32> to vector<4x16xf32>
      %212 = vector.extract_strided_slice %193 {offsets = [0, 32], sizes = [4, 16], strides = [1, 1]} : vector<4x48xf32> to vector<4x16xf32>
      %213 = arith.mulf %202, %212 : vector<4x16xf32>
      %214 = arith.addf %211, %213 : vector<4x16xf32>
      %215 = math.tanh %214 : vector<4x16xf32>
      %cst_57 = arith.constant 1.000000e+00 : f32
      %216 = vector.broadcast %cst_57 : f32 to vector<4x16xf32>
      %217 = arith.subf %216, %210 : vector<4x16xf32>
      %218 = arith.mulf %217, %215 : vector<4x16xf32>
      %219 = arith.mulf %210, %194 : vector<4x16xf32>
      %220 = arith.addf %218, %219 : vector<4x16xf32>
      %221 = tpu.concatenate %192, %220 in 1 : vector<4x16xf32>, vector<4x16xf32> -> vector<4x32xf32>
      %c2_58 = arith.constant 2 : index
      %c0_59 = arith.constant 0 : index
      %c0_60 = arith.constant 0 : index
      %222 = vector.load %arg17[%c2_58, %c0_59, %c0_60] : memref<8x4x32xf32, #tpu.memory_space<vmem>>, vector<1x4x16xf32>
      %223 = vector.shape_cast %222 : vector<1x4x16xf32> to vector<4x16xf32>
      %224 = vector.shape_cast %192 : vector<4x16xf32> to vector<1x4x16xf32>
      tpu.vector_store %arg17[%c2_58, %c0_59, %c0_60], %224 {strides = array<i32>} : memref<8x4x32xf32, #tpu.memory_space<vmem>>, vector<1x4x16xf32>,
      %c5_61 = arith.constant 5 : index
      %c0_62 = arith.constant 0 : index
      %c16_63 = arith.constant 16 : index
      %225 = vector.load %arg17[%c5_61, %c0_62, %c16_63] : memref<8x4x32xf32, #tpu.memory_space<vmem>>, vector<1x4x16xf32>
      %226 = vector.shape_cast %225 : vector<1x4x16xf32> to vector<4x16xf32>
      %227 = vector.shape_cast %220 : vector<4x16xf32> to vector<1x4x16xf32>
      tpu.vector_store %arg17[%c5_61, %c0_62, %c16_63], %227 {strides = array<i32>} : memref<8x4x32xf32, #tpu.memory_space<vmem>>, vector<1x4x16xf32>,
      %c3 = arith.constant 3 : index
      %c0_64 = arith.constant 0 : index
      %c0_65 = arith.constant 0 : index
      %228 = vector.load %arg16[%c3, %c0_64, %c0_65] : memref<8x4x96xf32, #tpu.memory_space<vmem>>, vector<1x4x48xf32>
      %229 = vector.shape_cast %228 : vector<1x4x48xf32> to vector<4x48xf32>
      %c4 = arith.constant 4 : index
      %c0_66 = arith.constant 0 : index
      %c48_67 = arith.constant 48 : index
      %230 = vector.load %arg16[%c4, %c0_66, %c48_67] : memref<8x4x96xf32, #tpu.memory_space<vmem>>, vector<1x4x48xf32>
      %231 = vector.shape_cast %230 : vector<1x4x48xf32> to vector<4x48xf32>
      %cst_68 = arith.constant dense<0.000000e+00> : vector<4x96xf32>
      %232 = tpu.matmul %221, %15, %cst_68 {dimension_numbers = #tpu.dot_dimension_numbers<[1], [0], [0], [1], [0, 0, 1, 1], [], []>} : vector<4x32xf32>, vector<32x96xf32>, vector<4x96xf32> -> vector<4x96xf32>
      %233 = vector.broadcast %16 : vector<1x96xf32> to vector<4x96xf32>
      %234 = arith.addf %232, %233 : vector<4x96xf32>
      %235 = vector.extract_strided_slice %234 {offsets = [0, 0], sizes = [4, 48], strides = [1, 1]} : vector<4x96xf32> to vector<4x48xf32>
      %236 = vector.extract_strided_slice %221 {offsets = [0, 0], sizes = [4, 16], strides = [1, 1]} : vector<4x32xf32> to vector<4x16xf32>
      %237 = vector.extract_strided_slice %229 {offsets = [0, 0], sizes = [4, 16], strides = [1, 1]} : vector<4x48xf32> to vector<4x16xf32>
      %238 = vector.extract_strided_slice %235 {offsets = [0, 0], sizes = [4, 16], strides = [1, 1]} : vector<4x48xf32> to vector<4x16xf32>
      %239 = arith.addf %237, %238 : vector<4x16xf32>
      %240 = arith.negf %239 : vector<4x16xf32>
      %241 = math.exp %240 : vector<4x16xf32>
      %cst_69 = arith.constant 1.000000e+00 : f32
      %242 = vector.broadcast %cst_69 : f32 to vector<4x16xf32>
      %243 = arith.addf %242, %241 : vector<4x16xf32>
      %244 = arith.divf %242, %243 : vector<4x16xf32>
      %245 = vector.extract_strided_slice %229 {offsets = [0, 16], sizes = [4, 16], strides = [1, 1]} : vector<4x48xf32> to vector<4x16xf32>
      %246 = vector.extract_strided_slice %235 {offsets = [0, 16], sizes = [4, 16], strides = [1, 1]} : vector<4x48xf32> to vector<4x16xf32>
      %247 = arith.addf %245, %246 : vector<4x16xf32>
      %248 = arith.negf %247 : vector<4x16xf32>
      %249 = math.exp %248 : vector<4x16xf32>
      %cst_70 = arith.constant 1.000000e+00 : f32
      %250 = vector.broadcast %cst_70 : f32 to vector<4x16xf32>
      %251 = arith.addf %250, %249 : vector<4x16xf32>
      %252 = arith.divf %250, %251 : vector<4x16xf32>
      %253 = vector.extract_strided_slice %229 {offsets = [0, 32], sizes = [4, 16], strides = [1, 1]} : vector<4x48xf32> to vector<4x16xf32>
      %254 = vector.extract_strided_slice %235 {offsets = [0, 32], sizes = [4, 16], strides = [1, 1]} : vector<4x48xf32> to vector<4x16xf32>
      %255 = arith.mulf %244, %254 : vector<4x16xf32>
      %256 = arith.addf %253, %255 : vector<4x16xf32>
      %257 = math.tanh %256 : vector<4x16xf32>
      %cst_71 = arith.constant 1.000000e+00 : f32
      %258 = vector.broadcast %cst_71 : f32 to vector<4x16xf32>
      %259 = arith.subf %258, %252 : vector<4x16xf32>
      %260 = arith.mulf %259, %257 : vector<4x16xf32>
      %261 = arith.mulf %252, %236 : vector<4x16xf32>
      %262 = arith.addf %260, %261 : vector<4x16xf32>
      %263 = vector.extract_strided_slice %234 {offsets = [0, 48], sizes = [4, 48], strides = [1, 1]} : vector<4x96xf32> to vector<4x48xf32>
      %264 = vector.extract_strided_slice %221 {offsets = [0, 16], sizes = [4, 16], strides = [1, 1]} : vector<4x32xf32> to vector<4x16xf32>
      %265 = vector.extract_strided_slice %231 {offsets = [0, 0], sizes = [4, 16], strides = [1, 1]} : vector<4x48xf32> to vector<4x16xf32>
      %266 = vector.extract_strided_slice %263 {offsets = [0, 0], sizes = [4, 16], strides = [1, 1]} : vector<4x48xf32> to vector<4x16xf32>
      %267 = arith.addf %265, %266 : vector<4x16xf32>
      %268 = arith.negf %267 : vector<4x16xf32>
      %269 = math.exp %268 : vector<4x16xf32>
      %cst_72 = arith.constant 1.000000e+00 : f32
      %270 = vector.broadcast %cst_72 : f32 to vector<4x16xf32>
      %271 = arith.addf %270, %269 : vector<4x16xf32>
      %272 = arith.divf %270, %271 : vector<4x16xf32>
      %273 = vector.extract_strided_slice %231 {offsets = [0, 16], sizes = [4, 16], strides = [1, 1]} : vector<4x48xf32> to vector<4x16xf32>
      %274 = vector.extract_strided_slice %263 {offsets = [0, 16], sizes = [4, 16], strides = [1, 1]} : vector<4x48xf32> to vector<4x16xf32>
      %275 = arith.addf %273, %274 : vector<4x16xf32>
      %276 = arith.negf %275 : vector<4x16xf32>
      %277 = math.exp %276 : vector<4x16xf32>
      %cst_73 = arith.constant 1.000000e+00 : f32
      %278 = vector.broadcast %cst_73 : f32 to vector<4x16xf32>
      %279 = arith.addf %278, %277 : vector<4x16xf32>
      %280 = arith.divf %278, %279 : vector<4x16xf32>
      %281 = vector.extract_strided_slice %231 {offsets = [0, 32], sizes = [4, 16], strides = [1, 1]} : vector<4x48xf32> to vector<4x16xf32>
      %282 = vector.extract_strided_slice %263 {offsets = [0, 32], sizes = [4, 16], strides = [1, 1]} : vector<4x48xf32> to vector<4x16xf32>
      %283 = arith.mulf %272, %282 : vector<4x16xf32>
      %284 = arith.addf %281, %283 : vector<4x16xf32>
      %285 = math.tanh %284 : vector<4x16xf32>
      %cst_74 = arith.constant 1.000000e+00 : f32
      %286 = vector.broadcast %cst_74 : f32 to vector<4x16xf32>
      %287 = arith.subf %286, %280 : vector<4x16xf32>
      %288 = arith.mulf %287, %285 : vector<4x16xf32>
      %289 = arith.mulf %280, %264 : vector<4x16xf32>
      %290 = arith.addf %288, %289 : vector<4x16xf32>
      %291 = tpu.concatenate %262, %290 in 1 : vector<4x16xf32>, vector<4x16xf32> -> vector<4x32xf32>
      %c3_75 = arith.constant 3 : index
      %c0_76 = arith.constant 0 : index
      %c0_77 = arith.constant 0 : index
      %292 = vector.load %arg17[%c3_75, %c0_76, %c0_77] : memref<8x4x32xf32, #tpu.memory_space<vmem>>, vector<1x4x16xf32>
      %293 = vector.shape_cast %292 : vector<1x4x16xf32> to vector<4x16xf32>
      %294 = vector.shape_cast %262 : vector<4x16xf32> to vector<1x4x16xf32>
      tpu.vector_store %arg17[%c3_75, %c0_76, %c0_77], %294 {strides = array<i32>} : memref<8x4x32xf32, #tpu.memory_space<vmem>>, vector<1x4x16xf32>,
      %c4_78 = arith.constant 4 : index
      %c0_79 = arith.constant 0 : index
      %c16_80 = arith.constant 16 : index
      %295 = vector.load %arg17[%c4_78, %c0_79, %c16_80] : memref<8x4x32xf32, #tpu.memory_space<vmem>>, vector<1x4x16xf32>
      %296 = vector.shape_cast %295 : vector<1x4x16xf32> to vector<4x16xf32>
      %297 = vector.shape_cast %290 : vector<4x16xf32> to vector<1x4x16xf32>
      tpu.vector_store %arg17[%c4_78, %c0_79, %c16_80], %297 {strides = array<i32>} : memref<8x4x32xf32, #tpu.memory_space<vmem>>, vector<1x4x16xf32>,
      %c4_81 = arith.constant 4 : index
      %c0_82 = arith.constant 0 : index
      %c0_83 = arith.constant 0 : index
      %298 = vector.load %arg16[%c4_81, %c0_82, %c0_83] : memref<8x4x96xf32, #tpu.memory_space<vmem>>, vector<1x4x48xf32>
      %299 = vector.shape_cast %298 : vector<1x4x48xf32> to vector<4x48xf32>
      %c3_84 = arith.constant 3 : index
      %c0_85 = arith.constant 0 : index
      %c48_86 = arith.constant 48 : index
      %300 = vector.load %arg16[%c3_84, %c0_85, %c48_86] : memref<8x4x96xf32, #tpu.memory_space<vmem>>, vector<1x4x48xf32>
      %301 = vector.shape_cast %300 : vector<1x4x48xf32> to vector<4x48xf32>
      %cst_87 = arith.constant dense<0.000000e+00> : vector<4x96xf32>
      %302 = tpu.matmul %291, %15, %cst_87 {dimension_numbers = #tpu.dot_dimension_numbers<[1], [0], [0], [1], [0, 0, 1, 1], [], []>} : vector<4x32xf32>, vector<32x96xf32>, vector<4x96xf32> -> vector<4x96xf32>
      %303 = vector.broadcast %16 : vector<1x96xf32> to vector<4x96xf32>
      %304 = arith.addf %302, %303 : vector<4x96xf32>
      %305 = vector.extract_strided_slice %304 {offsets = [0, 0], sizes = [4, 48], strides = [1, 1]} : vector<4x96xf32> to vector<4x48xf32>
      %306 = vector.extract_strided_slice %291 {offsets = [0, 0], sizes = [4, 16], strides = [1, 1]} : vector<4x32xf32> to vector<4x16xf32>
      %307 = vector.extract_strided_slice %299 {offsets = [0, 0], sizes = [4, 16], strides = [1, 1]} : vector<4x48xf32> to vector<4x16xf32>
      %308 = vector.extract_strided_slice %305 {offsets = [0, 0], sizes = [4, 16], strides = [1, 1]} : vector<4x48xf32> to vector<4x16xf32>
      %309 = arith.addf %307, %308 : vector<4x16xf32>
      %310 = arith.negf %309 : vector<4x16xf32>
      %311 = math.exp %310 : vector<4x16xf32>
      %cst_88 = arith.constant 1.000000e+00 : f32
      %312 = vector.broadcast %cst_88 : f32 to vector<4x16xf32>
      %313 = arith.addf %312, %311 : vector<4x16xf32>
      %314 = arith.divf %312, %313 : vector<4x16xf32>
      %315 = vector.extract_strided_slice %299 {offsets = [0, 16], sizes = [4, 16], strides = [1, 1]} : vector<4x48xf32> to vector<4x16xf32>
      %316 = vector.extract_strided_slice %305 {offsets = [0, 16], sizes = [4, 16], strides = [1, 1]} : vector<4x48xf32> to vector<4x16xf32>
      %317 = arith.addf %315, %316 : vector<4x16xf32>
      %318 = arith.negf %317 : vector<4x16xf32>
      %319 = math.exp %318 : vector<4x16xf32>
      %cst_89 = arith.constant 1.000000e+00 : f32
      %320 = vector.broadcast %cst_89 : f32 to vector<4x16xf32>
      %321 = arith.addf %320, %319 : vector<4x16xf32>
      %322 = arith.divf %320, %321 : vector<4x16xf32>
      %323 = vector.extract_strided_slice %299 {offsets = [0, 32], sizes = [4, 16], strides = [1, 1]} : vector<4x48xf32> to vector<4x16xf32>
      %324 = vector.extract_strided_slice %305 {offsets = [0, 32], sizes = [4, 16], strides = [1, 1]} : vector<4x48xf32> to vector<4x16xf32>
      %325 = arith.mulf %314, %324 : vector<4x16xf32>
      %326 = arith.addf %323, %325 : vector<4x16xf32>
      %327 = math.tanh %326 : vector<4x16xf32>
      %cst_90 = arith.constant 1.000000e+00 : f32
      %328 = vector.broadcast %cst_90 : f32 to vector<4x16xf32>
      %329 = arith.subf %328, %322 : vector<4x16xf32>
      %330 = arith.mulf %329, %327 : vector<4x16xf32>
      %331 = arith.mulf %322, %306 : vector<4x16xf32>
      %332 = arith.addf %330, %331 : vector<4x16xf32>
      %333 = vector.extract_strided_slice %304 {offsets = [0, 48], sizes = [4, 48], strides = [1, 1]} : vector<4x96xf32> to vector<4x48xf32>
      %334 = vector.extract_strided_slice %291 {offsets = [0, 16], sizes = [4, 16], strides = [1, 1]} : vector<4x32xf32> to vector<4x16xf32>
      %335 = vector.extract_strided_slice %301 {offsets = [0, 0], sizes = [4, 16], strides = [1, 1]} : vector<4x48xf32> to vector<4x16xf32>
      %336 = vector.extract_strided_slice %333 {offsets = [0, 0], sizes = [4, 16], strides = [1, 1]} : vector<4x48xf32> to vector<4x16xf32>
      %337 = arith.addf %335, %336 : vector<4x16xf32>
      %338 = arith.negf %337 : vector<4x16xf32>
      %339 = math.exp %338 : vector<4x16xf32>
      %cst_91 = arith.constant 1.000000e+00 : f32
      %340 = vector.broadcast %cst_91 : f32 to vector<4x16xf32>
      %341 = arith.addf %340, %339 : vector<4x16xf32>
      %342 = arith.divf %340, %341 : vector<4x16xf32>
      %343 = vector.extract_strided_slice %301 {offsets = [0, 16], sizes = [4, 16], strides = [1, 1]} : vector<4x48xf32> to vector<4x16xf32>
      %344 = vector.extract_strided_slice %333 {offsets = [0, 16], sizes = [4, 16], strides = [1, 1]} : vector<4x48xf32> to vector<4x16xf32>
      %345 = arith.addf %343, %344 : vector<4x16xf32>
      %346 = arith.negf %345 : vector<4x16xf32>
      %347 = math.exp %346 : vector<4x16xf32>
      %cst_92 = arith.constant 1.000000e+00 : f32
      %348 = vector.broadcast %cst_92 : f32 to vector<4x16xf32>
      %349 = arith.addf %348, %347 : vector<4x16xf32>
      %350 = arith.divf %348, %349 : vector<4x16xf32>
      %351 = vector.extract_strided_slice %301 {offsets = [0, 32], sizes = [4, 16], strides = [1, 1]} : vector<4x48xf32> to vector<4x16xf32>
      %352 = vector.extract_strided_slice %333 {offsets = [0, 32], sizes = [4, 16], strides = [1, 1]} : vector<4x48xf32> to vector<4x16xf32>
      %353 = arith.mulf %342, %352 : vector<4x16xf32>
      %354 = arith.addf %351, %353 : vector<4x16xf32>
      %355 = math.tanh %354 : vector<4x16xf32>
      %cst_93 = arith.constant 1.000000e+00 : f32
      %356 = vector.broadcast %cst_93 : f32 to vector<4x16xf32>
      %357 = arith.subf %356, %350 : vector<4x16xf32>
      %358 = arith.mulf %357, %355 : vector<4x16xf32>
      %359 = arith.mulf %350, %334 : vector<4x16xf32>
      %360 = arith.addf %358, %359 : vector<4x16xf32>
      %361 = tpu.concatenate %332, %360 in 1 : vector<4x16xf32>, vector<4x16xf32> -> vector<4x32xf32>
      %c4_94 = arith.constant 4 : index
      %c0_95 = arith.constant 0 : index
      %c0_96 = arith.constant 0 : index
      %362 = vector.load %arg17[%c4_94, %c0_95, %c0_96] : memref<8x4x32xf32, #tpu.memory_space<vmem>>, vector<1x4x16xf32>
      %363 = vector.shape_cast %362 : vector<1x4x16xf32> to vector<4x16xf32>
      %364 = vector.shape_cast %332 : vector<4x16xf32> to vector<1x4x16xf32>
      tpu.vector_store %arg17[%c4_94, %c0_95, %c0_96], %364 {strides = array<i32>} : memref<8x4x32xf32, #tpu.memory_space<vmem>>, vector<1x4x16xf32>,
      %c3_97 = arith.constant 3 : index
      %c0_98 = arith.constant 0 : index
      %c16_99 = arith.constant 16 : index
      %365 = vector.load %arg17[%c3_97, %c0_98, %c16_99] : memref<8x4x32xf32, #tpu.memory_space<vmem>>, vector<1x4x16xf32>
      %366 = vector.shape_cast %365 : vector<1x4x16xf32> to vector<4x16xf32>
      %367 = vector.shape_cast %360 : vector<4x16xf32> to vector<1x4x16xf32>
      tpu.vector_store %arg17[%c3_97, %c0_98, %c16_99], %367 {strides = array<i32>} : memref<8x4x32xf32, #tpu.memory_space<vmem>>, vector<1x4x16xf32>,
      %c5_100 = arith.constant 5 : index
      %c0_101 = arith.constant 0 : index
      %c0_102 = arith.constant 0 : index
      %368 = vector.load %arg16[%c5_100, %c0_101, %c0_102] : memref<8x4x96xf32, #tpu.memory_space<vmem>>, vector<1x4x48xf32>
      %369 = vector.shape_cast %368 : vector<1x4x48xf32> to vector<4x48xf32>
      %c2_103 = arith.constant 2 : index
      %c0_104 = arith.constant 0 : index
      %c48_105 = arith.constant 48 : index
      %370 = vector.load %arg16[%c2_103, %c0_104, %c48_105] : memref<8x4x96xf32, #tpu.memory_space<vmem>>, vector<1x4x48xf32>
      %371 = vector.shape_cast %370 : vector<1x4x48xf32> to vector<4x48xf32>
      %cst_106 = arith.constant dense<0.000000e+00> : vector<4x96xf32>
      %372 = tpu.matmul %361, %15, %cst_106 {dimension_numbers = #tpu.dot_dimension_numbers<[1], [0], [0], [1], [0, 0, 1, 1], [], []>} : vector<4x32xf32>, vector<32x96xf32>, vector<4x96xf32> -> vector<4x96xf32>
      %373 = vector.broadcast %16 : vector<1x96xf32> to vector<4x96xf32>
      %374 = arith.addf %372, %373 : vector<4x96xf32>
      %375 = vector.extract_strided_slice %374 {offsets = [0, 0], sizes = [4, 48], strides = [1, 1]} : vector<4x96xf32> to vector<4x48xf32>
      %376 = vector.extract_strided_slice %361 {offsets = [0, 0], sizes = [4, 16], strides = [1, 1]} : vector<4x32xf32> to vector<4x16xf32>
      %377 = vector.extract_strided_slice %369 {offsets = [0, 0], sizes = [4, 16], strides = [1, 1]} : vector<4x48xf32> to vector<4x16xf32>
      %378 = vector.extract_strided_slice %375 {offsets = [0, 0], sizes = [4, 16], strides = [1, 1]} : vector<4x48xf32> to vector<4x16xf32>
      %379 = arith.addf %377, %378 : vector<4x16xf32>
      %380 = arith.negf %379 : vector<4x16xf32>
      %381 = math.exp %380 : vector<4x16xf32>
      %cst_107 = arith.constant 1.000000e+00 : f32
      %382 = vector.broadcast %cst_107 : f32 to vector<4x16xf32>
      %383 = arith.addf %382, %381 : vector<4x16xf32>
      %384 = arith.divf %382, %383 : vector<4x16xf32>
      %385 = vector.extract_strided_slice %369 {offsets = [0, 16], sizes = [4, 16], strides = [1, 1]} : vector<4x48xf32> to vector<4x16xf32>
      %386 = vector.extract_strided_slice %375 {offsets = [0, 16], sizes = [4, 16], strides = [1, 1]} : vector<4x48xf32> to vector<4x16xf32>
      %387 = arith.addf %385, %386 : vector<4x16xf32>
      %388 = arith.negf %387 : vector<4x16xf32>
      %389 = math.exp %388 : vector<4x16xf32>
      %cst_108 = arith.constant 1.000000e+00 : f32
      %390 = vector.broadcast %cst_108 : f32 to vector<4x16xf32>
      %391 = arith.addf %390, %389 : vector<4x16xf32>
      %392 = arith.divf %390, %391 : vector<4x16xf32>
      %393 = vector.extract_strided_slice %369 {offsets = [0, 32], sizes = [4, 16], strides = [1, 1]} : vector<4x48xf32> to vector<4x16xf32>
      %394 = vector.extract_strided_slice %375 {offsets = [0, 32], sizes = [4, 16], strides = [1, 1]} : vector<4x48xf32> to vector<4x16xf32>
      %395 = arith.mulf %384, %394 : vector<4x16xf32>
      %396 = arith.addf %393, %395 : vector<4x16xf32>
      %397 = math.tanh %396 : vector<4x16xf32>
      %cst_109 = arith.constant 1.000000e+00 : f32
      %398 = vector.broadcast %cst_109 : f32 to vector<4x16xf32>
      %399 = arith.subf %398, %392 : vector<4x16xf32>
      %400 = arith.mulf %399, %397 : vector<4x16xf32>
      %401 = arith.mulf %392, %376 : vector<4x16xf32>
      %402 = arith.addf %400, %401 : vector<4x16xf32>
      %403 = vector.extract_strided_slice %374 {offsets = [0, 48], sizes = [4, 48], strides = [1, 1]} : vector<4x96xf32> to vector<4x48xf32>
      %404 = vector.extract_strided_slice %361 {offsets = [0, 16], sizes = [4, 16], strides = [1, 1]} : vector<4x32xf32> to vector<4x16xf32>
      %405 = vector.extract_strided_slice %371 {offsets = [0, 0], sizes = [4, 16], strides = [1, 1]} : vector<4x48xf32> to vector<4x16xf32>
      %406 = vector.extract_strided_slice %403 {offsets = [0, 0], sizes = [4, 16], strides = [1, 1]} : vector<4x48xf32> to vector<4x16xf32>
      %407 = arith.addf %405, %406 : vector<4x16xf32>
      %408 = arith.negf %407 : vector<4x16xf32>
      %409 = math.exp %408 : vector<4x16xf32>
      %cst_110 = arith.constant 1.000000e+00 : f32
      %410 = vector.broadcast %cst_110 : f32 to vector<4x16xf32>
      %411 = arith.addf %410, %409 : vector<4x16xf32>
      %412 = arith.divf %410, %411 : vector<4x16xf32>
      %413 = vector.extract_strided_slice %371 {offsets = [0, 16], sizes = [4, 16], strides = [1, 1]} : vector<4x48xf32> to vector<4x16xf32>
      %414 = vector.extract_strided_slice %403 {offsets = [0, 16], sizes = [4, 16], strides = [1, 1]} : vector<4x48xf32> to vector<4x16xf32>
      %415 = arith.addf %413, %414 : vector<4x16xf32>
      %416 = arith.negf %415 : vector<4x16xf32>
      %417 = math.exp %416 : vector<4x16xf32>
      %cst_111 = arith.constant 1.000000e+00 : f32
      %418 = vector.broadcast %cst_111 : f32 to vector<4x16xf32>
      %419 = arith.addf %418, %417 : vector<4x16xf32>
      %420 = arith.divf %418, %419 : vector<4x16xf32>
      %421 = vector.extract_strided_slice %371 {offsets = [0, 32], sizes = [4, 16], strides = [1, 1]} : vector<4x48xf32> to vector<4x16xf32>
      %422 = vector.extract_strided_slice %403 {offsets = [0, 32], sizes = [4, 16], strides = [1, 1]} : vector<4x48xf32> to vector<4x16xf32>
      %423 = arith.mulf %412, %422 : vector<4x16xf32>
      %424 = arith.addf %421, %423 : vector<4x16xf32>
      %425 = math.tanh %424 : vector<4x16xf32>
      %cst_112 = arith.constant 1.000000e+00 : f32
      %426 = vector.broadcast %cst_112 : f32 to vector<4x16xf32>
      %427 = arith.subf %426, %420 : vector<4x16xf32>
      %428 = arith.mulf %427, %425 : vector<4x16xf32>
      %429 = arith.mulf %420, %404 : vector<4x16xf32>
      %430 = arith.addf %428, %429 : vector<4x16xf32>
      %431 = tpu.concatenate %402, %430 in 1 : vector<4x16xf32>, vector<4x16xf32> -> vector<4x32xf32>
      %c5_113 = arith.constant 5 : index
      %c0_114 = arith.constant 0 : index
      %c0_115 = arith.constant 0 : index
      %432 = vector.load %arg17[%c5_113, %c0_114, %c0_115] : memref<8x4x32xf32, #tpu.memory_space<vmem>>, vector<1x4x16xf32>
      %433 = vector.shape_cast %432 : vector<1x4x16xf32> to vector<4x16xf32>
      %434 = vector.shape_cast %402 : vector<4x16xf32> to vector<1x4x16xf32>
      tpu.vector_store %arg17[%c5_113, %c0_114, %c0_115], %434 {strides = array<i32>} : memref<8x4x32xf32, #tpu.memory_space<vmem>>, vector<1x4x16xf32>,
      %c2_116 = arith.constant 2 : index
      %c0_117 = arith.constant 0 : index
      %c16_118 = arith.constant 16 : index
      %435 = vector.load %arg17[%c2_116, %c0_117, %c16_118] : memref<8x4x32xf32, #tpu.memory_space<vmem>>, vector<1x4x16xf32>
      %436 = vector.shape_cast %435 : vector<1x4x16xf32> to vector<4x16xf32>
      %437 = vector.shape_cast %430 : vector<4x16xf32> to vector<1x4x16xf32>
      tpu.vector_store %arg17[%c2_116, %c0_117, %c16_118], %437 {strides = array<i32>} : memref<8x4x32xf32, #tpu.memory_space<vmem>>, vector<1x4x16xf32>,
      %c6_119 = arith.constant 6 : index
      %c0_120 = arith.constant 0 : index
      %c0_121 = arith.constant 0 : index
      %438 = vector.load %arg16[%c6_119, %c0_120, %c0_121] : memref<8x4x96xf32, #tpu.memory_space<vmem>>, vector<1x4x48xf32>
      %439 = vector.shape_cast %438 : vector<1x4x48xf32> to vector<4x48xf32>
      %c1_122 = arith.constant 1 : index
      %c0_123 = arith.constant 0 : index
      %c48_124 = arith.constant 48 : index
      %440 = vector.load %arg16[%c1_122, %c0_123, %c48_124] : memref<8x4x96xf32, #tpu.memory_space<vmem>>, vector<1x4x48xf32>
      %441 = vector.shape_cast %440 : vector<1x4x48xf32> to vector<4x48xf32>
      %cst_125 = arith.constant dense<0.000000e+00> : vector<4x96xf32>
      %442 = tpu.matmul %431, %15, %cst_125 {dimension_numbers = #tpu.dot_dimension_numbers<[1], [0], [0], [1], [0, 0, 1, 1], [], []>} : vector<4x32xf32>, vector<32x96xf32>, vector<4x96xf32> -> vector<4x96xf32>
      %443 = vector.broadcast %16 : vector<1x96xf32> to vector<4x96xf32>
      %444 = arith.addf %442, %443 : vector<4x96xf32>
      %445 = vector.extract_strided_slice %444 {offsets = [0, 0], sizes = [4, 48], strides = [1, 1]} : vector<4x96xf32> to vector<4x48xf32>
      %446 = vector.extract_strided_slice %431 {offsets = [0, 0], sizes = [4, 16], strides = [1, 1]} : vector<4x32xf32> to vector<4x16xf32>
      %447 = vector.extract_strided_slice %439 {offsets = [0, 0], sizes = [4, 16], strides = [1, 1]} : vector<4x48xf32> to vector<4x16xf32>
      %448 = vector.extract_strided_slice %445 {offsets = [0, 0], sizes = [4, 16], strides = [1, 1]} : vector<4x48xf32> to vector<4x16xf32>
      %449 = arith.addf %447, %448 : vector<4x16xf32>
      %450 = arith.negf %449 : vector<4x16xf32>
      %451 = math.exp %450 : vector<4x16xf32>
      %cst_126 = arith.constant 1.000000e+00 : f32
      %452 = vector.broadcast %cst_126 : f32 to vector<4x16xf32>
      %453 = arith.addf %452, %451 : vector<4x16xf32>
      %454 = arith.divf %452, %453 : vector<4x16xf32>
      %455 = vector.extract_strided_slice %439 {offsets = [0, 16], sizes = [4, 16], strides = [1, 1]} : vector<4x48xf32> to vector<4x16xf32>
      %456 = vector.extract_strided_slice %445 {offsets = [0, 16], sizes = [4, 16], strides = [1, 1]} : vector<4x48xf32> to vector<4x16xf32>
      %457 = arith.addf %455, %456 : vector<4x16xf32>
      %458 = arith.negf %457 : vector<4x16xf32>
      %459 = math.exp %458 : vector<4x16xf32>
      %cst_127 = arith.constant 1.000000e+00 : f32
      %460 = vector.broadcast %cst_127 : f32 to vector<4x16xf32>
      %461 = arith.addf %460, %459 : vector<4x16xf32>
      %462 = arith.divf %460, %461 : vector<4x16xf32>
      %463 = vector.extract_strided_slice %439 {offsets = [0, 32], sizes = [4, 16], strides = [1, 1]} : vector<4x48xf32> to vector<4x16xf32>
      %464 = vector.extract_strided_slice %445 {offsets = [0, 32], sizes = [4, 16], strides = [1, 1]} : vector<4x48xf32> to vector<4x16xf32>
      %465 = arith.mulf %454, %464 : vector<4x16xf32>
      %466 = arith.addf %463, %465 : vector<4x16xf32>
      %467 = math.tanh %466 : vector<4x16xf32>
      %cst_128 = arith.constant 1.000000e+00 : f32
      %468 = vector.broadcast %cst_128 : f32 to vector<4x16xf32>
      %469 = arith.subf %468, %462 : vector<4x16xf32>
      %470 = arith.mulf %469, %467 : vector<4x16xf32>
      %471 = arith.mulf %462, %446 : vector<4x16xf32>
      %472 = arith.addf %470, %471 : vector<4x16xf32>
      %473 = vector.extract_strided_slice %444 {offsets = [0, 48], sizes = [4, 48], strides = [1, 1]} : vector<4x96xf32> to vector<4x48xf32>
      %474 = vector.extract_strided_slice %431 {offsets = [0, 16], sizes = [4, 16], strides = [1, 1]} : vector<4x32xf32> to vector<4x16xf32>
      %475 = vector.extract_strided_slice %441 {offsets = [0, 0], sizes = [4, 16], strides = [1, 1]} : vector<4x48xf32> to vector<4x16xf32>
      %476 = vector.extract_strided_slice %473 {offsets = [0, 0], sizes = [4, 16], strides = [1, 1]} : vector<4x48xf32> to vector<4x16xf32>
      %477 = arith.addf %475, %476 : vector<4x16xf32>
      %478 = arith.negf %477 : vector<4x16xf32>
      %479 = math.exp %478 : vector<4x16xf32>
      %cst_129 = arith.constant 1.000000e+00 : f32
      %480 = vector.broadcast %cst_129 : f32 to vector<4x16xf32>
      %481 = arith.addf %480, %479 : vector<4x16xf32>
      %482 = arith.divf %480, %481 : vector<4x16xf32>
      %483 = vector.extract_strided_slice %441 {offsets = [0, 16], sizes = [4, 16], strides = [1, 1]} : vector<4x48xf32> to vector<4x16xf32>
      %484 = vector.extract_strided_slice %473 {offsets = [0, 16], sizes = [4, 16], strides = [1, 1]} : vector<4x48xf32> to vector<4x16xf32>
      %485 = arith.addf %483, %484 : vector<4x16xf32>
      %486 = arith.negf %485 : vector<4x16xf32>
      %487 = math.exp %486 : vector<4x16xf32>
      %cst_130 = arith.constant 1.000000e+00 : f32
      %488 = vector.broadcast %cst_130 : f32 to vector<4x16xf32>
      %489 = arith.addf %488, %487 : vector<4x16xf32>
      %490 = arith.divf %488, %489 : vector<4x16xf32>
      %491 = vector.extract_strided_slice %441 {offsets = [0, 32], sizes = [4, 16], strides = [1, 1]} : vector<4x48xf32> to vector<4x16xf32>
      %492 = vector.extract_strided_slice %473 {offsets = [0, 32], sizes = [4, 16], strides = [1, 1]} : vector<4x48xf32> to vector<4x16xf32>
      %493 = arith.mulf %482, %492 : vector<4x16xf32>
      %494 = arith.addf %491, %493 : vector<4x16xf32>
      %495 = math.tanh %494 : vector<4x16xf32>
      %cst_131 = arith.constant 1.000000e+00 : f32
      %496 = vector.broadcast %cst_131 : f32 to vector<4x16xf32>
      %497 = arith.subf %496, %490 : vector<4x16xf32>
      %498 = arith.mulf %497, %495 : vector<4x16xf32>
      %499 = arith.mulf %490, %474 : vector<4x16xf32>
      %500 = arith.addf %498, %499 : vector<4x16xf32>
      %501 = tpu.concatenate %472, %500 in 1 : vector<4x16xf32>, vector<4x16xf32> -> vector<4x32xf32>
      %c6_132 = arith.constant 6 : index
      %c0_133 = arith.constant 0 : index
      %c0_134 = arith.constant 0 : index
      %502 = vector.load %arg17[%c6_132, %c0_133, %c0_134] : memref<8x4x32xf32, #tpu.memory_space<vmem>>, vector<1x4x16xf32>
      %503 = vector.shape_cast %502 : vector<1x4x16xf32> to vector<4x16xf32>
      %504 = vector.shape_cast %472 : vector<4x16xf32> to vector<1x4x16xf32>
      tpu.vector_store %arg17[%c6_132, %c0_133, %c0_134], %504 {strides = array<i32>} : memref<8x4x32xf32, #tpu.memory_space<vmem>>, vector<1x4x16xf32>,
      %c1_135 = arith.constant 1 : index
      %c0_136 = arith.constant 0 : index
      %c16_137 = arith.constant 16 : index
      %505 = vector.load %arg17[%c1_135, %c0_136, %c16_137] : memref<8x4x32xf32, #tpu.memory_space<vmem>>, vector<1x4x16xf32>
      %506 = vector.shape_cast %505 : vector<1x4x16xf32> to vector<4x16xf32>
      %507 = vector.shape_cast %500 : vector<4x16xf32> to vector<1x4x16xf32>
      tpu.vector_store %arg17[%c1_135, %c0_136, %c16_137], %507 {strides = array<i32>} : memref<8x4x32xf32, #tpu.memory_space<vmem>>, vector<1x4x16xf32>,
      %c7_138 = arith.constant 7 : index
      %c0_139 = arith.constant 0 : index
      %c0_140 = arith.constant 0 : index
      %508 = vector.load %arg16[%c7_138, %c0_139, %c0_140] : memref<8x4x96xf32, #tpu.memory_space<vmem>>, vector<1x4x48xf32>
      %509 = vector.shape_cast %508 : vector<1x4x48xf32> to vector<4x48xf32>
      %c0_141 = arith.constant 0 : index
      %c0_142 = arith.constant 0 : index
      %c48_143 = arith.constant 48 : index
      %510 = vector.load %arg16[%c0_141, %c0_142, %c48_143] : memref<8x4x96xf32, #tpu.memory_space<vmem>>, vector<1x4x48xf32>
      %511 = vector.shape_cast %510 : vector<1x4x48xf32> to vector<4x48xf32>
      %cst_144 = arith.constant dense<0.000000e+00> : vector<4x96xf32>
      %512 = tpu.matmul %501, %15, %cst_144 {dimension_numbers = #tpu.dot_dimension_numbers<[1], [0], [0], [1], [0, 0, 1, 1], [], []>} : vector<4x32xf32>, vector<32x96xf32>, vector<4x96xf32> -> vector<4x96xf32>
      %513 = vector.broadcast %16 : vector<1x96xf32> to vector<4x96xf32>
      %514 = arith.addf %512, %513 : vector<4x96xf32>
      %515 = vector.extract_strided_slice %514 {offsets = [0, 0], sizes = [4, 48], strides = [1, 1]} : vector<4x96xf32> to vector<4x48xf32>
      %516 = vector.extract_strided_slice %501 {offsets = [0, 0], sizes = [4, 16], strides = [1, 1]} : vector<4x32xf32> to vector<4x16xf32>
      %517 = vector.extract_strided_slice %509 {offsets = [0, 0], sizes = [4, 16], strides = [1, 1]} : vector<4x48xf32> to vector<4x16xf32>
      %518 = vector.extract_strided_slice %515 {offsets = [0, 0], sizes = [4, 16], strides = [1, 1]} : vector<4x48xf32> to vector<4x16xf32>
      %519 = arith.addf %517, %518 : vector<4x16xf32>
      %520 = arith.negf %519 : vector<4x16xf32>
      %521 = math.exp %520 : vector<4x16xf32>
      %cst_145 = arith.constant 1.000000e+00 : f32
      %522 = vector.broadcast %cst_145 : f32 to vector<4x16xf32>
      %523 = arith.addf %522, %521 : vector<4x16xf32>
      %524 = arith.divf %522, %523 : vector<4x16xf32>
      %525 = vector.extract_strided_slice %509 {offsets = [0, 16], sizes = [4, 16], strides = [1, 1]} : vector<4x48xf32> to vector<4x16xf32>
      %526 = vector.extract_strided_slice %515 {offsets = [0, 16], sizes = [4, 16], strides = [1, 1]} : vector<4x48xf32> to vector<4x16xf32>
      %527 = arith.addf %525, %526 : vector<4x16xf32>
      %528 = arith.negf %527 : vector<4x16xf32>
      %529 = math.exp %528 : vector<4x16xf32>
      %cst_146 = arith.constant 1.000000e+00 : f32
      %530 = vector.broadcast %cst_146 : f32 to vector<4x16xf32>
      %531 = arith.addf %530, %529 : vector<4x16xf32>
      %532 = arith.divf %530, %531 : vector<4x16xf32>
      %533 = vector.extract_strided_slice %509 {offsets = [0, 32], sizes = [4, 16], strides = [1, 1]} : vector<4x48xf32> to vector<4x16xf32>
      %534 = vector.extract_strided_slice %515 {offsets = [0, 32], sizes = [4, 16], strides = [1, 1]} : vector<4x48xf32> to vector<4x16xf32>
      %535 = arith.mulf %524, %534 : vector<4x16xf32>
      %536 = arith.addf %533, %535 : vector<4x16xf32>
      %537 = math.tanh %536 : vector<4x16xf32>
      %cst_147 = arith.constant 1.000000e+00 : f32
      %538 = vector.broadcast %cst_147 : f32 to vector<4x16xf32>
      %539 = arith.subf %538, %532 : vector<4x16xf32>
      %540 = arith.mulf %539, %537 : vector<4x16xf32>
      %541 = arith.mulf %532, %516 : vector<4x16xf32>
      %542 = arith.addf %540, %541 : vector<4x16xf32>
      %543 = vector.extract_strided_slice %514 {offsets = [0, 48], sizes = [4, 48], strides = [1, 1]} : vector<4x96xf32> to vector<4x48xf32>
      %544 = vector.extract_strided_slice %501 {offsets = [0, 16], sizes = [4, 16], strides = [1, 1]} : vector<4x32xf32> to vector<4x16xf32>
      %545 = vector.extract_strided_slice %511 {offsets = [0, 0], sizes = [4, 16], strides = [1, 1]} : vector<4x48xf32> to vector<4x16xf32>
      %546 = vector.extract_strided_slice %543 {offsets = [0, 0], sizes = [4, 16], strides = [1, 1]} : vector<4x48xf32> to vector<4x16xf32>
      %547 = arith.addf %545, %546 : vector<4x16xf32>
      %548 = arith.negf %547 : vector<4x16xf32>
      %549 = math.exp %548 : vector<4x16xf32>
      %cst_148 = arith.constant 1.000000e+00 : f32
      %550 = vector.broadcast %cst_148 : f32 to vector<4x16xf32>
      %551 = arith.addf %550, %549 : vector<4x16xf32>
      %552 = arith.divf %550, %551 : vector<4x16xf32>
      %553 = vector.extract_strided_slice %511 {offsets = [0, 16], sizes = [4, 16], strides = [1, 1]} : vector<4x48xf32> to vector<4x16xf32>
      %554 = vector.extract_strided_slice %543 {offsets = [0, 16], sizes = [4, 16], strides = [1, 1]} : vector<4x48xf32> to vector<4x16xf32>
      %555 = arith.addf %553, %554 : vector<4x16xf32>
      %556 = arith.negf %555 : vector<4x16xf32>
      %557 = math.exp %556 : vector<4x16xf32>
      %cst_149 = arith.constant 1.000000e+00 : f32
      %558 = vector.broadcast %cst_149 : f32 to vector<4x16xf32>
      %559 = arith.addf %558, %557 : vector<4x16xf32>
      %560 = arith.divf %558, %559 : vector<4x16xf32>
      %561 = vector.extract_strided_slice %511 {offsets = [0, 32], sizes = [4, 16], strides = [1, 1]} : vector<4x48xf32> to vector<4x16xf32>
      %562 = vector.extract_strided_slice %543 {offsets = [0, 32], sizes = [4, 16], strides = [1, 1]} : vector<4x48xf32> to vector<4x16xf32>
      %563 = arith.mulf %552, %562 : vector<4x16xf32>
      %564 = arith.addf %561, %563 : vector<4x16xf32>
      %565 = math.tanh %564 : vector<4x16xf32>
      %cst_150 = arith.constant 1.000000e+00 : f32
      %566 = vector.broadcast %cst_150 : f32 to vector<4x16xf32>
      %567 = arith.subf %566, %560 : vector<4x16xf32>
      %568 = arith.mulf %567, %565 : vector<4x16xf32>
      %569 = arith.mulf %560, %544 : vector<4x16xf32>
      %570 = arith.addf %568, %569 : vector<4x16xf32>
      %c7_151 = arith.constant 7 : index
      %c0_152 = arith.constant 0 : index
      %c0_153 = arith.constant 0 : index
      %571 = vector.load %arg17[%c7_151, %c0_152, %c0_153] : memref<8x4x32xf32, #tpu.memory_space<vmem>>, vector<1x4x16xf32>
      %572 = vector.shape_cast %571 : vector<1x4x16xf32> to vector<4x16xf32>
      %573 = vector.shape_cast %542 : vector<4x16xf32> to vector<1x4x16xf32>
      tpu.vector_store %arg17[%c7_151, %c0_152, %c0_153], %573 {strides = array<i32>} : memref<8x4x32xf32, #tpu.memory_space<vmem>>, vector<1x4x16xf32>,
      %c0_154 = arith.constant 0 : index
      %c0_155 = arith.constant 0 : index
      %c16_156 = arith.constant 16 : index
      %574 = vector.load %arg17[%c0_154, %c0_155, %c16_156] : memref<8x4x32xf32, #tpu.memory_space<vmem>>, vector<1x4x16xf32>
      %575 = vector.shape_cast %574 : vector<1x4x16xf32> to vector<4x16xf32>
      %576 = vector.shape_cast %570 : vector<4x16xf32> to vector<1x4x16xf32>
      tpu.vector_store %arg17[%c0_154, %c0_155, %c16_156], %576 {strides = array<i32>} : memref<8x4x32xf32, #tpu.memory_space<vmem>>, vector<1x4x16xf32>,
      %c0_157 = arith.constant 0 : index
      %c0_158 = arith.constant 0 : index
      %c0_159 = arith.constant 0 : index
      %577 = vector.load %arg17[%c0_157, %c0_158, %c0_159] : memref<8x4x32xf32, #tpu.memory_space<vmem>>, vector<8x2x32xf32>
      %c0_160 = arith.constant 0 : index
      %c0_161 = arith.constant 0 : index
      %578 = vector.load %arg7[%c0_160, %c0_161] : memref<32x32xf32, #tpu.memory_space<vmem>>, vector<32x32xf32>
      %c0_162 = arith.constant 0 : index
      %c0_163 = arith.constant 0 : index
      %579 = vector.load %arg8[%c0_162, %c0_163] : memref<1x32xf32, #tpu.memory_space<vmem>>, vector<1x32xf32>
      %cst_164 = arith.constant 0.000000e+00 : f32
      %580 = vector.broadcast %cst_164 : f32 to vector<2x8x32xf32>
      %c0_165 = arith.constant 0 : index
      %c2_166 = arith.constant 2 : index
      %c0_167 = arith.constant 0 : index
      %581 = vector.load %arg17[%c0_165, %c2_166, %c0_167] : memref<8x4x32xf32, #tpu.memory_space<vmem>>, vector<8x2x32xf32>
      %582 = vector.shape_cast %581 : vector<8x2x32xf32> to vector<16x32xf32>
      %cst_168 = arith.constant dense<0.000000e+00> : vector<16x32xf32>
      %583 = tpu.matmul %582, %578, %cst_168 {dimension_numbers = #tpu.dot_dimension_numbers<[1], [0], [0], [1], [0, 0, 1, 1], [], []>} : vector<16x32xf32>, vector<32x32xf32>, vector<16x32xf32> -> vector<16x32xf32>
      %584 = vector.shape_cast %583 : vector<16x32xf32> to vector<8x2x32xf32>
      %585 = vector.shape_cast %579 : vector<1x32xf32> to vector<1x1x32xf32>
      %586 = vector.broadcast %585 : vector<1x1x32xf32> to vector<8x2x32xf32>
      %587 = arith.addf %584, %586 : vector<8x2x32xf32>
      "tpu.trace_start"() <{level = 10 : i32, message = "sbf,qbf->bsq"}> : () -> ()
      %cst_169 = arith.constant dense<0.000000e+00> : vector<2x8x8xf32>
      %588 = tpu.matmul %587, %577, %cst_169 {dimension_numbers = #tpu.dot_dimension_numbers<[2], [2], [0], [0], [0, 1, 0, 0, 1, 0], [1], [1]>} : vector<8x2x32xf32>, vector<8x2x32xf32>, vector<2x8x8xf32> -> vector<2x8x8xf32>
      "tpu.trace_stop"() : () -> ()
      %cst_170 = arith.constant dense<0xFF800000> : vector<2x8xf32>
      %589 = vector.multi_reduction <maximumf>, %588, %cst_170 [2] : vector<2x8x8xf32> to vector<2x8xf32>
      %590 = vector.shape_cast %589 : vector<2x8xf32> to vector<2x8x1xf32>
      %591 = vector.broadcast %590 : vector<2x8x1xf32> to vector<2x8x8xf32>
      %592 = arith.subf %588, %591 : vector<2x8x8xf32>
      %593 = math.exp %592 : vector<2x8x8xf32>
      %cst_171 = arith.constant dense<0.000000e+00> : vector<2x8xf32>
      %594 = vector.multi_reduction <add>, %593, %cst_171 [2] : vector<2x8x8xf32> to vector<2x8xf32>
      %595 = vector.shape_cast %594 : vector<2x8xf32> to vector<2x8x1xf32>
      %596 = tpu.reciprocal %595 {approx = true} : vector<2x8x1xf32> -> vector<2x8x1xf32>
      %597 = vector.broadcast %596 : vector<2x8x1xf32> to vector<2x8x8xf32>
      %598 = arith.mulf %593, %597 : vector<2x8x8xf32>
      "tpu.trace_start"() <{level = 10 : i32, message = "bsq,sbe->bqe"}> : () -> ()
      %cst_172 = arith.constant dense<0.000000e+00> : vector<2x8x32xf32>
      %599 = tpu.matmul %598, %581, %cst_172 {dimension_numbers = #tpu.dot_dimension_numbers<[1], [0], [2], [2], [0, 0, 0, 2, 1, 2], [0], [1]>} : vector<2x8x8xf32>, vector<8x2x32xf32>, vector<2x8x32xf32> -> vector<2x8x32xf32>
      "tpu.trace_stop"() : () -> ()
      %600 = arith.addf %580, %599 : vector<2x8x32xf32>
      %601 = tpu.transpose %600, [1, 0, 2] : vector<2x8x32xf32> -> vector<8x2x32xf32>
      %602 = arith.mulf %577, %601 : vector<8x2x32xf32>
      %cst_173 = arith.constant dense<0.000000e+00> : vector<8x2xf32>
      %603 = vector.multi_reduction <add>, %602, %cst_173 [2] : vector<8x2x32xf32> to vector<8x2xf32>
      %604 = arith.mulf %577, %577 : vector<8x2x32xf32>
      %cst_174 = arith.constant dense<0.000000e+00> : vector<8x2xf32>
      %605 = vector.multi_reduction <add>, %604, %cst_174 [2] : vector<8x2x32xf32> to vector<8x2xf32>
      %606 = arith.mulf %601, %601 : vector<8x2x32xf32>
      %cst_175 = arith.constant dense<0.000000e+00> : vector<8x2xf32>
      %607 = vector.multi_reduction <add>, %606, %cst_175 [2] : vector<8x2x32xf32> to vector<8x2xf32>
      %cst_176 = arith.constant 9.99999996E-13 : f32
      %608 = vector.broadcast %cst_176 : f32 to vector<8x2xf32>
      %609 = arith.maximumf %605, %608 : vector<8x2xf32>
      %610 = math.rsqrt %609 : vector<8x2xf32>
      %611 = arith.mulf %603, %610 : vector<8x2xf32>
      %cst_177 = arith.constant 9.99999996E-13 : f32
      %612 = vector.broadcast %cst_177 : f32 to vector<8x2xf32>
      %613 = arith.maximumf %607, %612 : vector<8x2xf32>
      %614 = math.rsqrt %613 : vector<8x2xf32>
      %615 = arith.mulf %611, %614 : vector<8x2xf32>
      %616 = arith.addf %605, %607 : vector<8x2xf32>
      %cst_178 = arith.constant 2.000000e+00 : f32
      %617 = vector.broadcast %cst_178 : f32 to vector<8x2xf32>
      %618 = arith.mulf %617, %603 : vector<8x2xf32>
      %619 = arith.subf %616, %618 : vector<8x2xf32>
      %cst_179 = arith.constant 0.000000e+00 : f32
      %620 = vector.broadcast %cst_179 : f32 to vector<8x2xf32>
      %621 = arith.maximumf %619, %620 : vector<8x2xf32>
      %622 = math.sqrt %621 : vector<8x2xf32>
      %c0_180 = arith.constant 0 : index
      %c0_181 = arith.constant 0 : index
      %623 = vector.load %arg9[%c0_180, %c0_181] : memref<2x48xf32, #tpu.memory_space<vmem>>, vector<2x48xf32>
      %624 = vector.shape_cast %615 : vector<8x2xf32> to vector<8x2x1xf32>
      %625 = vector.extract_strided_slice %623 {offsets = [0, 0], sizes = [1, 48], strides = [1, 1]} : vector<2x48xf32> to vector<1x48xf32>
      %626 = vector.shape_cast %625 : vector<1x48xf32> to vector<1x1x48xf32>
      %627 = vector.broadcast %624 : vector<8x2x1xf32> to vector<8x2x48xf32>
      %628 = vector.broadcast %626 : vector<1x1x48xf32> to vector<8x2x48xf32>
      %629 = arith.mulf %627, %628 : vector<8x2x48xf32>
      %630 = vector.shape_cast %622 : vector<8x2xf32> to vector<8x2x1xf32>
      %631 = vector.extract_strided_slice %623 {offsets = [1, 0], sizes = [1, 48], strides = [1, 1]} : vector<2x48xf32> to vector<1x48xf32>
      %632 = vector.shape_cast %631 : vector<1x48xf32> to vector<1x1x48xf32>
      %633 = vector.broadcast %630 : vector<8x2x1xf32> to vector<8x2x48xf32>
      %634 = vector.broadcast %632 : vector<1x1x48xf32> to vector<8x2x48xf32>
      %635 = arith.mulf %633, %634 : vector<8x2x48xf32>
      %636 = arith.addf %629, %635 : vector<8x2x48xf32>
      %c0_182 = arith.constant 0 : index
      %c0_183 = arith.constant 0 : index
      %637 = vector.load %arg11[%c0_182, %c0_183] : memref<1x48xf32, #tpu.memory_space<vmem>>, vector<1x48xf32>
      %638 = vector.shape_cast %637 : vector<1x48xf32> to vector<1x1x48xf32>
      %639 = vector.broadcast %638 : vector<1x1x48xf32> to vector<8x2x48xf32>
      %640 = arith.addf %636, %639 : vector<8x2x48xf32>
      %c0_184 = arith.constant 0 : index
      %c0_185 = arith.constant 0 : index
      %c0_186 = arith.constant 0 : index
      %641 = vector.load %arg18[%c0_184, %c0_185, %c0_186] : memref<8x2x48xf32, #tpu.memory_space<vmem>>, vector<8x2x48xf32>
      tpu.vector_store %arg18[%c0_184, %c0_185, %c0_186], %640 {strides = array<i32>} : memref<8x2x48xf32, #tpu.memory_space<vmem>>, vector<8x2x48xf32>,
      %c0_187 = arith.constant 0 : index
      %c0_188 = arith.constant 0 : index
      %642 = vector.load %arg10[%c0_187, %c0_188] : memref<16x48xf32, #tpu.memory_space<vmem>>, vector<16x48xf32>
      %c0_189 = arith.constant 0 : index
      %c0_190 = arith.constant 0 : index
      %643 = vector.load %arg12[%c0_189, %c0_190] : memref<1x48xf32, #tpu.memory_space<vmem>>, vector<1x48xf32>
      %cst_191 = arith.constant 0.000000e+00 : f32
      %644 = vector.broadcast %cst_191 : f32 to vector<2x16xf32>
      %cst_192 = arith.constant dense<0.000000e+00> : vector<2x48xf32>
      %645 = tpu.matmul %644, %642, %cst_192 {dimension_numbers = #tpu.dot_dimension_numbers<[1], [0], [0], [1], [0, 0, 1, 1], [], []>} : vector<2x16xf32>, vector<16x48xf32>, vector<2x48xf32> -> vector<2x48xf32>
      %646 = vector.broadcast %643 : vector<1x48xf32> to vector<2x48xf32>
      %647 = arith.addf %645, %646 : vector<2x48xf32>
      %c0_193 = arith.constant 0 : index
      %c0_194 = arith.constant 0 : index
      %c0_195 = arith.constant 0 : index
      %648 = vector.load %arg18[%c0_193, %c0_194, %c0_195] : memref<8x2x48xf32, #tpu.memory_space<vmem>>, vector<1x2x48xf32>
      %649 = vector.shape_cast %648 : vector<1x2x48xf32> to vector<2x48xf32>
      %650 = vector.extract_strided_slice %649 {offsets = [0, 0], sizes = [2, 16], strides = [1, 1]} : vector<2x48xf32> to vector<2x16xf32>
      %651 = vector.extract_strided_slice %647 {offsets = [0, 0], sizes = [2, 16], strides = [1, 1]} : vector<2x48xf32> to vector<2x16xf32>
      %652 = arith.addf %650, %651 : vector<2x16xf32>
      %653 = arith.negf %652 : vector<2x16xf32>
      %654 = math.exp %653 : vector<2x16xf32>
      %cst_196 = arith.constant 1.000000e+00 : f32
      %655 = vector.broadcast %cst_196 : f32 to vector<2x16xf32>
      %656 = arith.addf %655, %654 : vector<2x16xf32>
      %657 = arith.divf %655, %656 : vector<2x16xf32>
      %658 = vector.extract_strided_slice %649 {offsets = [0, 16], sizes = [2, 16], strides = [1, 1]} : vector<2x48xf32> to vector<2x16xf32>
      %659 = vector.extract_strided_slice %647 {offsets = [0, 16], sizes = [2, 16], strides = [1, 1]} : vector<2x48xf32> to vector<2x16xf32>
      %660 = arith.addf %658, %659 : vector<2x16xf32>
      %661 = arith.negf %660 : vector<2x16xf32>
      %662 = math.exp %661 : vector<2x16xf32>
      %cst_197 = arith.constant 1.000000e+00 : f32
      %663 = vector.broadcast %cst_197 : f32 to vector<2x16xf32>
      %664 = arith.addf %663, %662 : vector<2x16xf32>
      %665 = arith.divf %663, %664 : vector<2x16xf32>
      %666 = vector.extract_strided_slice %649 {offsets = [0, 32], sizes = [2, 16], strides = [1, 1]} : vector<2x48xf32> to vector<2x16xf32>
      %667 = vector.extract_strided_slice %647 {offsets = [0, 32], sizes = [2, 16], strides = [1, 1]} : vector<2x48xf32> to vector<2x16xf32>
      %668 = arith.mulf %657, %667 : vector<2x16xf32>
      %669 = arith.addf %666, %668 : vector<2x16xf32>
      %670 = math.tanh %669 : vector<2x16xf32>
      %cst_198 = arith.constant 1.000000e+00 : f32
      %671 = vector.broadcast %cst_198 : f32 to vector<2x16xf32>
      %672 = arith.subf %671, %665 : vector<2x16xf32>
      %673 = arith.mulf %672, %670 : vector<2x16xf32>
      %674 = arith.mulf %665, %644 : vector<2x16xf32>
      %675 = arith.addf %673, %674 : vector<2x16xf32>
      %cst_199 = arith.constant dense<0.000000e+00> : vector<2x48xf32>
      %676 = tpu.matmul %675, %642, %cst_199 {dimension_numbers = #tpu.dot_dimension_numbers<[1], [0], [0], [1], [0, 0, 1, 1], [], []>} : vector<2x16xf32>, vector<16x48xf32>, vector<2x48xf32> -> vector<2x48xf32>
      %677 = vector.broadcast %643 : vector<1x48xf32> to vector<2x48xf32>
      %678 = arith.addf %676, %677 : vector<2x48xf32>
      %c1_200 = arith.constant 1 : index
      %c0_201 = arith.constant 0 : index
      %c0_202 = arith.constant 0 : index
      %679 = vector.load %arg18[%c1_200, %c0_201, %c0_202] : memref<8x2x48xf32, #tpu.memory_space<vmem>>, vector<1x2x48xf32>
      %680 = vector.shape_cast %679 : vector<1x2x48xf32> to vector<2x48xf32>
      %681 = vector.extract_strided_slice %680 {offsets = [0, 0], sizes = [2, 16], strides = [1, 1]} : vector<2x48xf32> to vector<2x16xf32>
      %682 = vector.extract_strided_slice %678 {offsets = [0, 0], sizes = [2, 16], strides = [1, 1]} : vector<2x48xf32> to vector<2x16xf32>
      %683 = arith.addf %681, %682 : vector<2x16xf32>
      %684 = arith.negf %683 : vector<2x16xf32>
      %685 = math.exp %684 : vector<2x16xf32>
      %cst_203 = arith.constant 1.000000e+00 : f32
      %686 = vector.broadcast %cst_203 : f32 to vector<2x16xf32>
      %687 = arith.addf %686, %685 : vector<2x16xf32>
      %688 = arith.divf %686, %687 : vector<2x16xf32>
      %689 = vector.extract_strided_slice %680 {offsets = [0, 16], sizes = [2, 16], strides = [1, 1]} : vector<2x48xf32> to vector<2x16xf32>
      %690 = vector.extract_strided_slice %678 {offsets = [0, 16], sizes = [2, 16], strides = [1, 1]} : vector<2x48xf32> to vector<2x16xf32>
      %691 = arith.addf %689, %690 : vector<2x16xf32>
      %692 = arith.negf %691 : vector<2x16xf32>
      %693 = math.exp %692 : vector<2x16xf32>
      %cst_204 = arith.constant 1.000000e+00 : f32
      %694 = vector.broadcast %cst_204 : f32 to vector<2x16xf32>
      %695 = arith.addf %694, %693 : vector<2x16xf32>
      %696 = arith.divf %694, %695 : vector<2x16xf32>
      %697 = vector.extract_strided_slice %680 {offsets = [0, 32], sizes = [2, 16], strides = [1, 1]} : vector<2x48xf32> to vector<2x16xf32>
      %698 = vector.extract_strided_slice %678 {offsets = [0, 32], sizes = [2, 16], strides = [1, 1]} : vector<2x48xf32> to vector<2x16xf32>
      %699 = arith.mulf %688, %698 : vector<2x16xf32>
      %700 = arith.addf %697, %699 : vector<2x16xf32>
      %701 = math.tanh %700 : vector<2x16xf32>
      %cst_205 = arith.constant 1.000000e+00 : f32
      %702 = vector.broadcast %cst_205 : f32 to vector<2x16xf32>
      %703 = arith.subf %702, %696 : vector<2x16xf32>
      %704 = arith.mulf %703, %701 : vector<2x16xf32>
      %705 = arith.mulf %696, %675 : vector<2x16xf32>
      %706 = arith.addf %704, %705 : vector<2x16xf32>
      %cst_206 = arith.constant dense<0.000000e+00> : vector<2x48xf32>
      %707 = tpu.matmul %706, %642, %cst_206 {dimension_numbers = #tpu.dot_dimension_numbers<[1], [0], [0], [1], [0, 0, 1, 1], [], []>} : vector<2x16xf32>, vector<16x48xf32>, vector<2x48xf32> -> vector<2x48xf32>
      %708 = vector.broadcast %643 : vector<1x48xf32> to vector<2x48xf32>
      %709 = arith.addf %707, %708 : vector<2x48xf32>
      %c2_207 = arith.constant 2 : index
      %c0_208 = arith.constant 0 : index
      %c0_209 = arith.constant 0 : index
      %710 = vector.load %arg18[%c2_207, %c0_208, %c0_209] : memref<8x2x48xf32, #tpu.memory_space<vmem>>, vector<1x2x48xf32>
      %711 = vector.shape_cast %710 : vector<1x2x48xf32> to vector<2x48xf32>
      %712 = vector.extract_strided_slice %711 {offsets = [0, 0], sizes = [2, 16], strides = [1, 1]} : vector<2x48xf32> to vector<2x16xf32>
      %713 = vector.extract_strided_slice %709 {offsets = [0, 0], sizes = [2, 16], strides = [1, 1]} : vector<2x48xf32> to vector<2x16xf32>
      %714 = arith.addf %712, %713 : vector<2x16xf32>
      %715 = arith.negf %714 : vector<2x16xf32>
      %716 = math.exp %715 : vector<2x16xf32>
      %cst_210 = arith.constant 1.000000e+00 : f32
      %717 = vector.broadcast %cst_210 : f32 to vector<2x16xf32>
      %718 = arith.addf %717, %716 : vector<2x16xf32>
      %719 = arith.divf %717, %718 : vector<2x16xf32>
      %720 = vector.extract_strided_slice %711 {offsets = [0, 16], sizes = [2, 16], strides = [1, 1]} : vector<2x48xf32> to vector<2x16xf32>
      %721 = vector.extract_strided_slice %709 {offsets = [0, 16], sizes = [2, 16], strides = [1, 1]} : vector<2x48xf32> to vector<2x16xf32>
      %722 = arith.addf %720, %721 : vector<2x16xf32>
      %723 = arith.negf %722 : vector<2x16xf32>
      %724 = math.exp %723 : vector<2x16xf32>
      %cst_211 = arith.constant 1.000000e+00 : f32
      %725 = vector.broadcast %cst_211 : f32 to vector<2x16xf32>
      %726 = arith.addf %725, %724 : vector<2x16xf32>
      %727 = arith.divf %725, %726 : vector<2x16xf32>
      %728 = vector.extract_strided_slice %711 {offsets = [0, 32], sizes = [2, 16], strides = [1, 1]} : vector<2x48xf32> to vector<2x16xf32>
      %729 = vector.extract_strided_slice %709 {offsets = [0, 32], sizes = [2, 16], strides = [1, 1]} : vector<2x48xf32> to vector<2x16xf32>
      %730 = arith.mulf %719, %729 : vector<2x16xf32>
      %731 = arith.addf %728, %730 : vector<2x16xf32>
      %732 = math.tanh %731 : vector<2x16xf32>
      %cst_212 = arith.constant 1.000000e+00 : f32
      %733 = vector.broadcast %cst_212 : f32 to vector<2x16xf32>
      %734 = arith.subf %733, %727 : vector<2x16xf32>
      %735 = arith.mulf %734, %732 : vector<2x16xf32>
      %736 = arith.mulf %727, %706 : vector<2x16xf32>
      %737 = arith.addf %735, %736 : vector<2x16xf32>
      %cst_213 = arith.constant dense<0.000000e+00> : vector<2x48xf32>
      %738 = tpu.matmul %737, %642, %cst_213 {dimension_numbers = #tpu.dot_dimension_numbers<[1], [0], [0], [1], [0, 0, 1, 1], [], []>} : vector<2x16xf32>, vector<16x48xf32>, vector<2x48xf32> -> vector<2x48xf32>
      %739 = vector.broadcast %643 : vector<1x48xf32> to vector<2x48xf32>
      %740 = arith.addf %738, %739 : vector<2x48xf32>
      %c3_214 = arith.constant 3 : index
      %c0_215 = arith.constant 0 : index
      %c0_216 = arith.constant 0 : index
      %741 = vector.load %arg18[%c3_214, %c0_215, %c0_216] : memref<8x2x48xf32, #tpu.memory_space<vmem>>, vector<1x2x48xf32>
      %742 = vector.shape_cast %741 : vector<1x2x48xf32> to vector<2x48xf32>
      %743 = vector.extract_strided_slice %742 {offsets = [0, 0], sizes = [2, 16], strides = [1, 1]} : vector<2x48xf32> to vector<2x16xf32>
      %744 = vector.extract_strided_slice %740 {offsets = [0, 0], sizes = [2, 16], strides = [1, 1]} : vector<2x48xf32> to vector<2x16xf32>
      %745 = arith.addf %743, %744 : vector<2x16xf32>
      %746 = arith.negf %745 : vector<2x16xf32>
      %747 = math.exp %746 : vector<2x16xf32>
      %cst_217 = arith.constant 1.000000e+00 : f32
      %748 = vector.broadcast %cst_217 : f32 to vector<2x16xf32>
      %749 = arith.addf %748, %747 : vector<2x16xf32>
      %750 = arith.divf %748, %749 : vector<2x16xf32>
      %751 = vector.extract_strided_slice %742 {offsets = [0, 16], sizes = [2, 16], strides = [1, 1]} : vector<2x48xf32> to vector<2x16xf32>
      %752 = vector.extract_strided_slice %740 {offsets = [0, 16], sizes = [2, 16], strides = [1, 1]} : vector<2x48xf32> to vector<2x16xf32>
      %753 = arith.addf %751, %752 : vector<2x16xf32>
      %754 = arith.negf %753 : vector<2x16xf32>
      %755 = math.exp %754 : vector<2x16xf32>
      %cst_218 = arith.constant 1.000000e+00 : f32
      %756 = vector.broadcast %cst_218 : f32 to vector<2x16xf32>
      %757 = arith.addf %756, %755 : vector<2x16xf32>
      %758 = arith.divf %756, %757 : vector<2x16xf32>
      %759 = vector.extract_strided_slice %742 {offsets = [0, 32], sizes = [2, 16], strides = [1, 1]} : vector<2x48xf32> to vector<2x16xf32>
      %760 = vector.extract_strided_slice %740 {offsets = [0, 32], sizes = [2, 16], strides = [1, 1]} : vector<2x48xf32> to vector<2x16xf32>
      %761 = arith.mulf %750, %760 : vector<2x16xf32>
      %762 = arith.addf %759, %761 : vector<2x16xf32>
      %763 = math.tanh %762 : vector<2x16xf32>
      %cst_219 = arith.constant 1.000000e+00 : f32
      %764 = vector.broadcast %cst_219 : f32 to vector<2x16xf32>
      %765 = arith.subf %764, %758 : vector<2x16xf32>
      %766 = arith.mulf %765, %763 : vector<2x16xf32>
      %767 = arith.mulf %758, %737 : vector<2x16xf32>
      %768 = arith.addf %766, %767 : vector<2x16xf32>
      %cst_220 = arith.constant dense<0.000000e+00> : vector<2x48xf32>
      %769 = tpu.matmul %768, %642, %cst_220 {dimension_numbers = #tpu.dot_dimension_numbers<[1], [0], [0], [1], [0, 0, 1, 1], [], []>} : vector<2x16xf32>, vector<16x48xf32>, vector<2x48xf32> -> vector<2x48xf32>
      %770 = vector.broadcast %643 : vector<1x48xf32> to vector<2x48xf32>
      %771 = arith.addf %769, %770 : vector<2x48xf32>
      %c4_221 = arith.constant 4 : index
      %c0_222 = arith.constant 0 : index
      %c0_223 = arith.constant 0 : index
      %772 = vector.load %arg18[%c4_221, %c0_222, %c0_223] : memref<8x2x48xf32, #tpu.memory_space<vmem>>, vector<1x2x48xf32>
      %773 = vector.shape_cast %772 : vector<1x2x48xf32> to vector<2x48xf32>
      %774 = vector.extract_strided_slice %773 {offsets = [0, 0], sizes = [2, 16], strides = [1, 1]} : vector<2x48xf32> to vector<2x16xf32>
      %775 = vector.extract_strided_slice %771 {offsets = [0, 0], sizes = [2, 16], strides = [1, 1]} : vector<2x48xf32> to vector<2x16xf32>
      %776 = arith.addf %774, %775 : vector<2x16xf32>
      %777 = arith.negf %776 : vector<2x16xf32>
      %778 = math.exp %777 : vector<2x16xf32>
      %cst_224 = arith.constant 1.000000e+00 : f32
      %779 = vector.broadcast %cst_224 : f32 to vector<2x16xf32>
      %780 = arith.addf %779, %778 : vector<2x16xf32>
      %781 = arith.divf %779, %780 : vector<2x16xf32>
      %782 = vector.extract_strided_slice %773 {offsets = [0, 16], sizes = [2, 16], strides = [1, 1]} : vector<2x48xf32> to vector<2x16xf32>
      %783 = vector.extract_strided_slice %771 {offsets = [0, 16], sizes = [2, 16], strides = [1, 1]} : vector<2x48xf32> to vector<2x16xf32>
      %784 = arith.addf %782, %783 : vector<2x16xf32>
      %785 = arith.negf %784 : vector<2x16xf32>
      %786 = math.exp %785 : vector<2x16xf32>
      %cst_225 = arith.constant 1.000000e+00 : f32
      %787 = vector.broadcast %cst_225 : f32 to vector<2x16xf32>
      %788 = arith.addf %787, %786 : vector<2x16xf32>
      %789 = arith.divf %787, %788 : vector<2x16xf32>
      %790 = vector.extract_strided_slice %773 {offsets = [0, 32], sizes = [2, 16], strides = [1, 1]} : vector<2x48xf32> to vector<2x16xf32>
      %791 = vector.extract_strided_slice %771 {offsets = [0, 32], sizes = [2, 16], strides = [1, 1]} : vector<2x48xf32> to vector<2x16xf32>
      %792 = arith.mulf %781, %791 : vector<2x16xf32>
      %793 = arith.addf %790, %792 : vector<2x16xf32>
      %794 = math.tanh %793 : vector<2x16xf32>
      %cst_226 = arith.constant 1.000000e+00 : f32
      %795 = vector.broadcast %cst_226 : f32 to vector<2x16xf32>
      %796 = arith.subf %795, %789 : vector<2x16xf32>
      %797 = arith.mulf %796, %794 : vector<2x16xf32>
      %798 = arith.mulf %789, %768 : vector<2x16xf32>
      %799 = arith.addf %797, %798 : vector<2x16xf32>
      %cst_227 = arith.constant dense<0.000000e+00> : vector<2x48xf32>
      %800 = tpu.matmul %799, %642, %cst_227 {dimension_numbers = #tpu.dot_dimension_numbers<[1], [0], [0], [1], [0, 0, 1, 1], [], []>} : vector<2x16xf32>, vector<16x48xf32>, vector<2x48xf32> -> vector<2x48xf32>
      %801 = vector.broadcast %643 : vector<1x48xf32> to vector<2x48xf32>
      %802 = arith.addf %800, %801 : vector<2x48xf32>
      %c5_228 = arith.constant 5 : index
      %c0_229 = arith.constant 0 : index
      %c0_230 = arith.constant 0 : index
      %803 = vector.load %arg18[%c5_228, %c0_229, %c0_230] : memref<8x2x48xf32, #tpu.memory_space<vmem>>, vector<1x2x48xf32>
      %804 = vector.shape_cast %803 : vector<1x2x48xf32> to vector<2x48xf32>
      %805 = vector.extract_strided_slice %804 {offsets = [0, 0], sizes = [2, 16], strides = [1, 1]} : vector<2x48xf32> to vector<2x16xf32>
      %806 = vector.extract_strided_slice %802 {offsets = [0, 0], sizes = [2, 16], strides = [1, 1]} : vector<2x48xf32> to vector<2x16xf32>
      %807 = arith.addf %805, %806 : vector<2x16xf32>
      %808 = arith.negf %807 : vector<2x16xf32>
      %809 = math.exp %808 : vector<2x16xf32>
      %cst_231 = arith.constant 1.000000e+00 : f32
      %810 = vector.broadcast %cst_231 : f32 to vector<2x16xf32>
      %811 = arith.addf %810, %809 : vector<2x16xf32>
      %812 = arith.divf %810, %811 : vector<2x16xf32>
      %813 = vector.extract_strided_slice %804 {offsets = [0, 16], sizes = [2, 16], strides = [1, 1]} : vector<2x48xf32> to vector<2x16xf32>
      %814 = vector.extract_strided_slice %802 {offsets = [0, 16], sizes = [2, 16], strides = [1, 1]} : vector<2x48xf32> to vector<2x16xf32>
      %815 = arith.addf %813, %814 : vector<2x16xf32>
      %816 = arith.negf %815 : vector<2x16xf32>
      %817 = math.exp %816 : vector<2x16xf32>
      %cst_232 = arith.constant 1.000000e+00 : f32
      %818 = vector.broadcast %cst_232 : f32 to vector<2x16xf32>
      %819 = arith.addf %818, %817 : vector<2x16xf32>
      %820 = arith.divf %818, %819 : vector<2x16xf32>
      %821 = vector.extract_strided_slice %804 {offsets = [0, 32], sizes = [2, 16], strides = [1, 1]} : vector<2x48xf32> to vector<2x16xf32>
      %822 = vector.extract_strided_slice %802 {offsets = [0, 32], sizes = [2, 16], strides = [1, 1]} : vector<2x48xf32> to vector<2x16xf32>
      %823 = arith.mulf %812, %822 : vector<2x16xf32>
      %824 = arith.addf %821, %823 : vector<2x16xf32>
      %825 = math.tanh %824 : vector<2x16xf32>
      %cst_233 = arith.constant 1.000000e+00 : f32
      %826 = vector.broadcast %cst_233 : f32 to vector<2x16xf32>
      %827 = arith.subf %826, %820 : vector<2x16xf32>
      %828 = arith.mulf %827, %825 : vector<2x16xf32>
      %829 = arith.mulf %820, %799 : vector<2x16xf32>
      %830 = arith.addf %828, %829 : vector<2x16xf32>
      %cst_234 = arith.constant dense<0.000000e+00> : vector<2x48xf32>
      %831 = tpu.matmul %830, %642, %cst_234 {dimension_numbers = #tpu.dot_dimension_numbers<[1], [0], [0], [1], [0, 0, 1, 1], [], []>} : vector<2x16xf32>, vector<16x48xf32>, vector<2x48xf32> -> vector<2x48xf32>
      %832 = vector.broadcast %643 : vector<1x48xf32> to vector<2x48xf32>
      %833 = arith.addf %831, %832 : vector<2x48xf32>
      %c6_235 = arith.constant 6 : index
      %c0_236 = arith.constant 0 : index
      %c0_237 = arith.constant 0 : index
      %834 = vector.load %arg18[%c6_235, %c0_236, %c0_237] : memref<8x2x48xf32, #tpu.memory_space<vmem>>, vector<1x2x48xf32>
      %835 = vector.shape_cast %834 : vector<1x2x48xf32> to vector<2x48xf32>
      %836 = vector.extract_strided_slice %835 {offsets = [0, 0], sizes = [2, 16], strides = [1, 1]} : vector<2x48xf32> to vector<2x16xf32>
      %837 = vector.extract_strided_slice %833 {offsets = [0, 0], sizes = [2, 16], strides = [1, 1]} : vector<2x48xf32> to vector<2x16xf32>
      %838 = arith.addf %836, %837 : vector<2x16xf32>
      %839 = arith.negf %838 : vector<2x16xf32>
      %840 = math.exp %839 : vector<2x16xf32>
      %cst_238 = arith.constant 1.000000e+00 : f32
      %841 = vector.broadcast %cst_238 : f32 to vector<2x16xf32>
      %842 = arith.addf %841, %840 : vector<2x16xf32>
      %843 = arith.divf %841, %842 : vector<2x16xf32>
      %844 = vector.extract_strided_slice %835 {offsets = [0, 16], sizes = [2, 16], strides = [1, 1]} : vector<2x48xf32> to vector<2x16xf32>
      %845 = vector.extract_strided_slice %833 {offsets = [0, 16], sizes = [2, 16], strides = [1, 1]} : vector<2x48xf32> to vector<2x16xf32>
      %846 = arith.addf %844, %845 : vector<2x16xf32>
      %847 = arith.negf %846 : vector<2x16xf32>
      %848 = math.exp %847 : vector<2x16xf32>
      %cst_239 = arith.constant 1.000000e+00 : f32
      %849 = vector.broadcast %cst_239 : f32 to vector<2x16xf32>
      %850 = arith.addf %849, %848 : vector<2x16xf32>
      %851 = arith.divf %849, %850 : vector<2x16xf32>
      %852 = vector.extract_strided_slice %835 {offsets = [0, 32], sizes = [2, 16], strides = [1, 1]} : vector<2x48xf32> to vector<2x16xf32>
      %853 = vector.extract_strided_slice %833 {offsets = [0, 32], sizes = [2, 16], strides = [1, 1]} : vector<2x48xf32> to vector<2x16xf32>
      %854 = arith.mulf %843, %853 : vector<2x16xf32>
      %855 = arith.addf %852, %854 : vector<2x16xf32>
      %856 = math.tanh %855 : vector<2x16xf32>
      %cst_240 = arith.constant 1.000000e+00 : f32
      %857 = vector.broadcast %cst_240 : f32 to vector<2x16xf32>
      %858 = arith.subf %857, %851 : vector<2x16xf32>
      %859 = arith.mulf %858, %856 : vector<2x16xf32>
      %860 = arith.mulf %851, %830 : vector<2x16xf32>
      %861 = arith.addf %859, %860 : vector<2x16xf32>
      %cst_241 = arith.constant dense<0.000000e+00> : vector<2x48xf32>
      %862 = tpu.matmul %861, %642, %cst_241 {dimension_numbers = #tpu.dot_dimension_numbers<[1], [0], [0], [1], [0, 0, 1, 1], [], []>} : vector<2x16xf32>, vector<16x48xf32>, vector<2x48xf32> -> vector<2x48xf32>
      %863 = vector.broadcast %643 : vector<1x48xf32> to vector<2x48xf32>
      %864 = arith.addf %862, %863 : vector<2x48xf32>
      %c7_242 = arith.constant 7 : index
      %c0_243 = arith.constant 0 : index
      %c0_244 = arith.constant 0 : index
      %865 = vector.load %arg18[%c7_242, %c0_243, %c0_244] : memref<8x2x48xf32, #tpu.memory_space<vmem>>, vector<1x2x48xf32>
      %866 = vector.shape_cast %865 : vector<1x2x48xf32> to vector<2x48xf32>
      %867 = vector.extract_strided_slice %866 {offsets = [0, 0], sizes = [2, 16], strides = [1, 1]} : vector<2x48xf32> to vector<2x16xf32>
      %868 = vector.extract_strided_slice %864 {offsets = [0, 0], sizes = [2, 16], strides = [1, 1]} : vector<2x48xf32> to vector<2x16xf32>
      %869 = arith.addf %867, %868 : vector<2x16xf32>
      %870 = arith.negf %869 : vector<2x16xf32>
      %871 = math.exp %870 : vector<2x16xf32>
      %cst_245 = arith.constant 1.000000e+00 : f32
      %872 = vector.broadcast %cst_245 : f32 to vector<2x16xf32>
      %873 = arith.addf %872, %871 : vector<2x16xf32>
      %874 = arith.divf %872, %873 : vector<2x16xf32>
      %875 = vector.extract_strided_slice %866 {offsets = [0, 16], sizes = [2, 16], strides = [1, 1]} : vector<2x48xf32> to vector<2x16xf32>
      %876 = vector.extract_strided_slice %864 {offsets = [0, 16], sizes = [2, 16], strides = [1, 1]} : vector<2x48xf32> to vector<2x16xf32>
      %877 = arith.addf %875, %876 : vector<2x16xf32>
      %878 = arith.negf %877 : vector<2x16xf32>
      %879 = math.exp %878 : vector<2x16xf32>
      %cst_246 = arith.constant 1.000000e+00 : f32
      %880 = vector.broadcast %cst_246 : f32 to vector<2x16xf32>
      %881 = arith.addf %880, %879 : vector<2x16xf32>
      %882 = arith.divf %880, %881 : vector<2x16xf32>
      %883 = vector.extract_strided_slice %866 {offsets = [0, 32], sizes = [2, 16], strides = [1, 1]} : vector<2x48xf32> to vector<2x16xf32>
      %884 = vector.extract_strided_slice %864 {offsets = [0, 32], sizes = [2, 16], strides = [1, 1]} : vector<2x48xf32> to vector<2x16xf32>
      %885 = arith.mulf %874, %884 : vector<2x16xf32>
      %886 = arith.addf %883, %885 : vector<2x16xf32>
      %887 = math.tanh %886 : vector<2x16xf32>
      %cst_247 = arith.constant 1.000000e+00 : f32
      %888 = vector.broadcast %cst_247 : f32 to vector<2x16xf32>
      %889 = arith.subf %888, %882 : vector<2x16xf32>
      %890 = arith.mulf %889, %887 : vector<2x16xf32>
      %891 = arith.mulf %882, %861 : vector<2x16xf32>
      %892 = arith.addf %890, %891 : vector<2x16xf32>
      %c0_248 = arith.constant 0 : index
      %c0_249 = arith.constant 0 : index
      %893 = vector.load %arg13[%c0_248, %c0_249] : memref<1x16xf32, #tpu.memory_space<vmem>>, vector<1x16xf32>
      %894 = vector.broadcast %893 : vector<1x16xf32> to vector<2x16xf32>
      %895 = arith.mulf %892, %894 : vector<2x16xf32>
      %cst_250 = arith.constant dense<0.000000e+00> : vector<2xf32>
      %896 = vector.multi_reduction <add>, %895, %cst_250 [1] : vector<2x16xf32> to vector<2xf32>
      %897 = vector.shape_cast %896 : vector<2xf32> to vector<2x1xf32>
      %c0_251 = arith.constant 0 : index
      %c0_252 = arith.constant 0 : index
      %898 = vector.load %arg14[%c0_251, %c0_252] : memref<1x1xf32, #tpu.memory_space<vmem>>, vector<1x1xf32>
      %899 = vector.broadcast %898 : vector<1x1xf32> to vector<2x1xf32>
      %900 = arith.addf %897, %899 : vector<2x1xf32>
      %901 = arith.negf %900 : vector<2x1xf32>
      %902 = math.exp %901 : vector<2x1xf32>
      %cst_253 = arith.constant 1.000000e+00 : f32
      %903 = vector.broadcast %cst_253 : f32 to vector<2x1xf32>
      %904 = arith.addf %903, %902 : vector<2x1xf32>
      %905 = arith.divf %903, %904 : vector<2x1xf32>
      %c0_254 = arith.constant 0 : index
      %c0_255 = arith.constant 0 : index
      %906 = vector.load %arg15[%c0_254, %c0_255] : memref<2x1xf32, #tpu.memory_space<vmem>>, vector<2x1xf32>
      tpu.vector_store %arg15[%c0_254, %c0_255], %905 {strides = array<i32>} : memref<2x1xf32, #tpu.memory_space<vmem>>, vector<2x1xf32>,
    } else {
    }
    return
  }
  func.func @transform_0(%arg0: i32, %arg1: i32) -> (i32, i32, i32) {
    %c0_i32 = arith.constant 0 : i32
    %c0_i32_0 = arith.constant 0 : i32
    return %arg1, %arg0, %c0_i32 : i32, i32, i32
  }
  func.func @transform_1(%arg0: i32, %arg1: i32) -> (i32, i32) {
    %c0_i32 = arith.constant 0 : i32
    %c0_i32_0 = arith.constant 0 : i32
    %c0_i32_1 = arith.constant 0 : i32
    return %c0_i32, %c0_i32_0 : i32, i32
  }
  func.func @transform_2(%arg0: i32, %arg1: i32) -> (i32, i32) {
    %c0_i32 = arith.constant 0 : i32
    %c0_i32_0 = arith.constant 0 : i32
    %c0_i32_1 = arith.constant 0 : i32
    return %c0_i32, %c0_i32_0 : i32, i32
  }
  func.func @transform_3(%arg0: i32, %arg1: i32) -> (i32, i32) {
    %c0_i32 = arith.constant 0 : i32
    %c0_i32_0 = arith.constant 0 : i32
    %c0_i32_1 = arith.constant 0 : i32
    return %c0_i32, %c0_i32_0 : i32, i32
  }
  func.func @transform_4(%arg0: i32, %arg1: i32) -> (i32, i32) {
    %c0_i32 = arith.constant 0 : i32
    %c0_i32_0 = arith.constant 0 : i32
    %c0_i32_1 = arith.constant 0 : i32
    return %c0_i32, %c0_i32_0 : i32, i32
  }
  func.func @transform_5(%arg0: i32, %arg1: i32) -> (i32, i32) {
    %c0_i32 = arith.constant 0 : i32
    %c0_i32_0 = arith.constant 0 : i32
    %c0_i32_1 = arith.constant 0 : i32
    return %c0_i32, %c0_i32_0 : i32, i32
  }
  func.func @transform_6(%arg0: i32, %arg1: i32) -> (i32, i32) {
    %c0_i32 = arith.constant 0 : i32
    %c0_i32_0 = arith.constant 0 : i32
    %c0_i32_1 = arith.constant 0 : i32
    return %c0_i32, %c0_i32_0 : i32, i32
  }
  func.func @transform_7(%arg0: i32, %arg1: i32) -> (i32, i32) {
    %c0_i32 = arith.constant 0 : i32
    %c0_i32_0 = arith.constant 0 : i32
    %c0_i32_1 = arith.constant 0 : i32
    return %c0_i32, %c0_i32_0 : i32, i32
  }
  func.func @transform_8(%arg0: i32, %arg1: i32) -> (i32, i32) {
    %c0_i32 = arith.constant 0 : i32
    %c0_i32_0 = arith.constant 0 : i32
    %c0_i32_1 = arith.constant 0 : i32
    return %c0_i32, %c0_i32_0 : i32, i32
  }
  func.func @transform_9(%arg0: i32, %arg1: i32) -> (i32, i32) {
    %c0_i32 = arith.constant 0 : i32
    %c0_i32_0 = arith.constant 0 : i32
    %c0_i32_1 = arith.constant 0 : i32
    return %c0_i32, %c0_i32_0 : i32, i32
  }
  func.func @transform_10(%arg0: i32, %arg1: i32) -> (i32, i32) {
    %c0_i32 = arith.constant 0 : i32
    %c0_i32_0 = arith.constant 0 : i32
    %c0_i32_1 = arith.constant 0 : i32
    return %c0_i32, %c0_i32_0 : i32, i32
  }
  func.func @transform_11(%arg0: i32, %arg1: i32) -> (i32, i32) {
    %c0_i32 = arith.constant 0 : i32
    %c0_i32_0 = arith.constant 0 : i32
    %c0_i32_1 = arith.constant 0 : i32
    return %c0_i32, %c0_i32_0 : i32, i32
  }
  func.func @transform_12(%arg0: i32, %arg1: i32) -> (i32, i32) {
    %c0_i32 = arith.constant 0 : i32
    %c0_i32_0 = arith.constant 0 : i32
    %c0_i32_1 = arith.constant 0 : i32
    return %c0_i32, %c0_i32_0 : i32, i32
  }
  func.func @transform_13(%arg0: i32, %arg1: i32) -> (i32, i32) {
    %c0_i32 = arith.constant 0 : i32
    %c0_i32_0 = arith.constant 0 : i32
    return %arg0, %c0_i32 : i32, i32
  }
}

</mosaic_0001>

<bundles_post_ra>
// kernel: tpu_custom_call.1
= control target key start
LH: loop header
LB: loop body
LE: loop exit
PB: predicated region body
PF: predicated region fallthrough
CT: control target
= control target key end

     0   :  { %s6986_s0 = inlined_call_operand.hbm [shape: f32[8,4,32], index: 0, kind: input, shape index: {}]   ;;  %s6987_s1 = inlined_call_operand.hbm [shape: f32[32,96], index: 1, kind: input, shape index: {}]   ;;  %s6988_s2 = inlined_call_operand.hbm [shape: f32[32,96], index: 2, kind: input, shape index: {}]   ;;  %s6989_s3 = inlined_call_operand.vmem [shape: f32[1,96], index: 3, kind: input, shape index: {}]   ;;  %s6990_s4 = inlined_call_operand.vmem [shape: f32[1,96], index: 4, kind: input, shape index: {}]   ;;  %s6991_s5 = inlined_call_operand.hbm [shape: f32[32,32], index: 5, kind: input, shape index: {}]   ;;  %s6992_s6 = inlined_call_operand.vmem [shape: f32[1,32], index: 6, kind: input, shape index: {}]   ;;  %s6993_s7 = inlined_call_operand.vmem [shape: f32[2,48], index: 7, kind: input, shape index: {}]   ;;  %s6994_s8 = inlined_call_operand.vmem [shape: f32[16,48], index: 8, kind: input, shape index: {}]   ;;  %s6995_s9 = inlined_call_operand.vmem [shape: f32[1,48], index: 9, kind: input, shape index: {}]   ;;  %s6996_s10 = inlined_call_operand.vmem [shape: f32[1,48], index: 10, kind: input, shape index: {}]   ;;  %s6997_s11 = inlined_call_operand.vmem [shape: f32[1,16], index: 11, kind: input, shape index: {}]   ;;  %s6998_s12 = inlined_call_operand.<no memory space> [shape: f32[1,1], index: 12, kind: input, shape index: {}]   ;;  %s6999_s13 = inlined_call_operand.vmem [shape: f32[2,1], index: 13, kind: output, shape index: {}]  }
   0x1   :  { %v18_v0 = vstv %s6998_s12 }
   0x2   :  { %19 = vst [vmem:[#allocation5] sm:$0x1] %v18_v0 }
   0x3   :  { %20 = vsyncpa [#allocation7], 0 }
   0x4   :  { %21 = vsyncpa [#allocation9], 0 }
   0x5   :  { %22 = vsyncpa [#allocation12], 0  ;;  %s6137_s27 = smov [#allocation8]   ;;  %s6043_s14 = scalar_lea.hbm %s6987_s1, 512 }
   0x6   :  { %s40_s28 = sshll.u32 %s6137_s27, 4  ;;  %p6044_p0 = scmp.ne.s32.totalorder %s6987_s1, %s6043_s14  ;;  %s41_s28 = int_to_ptr.vmem [resolvable:$true] %s40_s28 }
   0x7   :  { %p6047_p1 = scmp.lt.u32.totalorder %s6043_s14, %s6987_s1 }
   0x9   :  { %p6049_p2 = pnand %p6047_p1, %p6044_p0 }
   0xb   :  { %6052 = shalt.err (!%p6049_p2)
}
   0xc   :  { %s6053_s12 = scalar_lea.vmem %s41_s28, 512  ;;  %p6058_p4 = scmp.lt.s32.totalorder %s41_s28, %s41_s28 }
   0xd   :  { %p6054_p3 = scmp.ne.s32.totalorder %s41_s28, %s6053_s12  ;;  %p6059_p5 = scmp.lt.s32.totalorder %s6053_s12, %s6053_s12 }
   0xf   :  { %p6060_p6 = por %p6059_p5, %p6058_p4 }
  0x11   :  { %p6061_p7 = pnand %p6060_p6, %p6054_p3 }
  0x13   :  { %6064 = shalt.err (!%p6061_p7)
}
  0x14   :  { %s6138_s19 = smov 128   ;;  %s6139_s20 = smov 8  }
  0x15   :  { %46 = dma.hbm_to_vmem [thread:$0]  %s6987_s1, 512, %s41_s28, [#allocation9], %s6138_s19, %s6138_s19, %s6139_s20  }
  0x16   :  { %s6140_s23 = smov [#allocation6]   ;;  %s6065_s27 = scalar_lea.hbm %s6986_s0, 512 }
  0x17   :  { %s28_s24 = sshll.u32 %s6140_s23, 4  ;;  %p6066_p8 = scmp.ne.s32.totalorder %s6986_s0, %s6065_s27  ;;  %s29_s24 = int_to_ptr.vmem [resolvable:$true] %s28_s24 }
  0x18   :  { %p6069_p9 = scmp.lt.u32.totalorder %s6065_s27, %s6986_s0 }
  0x1a   :  { %p6071_p10 = pnand %p6069_p9, %p6066_p8 }
  0x1c   :  { %6074 = shalt.err (!%p6071_p10)
}
  0x1d   :  { %s6075_s16 = scalar_lea.vmem %s29_s24, 512  ;;  %p6080_p12 = scmp.lt.s32.totalorder %s29_s24, %s29_s24 }
  0x1e   :  { %p6076_p11 = scmp.ne.s32.totalorder %s29_s24, %s6075_s16  ;;  %p6081_p13 = scmp.lt.s32.totalorder %s6075_s16, %s6075_s16 }
  0x20   :  { %p6082_p0 = por %p6081_p13, %p6080_p12 }
  0x22   :  { %p6083_p1 = pnand %p6082_p0, %p6076_p11 }
  0x24   :  { %6086 = shalt.err (!%p6083_p1)
}
  0x25   :  { %s6141_s1 = smov 64   ;;  %s6142_s28 = smov 4  }
  0x26   :  { %34 = dma.hbm_to_vmem [thread:$0]  %s6986_s0, 512, %s29_s24, [#allocation7], %s6141_s1, %s6141_s1, %s6142_s28  }
  0x27   :  { %s6143_s12 = smov [#allocation10]   ;;  %s6144_s22 = smov [#allocation11]  }
  0x28   :  { %s52_s21 = sshll.u32 %s6143_s12, 4  ;;  %s68_s23 = sshll.u32 %s6144_s22, 4  ;;  %s53_s21 = int_to_ptr.vmem [resolvable:$true] %s52_s21  ;;  %s6256_s23 = int_to_ptr.vmem [resolvable:$true] %s68_s23 }
  0x29   :  { %s6087_s27 = scalar_lea.hbm %s6988_s2, 512 }
  0x2a   :  { %p6088_p2 = scmp.ne.s32.totalorder %s6988_s2, %s6087_s27  ;;  %p6091_p3 = scmp.lt.u32.totalorder %s6087_s27, %s6988_s2 }
  0x2c   :  { %p6093_p4 = pnand %p6091_p3, %p6088_p2 }
  0x2e   :  { %6096 = shalt.err (!%p6093_p4)
}
  0x2f   :  { %s6097_s0 = scalar_lea.vmem %s53_s21, 512  ;;  %p6102_p6 = scmp.lt.s32.totalorder %s53_s21, %s53_s21 }
  0x30   :  { %p6098_p5 = scmp.ne.s32.totalorder %s53_s21, %s6097_s0  ;;  %p6103_p7 = scmp.lt.s32.totalorder %s6097_s0, %s6097_s0 }
  0x32   :  { %p6104_p8 = por %p6103_p7, %p6102_p6 }
  0x34   :  { %p6105_p9 = pnand %p6104_p8, %p6098_p5 }
  0x36   :  { %6108 = shalt.err (!%p6105_p9)
}
  0x37   :  { %58 = dma.hbm_to_vmem [thread:$0]  %s6988_s2, 512, %s53_s21, [#allocation9], %s6138_s19, %s6138_s19, %s6139_s20  }
  0x38   :  { %s6109_s17 = scalar_lea.hbm %s6991_s5, 512 }
  0x39   :  { %p6110_p10 = scmp.ne.s32.totalorder %s6991_s5, %s6109_s17  ;;  %p6113_p11 = scmp.lt.u32.totalorder %s6109_s17, %s6991_s5 }
  0x3b   :  { %p6115_p12 = pnand %p6113_p11, %p6110_p10 }
  0x3d   :  { %6118 = shalt.err (!%p6115_p12)
}
  0x3e   :  { %s6119_s26 = scalar_lea.vmem %s6256_s23, 512  ;;  %p6124_p0 = scmp.lt.s32.totalorder %s6256_s23, %s6256_s23 }
  0x3f   :  { %p6120_p13 = scmp.ne.s32.totalorder %s6256_s23, %s6119_s26  ;;  %p6125_p1 = scmp.lt.s32.totalorder %s6119_s26, %s6119_s26 }
  0x41   :  { %p6126_p2 = por %p6125_p1, %p6124_p0 }
  0x43   :  { %p6127_p3 = pnand %p6126_p2, %p6120_p13 }
  0x45   :  { %6130 = shalt.err (!%p6127_p3)
}
  0x46   :  { %74 = dma.hbm_to_vmem [thread:$0]  %s6991_s5, 512, %s6256_s23, [#allocation12], %s6138_s19, %s6138_s19, %s6139_s20  }
  0x47   :  { %6131 = dma.done.wait [#allocation7], 512  }
  0x48   :  { %6132 = vsyncadd [#allocation7], 4294966784 }
  0x49   :  { %6133 = dma.done.wait [#allocation9], 1024  }
  0x4a   :  { %6134 = vsyncadd [#allocation9], 4294966272 }
  0x4b   :  { %6135 = dma.done.wait [#allocation12], 512  }
  0x4c   :  { %6136 = vsyncadd [#allocation12], 4294966784  ;;  %v6145_v1 = vmov 0.0|0.0   ;;  %vm6146_vm0 = vmmov 0   ;;  %v6147_v2 = vmov 0.0   ;;  %v110_v3 = vld [vmem:[#allocation8] sm:$0xff] }
  0x4d   :  { %5709 = vmatprep.subr.bf16.mxu1 %v6145_v1  ;;  %5522 = vmatprep.mubr.msk.f32.mxu1 %vm6146_vm0, %v6147_v2  ;;  %v111_v4 = vld [vmem:[#allocation8 + $0x8] sm:$0xff]  ;;  %v254_v5 = vld [vmem:[#allocation10] sm:$0xff]  ;;  %v112_v8 = vld [vmem:[#allocation8 + $0x10] sm:$0xff]  ;;  %vm133_vm1 = vcmask 261120   ;;  %vm241_vm2 = vcmask 781312   ;;  %s6148_s27 = smov 96  }
  0x4e   :  { %v5701_v6 = vpack.c.bf16 %v111_v4, %v110_v3  ;;  %v255_v7 = vld [vmem:[#allocation10 + $0x8] sm:$0xff]  ;;  %v113_v9 = vld [vmem:[#allocation8 + $0x18] sm:$0xff]  ;;  %v256_v12 = vld [vmem:[#allocation10 + $0x10] sm:$0xff]  ;;  %s6151_s29 = smov 80   ;;  %vm402_vm3 = vcmask 257152   ;;  %vm399_vm4 = vcmask 125952  }
  0x4f   :  { %v6296_v10 = vpack.c.bf16 %v255_v7, %v254_v5  ;;  %v5705_v11 = vpack.c.bf16 %v113_v9, %v112_v8  ;;  %v257_v13 = vld [vmem:[#allocation10 + $0x18] sm:$0xff]  ;;  %v5820_v14 = vld [vmem:[#allocation6] sm:$0xff]   ;;  %v5821_v16 = vld [vmem:[#allocation6 + $0x8] sm:$0xff]   ;;  %vm397_vm5 = vcmask 130048   ;;  %s6152_s30 = smov 16   ;;  %s6153_s14 = smov 48  }
  0x50   :  { %5702 = vmatprep.subr.bf16.mxu0 %v5701_v6  ;;  %v6299_v15 = vpack.c.bf16 %v257_v13, %v256_v12  ;;  %5508 = vmatprep.mubr.msk.f32.mxu0 %vm133_vm1, %v5820_v14  ;;  %v5822_v17 = vld [vmem:[#allocation6 + $0x10] sm:$0xff]   ;;  %v5823_v18 = vld [vmem:[#allocation6 + $0x18] sm:$0xff]   ;;  %v6325_v19 = vld [vmem:[%s6990_s4] ss:$0 sm:$0xff]  ;;  %s6150_s4 = smov 112   ;;  %vm3841_vm6 = vcmask 64512  }
  0x51   :  { %5711 = vmatpush3.bf16.msra.mxu1 %v6296_v10  ;;  %5704 = vmatpush3.bf16.msra.mxu0 %v5701_v6  ;;  %v5350_v20 = vld [vmem:[%s6989_s3] ss:$0 sm:$0xff]  ;;  %s6149_s3 = smov 32   ;;  %vm4198_vm7 = vcmask 254976   ;;  %vm4471_vm10 = vcmask 386048  }
  0x52   :  { %5712 = vmatprep.subr.bf16.mxu1 %v6145_v1  ;;  %5706 = vmatprep.subr.bf16.mxu0 %v5705_v11 }
  0x55   :  { %5714 = vmatpush3.bf16.msra.mxu1 %v6299_v15  ;;  %5708 = vmatpush3.bf16.msra.mxu0 %v5705_v11 }
  0x56   :  { %5715 = vmatprep.subr.bf16.mxu0 %v6145_v1  ;;  %5721 = vmatprep.subr.bf16.mxu1 %v6145_v1 }
  0x58   :  { %5523 = vmatmul.mubr.f32.vlgmr.msra.gmra.mrb[0].mxu1 %v6147_v2  ;;  %5509 = vmatmul.mubr.msk.f32.vlgmr.msra.gmra.mrb[0].mxu0 %vm133_vm1, %v5821_v16 }
  0x59   :  { %5511 = vmatprep.mubr.msk.f32.mxu0 %vm133_vm1, %v5822_v17  ;;  %5717 = vmatpush3.bf16.msra.mxu0 %v6296_v10 }
  0x5a   :  { %5718 = vmatprep.subr.bf16.mxu0 %v6145_v1  ;;  %5723 = vmatpush3.bf16.msra.mxu1 %v6296_v10 }
  0x5b   :  { %5724 = vmatprep.subr.bf16.mxu1 %v6145_v1  ;;  %5544 = vmatprep.mubr.msk.f32.mxu1 %vm6146_vm0, %v6147_v2 }
  0x5c   :  { %5512 = vmatmul.mubr.msk.f32.gmra.mrb[2].mxu0 %vm133_vm1, %v5823_v18 }
  0x5d   :  { %5720 = vmatpush3.bf16.msra.mxu0 %v6299_v15  ;;  %5533 = vmatprep.mubr.msk.f32.mxu0 %vm6146_vm0, %v6147_v2 }
  0x5e   :  { %5726 = vmatpush3.bf16.msra.mxu1 %v6299_v15  ;;  %5727 = vmatprep.subr.bf16.mxu0 %v6145_v1 }
  0x5f   :  { %5733 = vmatprep.subr.bf16.mxu1 %v6145_v1 }
 0x12b   :  { %v337_v21 = vpop.f32.mrb[0].mxu1  ;;  %v5510_v22 = vpop.f32.mrb[0].mxu0 }
 0x12c   :  { %v338_v23 = vadd.f32 %v6325_v19, %v337_v21  ;;  %v214_v24 = vadd.f32 %v5510_v22, %v5350_v20  ;;  %v5524_v25 = vpop.f32.mrb[1].mxu1  ;;  %v208_v26 = vpop.f32.mrb[1].mxu0 }
 0x12d   :  { %v209_v27 = vadd.f32 %v5350_v20, %v208_v26 }
 0x12e   :  { %v232_v28 = vcombine.high %v214_v24, %v214_v24  ;;  %244 = vst.msk [vmem:[#allocation2 + $0x8] sm:$0xf] %vm241_vm2, %v214_v24  ;;  %349 = vrot.lane.b32.xlu0 %v338_v23, %s6148_s27 }
 0x12f   :  { %v231_v29 = vcombine.high %v209_v27, %v209_v27  ;;  %242 = vst.msk [vmem:[#allocation2] sm:$0xf] %vm241_vm2, %v209_v27  ;;  %v5513_v30 = vpop.f32.mrb[2].mxu0 }
 0x130   :  { %245 = vst.msk [vmem:[#allocation2 + $0xc] sm:$0xf] %vm241_vm2, %v232_v28  ;;  %v224_v31 = vadd.f32 %v5513_v30, %v5350_v20  ;;  %v218_v32 = vpop.f32.mrb[3].mxu0 }
 0x131   :  { %243 = vst.msk [vmem:[#allocation2 + $0x4] sm:$0xf] %vm241_vm2, %v231_v29  ;;  %v219_v33 = vadd.f32 %v5350_v20, %v218_v32 }
 0x132   :  { %v234_v34 = vcombine.high %v224_v31, %v224_v31  ;;  %248 = vst.msk [vmem:[#allocation2 + $0x18] sm:$0xf] %vm241_vm2, %v224_v31 }
 0x133   :  { %v233_v35 = vcombine.high %v219_v33, %v219_v33  ;;  %246 = vst.msk [vmem:[#allocation2 + $0x10] sm:$0xf] %vm241_vm2, %v219_v33 }
 0x134   :  { %249 = vst.msk [vmem:[#allocation2 + $0x1c] sm:$0xf] %vm241_vm2, %v234_v34 }
 0x135   :  { %247 = vst.msk [vmem:[#allocation2 + $0x14] sm:$0xf] %vm241_vm2, %v233_v35 }
 0x136   :  { %v259_v36 = vld [vmem:[#allocation2] sm:$0xf] }
 0x137   :  { %v341_v38 = vadd.f32 %v338_v23, %v259_v36 }
 0x138   :  { %v405_v12 = vld [vmem:[#allocation2 + $0x4] sm:$0xf] }
 0x139   :  { %v5356_v40 = vmul.f32 -1.442695, %v341_v38  ;;  %v407_v13 = vld [vmem:[#allocation2 + $0x18] sm:$0xf] }
 0x13b   :  { %v261_v37 = vld [vmem:[#allocation2 + $0x1c] sm:$0xf]  ;;  %5832 = vpow2.f32 %v5356_v40 }
 0x13c   :  { %v367_v39 = vadd.f32 %v338_v23, %v261_v37 }
 0x13e   :  { %v5357_v41 = vmul.f32 -1.442695, %v367_v39 }
 0x140   :  { %5834 = vpow2.f32 %v5357_v41 }
 0x145   :  { %v5833_v42 = vpop.eup %5832 }
 0x146   :  { %v345_v44 = vadd.f32 1.0, %v5833_v42 }
 0x148   :  { %5836 = vrcp.f32 %v345_v44 }
 0x14a   :  { %v5835_v43 = vpop.eup %5834 }
 0x14b   :  { %v371_v45 = vadd.f32 1.0, %v5835_v43 }
 0x14d   :  { %5838 = vrcp.f32 %v371_v45 }
 0x152   :  { %v5837_v46 = vpop.eup %5836 }
 0x153   :  { %v359_v58 = vsub.f32 1.0, %v5837_v46  ;;  %v365_v63 = vmul.f32 0.0, %v5837_v46 }
 0x157   :  { %v5839_v47 = vpop.eup %5838 }
 0x158   :  { %v381_v57 = vsub.f32 1.0, %v5839_v47  ;;  %v387_v61 = vmul.f32 0.0, %v5839_v47 }
 0x1a0   :  { %v350_v48 = vpop.permute.xlu0 %349 }
 0x1a1   :  { %v352_v49 = vmul.f32 %v5837_v46, %v350_v48  ;;  %v374_v50 = vmul.f32 %v5839_v47, %v350_v48 }
 0x1a3   :  { %376 = vrot.lane.b32.xlu1 %v374_v50, %s6149_s3  ;;  %354 = vrot.lane.b32.xlu0 %v352_v49, %s6149_s3 }
 0x215   :  { %v377_v51 = vpop.permute.xlu1 %376  ;;  %v355_v52 = vpop.permute.xlu0 %354 }
 0x216   :  { %v379_v53 = vadd.f32 %v377_v51, %v261_v37  ;;  %v357_v54 = vadd.f32 %v355_v52, %v259_v36 }
 0x218   :  { %5840 = vtanh.f32 %v379_v53  ;;  %v549_v53 = vld [vmem:[#allocation2 + $0x8] sm:$0xf] }
 0x219   :  { %5842 = vtanh.f32 %v357_v54  ;;  %v551_v54 = vld [vmem:[#allocation2 + $0x14] sm:$0xf] }
 0x222   :  { %v5841_v55 = vpop.eup %5840 }
 0x223   :  { %v5843_v56 = vpop.eup %5842  ;;  %383 = vrot.lane.b32.xlu0 %v5841_v55, %s6150_s4 }
 0x224   :  { %361 = vrot.lane.b32.xlu1 %v5843_v56, %s6150_s4 }
 0x295   :  { %v384_v59 = vpop.permute.xlu0 %383 }
 0x296   :  { %v362_v60 = vpop.permute.xlu1 %361  ;;  %v386_v62 = vmul.f32 %v384_v59, %v381_v57 }
 0x297   :  { %v364_v0 = vmul.f32 %v362_v60, %v359_v58 }
 0x298   :  { %v388_v3 = vadd.f32 %v387_v61, %v386_v62 }
 0x299   :  { %v366_v4 = vadd.f32 %v365_v63, %v364_v0 }
 0x29a   :  { %394 = vrot.lane.b32.xlu0 %v388_v3, %s6151_s29 }
 0x29b   :  { %390 = vrot.lane.b32.xlu1 %v366_v4, %s6150_s4 }
 0x30c   :  { %v395_v5 = vpop.permute.xlu0 %394 }
 0x30d   :  { %v391_v6 = vpop.permute.xlu1 %390  ;;  %403 = vst.msk [vmem:[#allocation3 + $0x1c] sm:$0xf] %vm402_vm3, %v395_v5 }
 0x30e   :  { %400 = vst.msk [vmem:[#allocation3] sm:$0xf] %vm399_vm4, %v391_v6  ;;  %v398_v7 = vsel %vm397_vm5, %v391_v6, %v395_v5 }
 0x30f   :  { %5534 = vmatmul.mubr.msk.f32.vlgmr.msra.gmra.mrb[4].mxu0 %vm133_vm1, %v398_v7 }
 0x310   :  { %5729 = vmatpush3.bf16.msra.mxu0 %v6296_v10  ;;  %5555 = vmatprep.mubr.msk.f32.mxu0 %vm6146_vm0, %v6147_v2 }
 0x311   :  { %5730 = vmatprep.subr.bf16.mxu0 %v6145_v1 }
 0x314   :  { %5732 = vmatpush3.bf16.msra.mxu0 %v6299_v15 }
 0x315   :  { %5739 = vmatprep.subr.bf16.mxu0 %v6145_v1 }
 0x3e2   :  { %v477_v8 = vpop.f32.mrb[4].mxu0 }
 0x3e3   :  { %v478_v9 = vadd.f32 %v6325_v19, %v477_v8  ;;  %v5535_v11 = vpop.f32.mrb[5].mxu0 }
 0x3e5   :  { %489 = vrot.lane.b32.xlu1 %v478_v9, %s6148_s27  ;;  %v481_v14 = vadd.f32 %v478_v9, %v405_v12  ;;  %v510_v16 = vadd.f32 %v478_v9, %v407_v13 }
 0x3e7   :  { %v5359_v17 = vmul.f32 -1.442695, %v481_v14  ;;  %v5360_v18 = vmul.f32 -1.442695, %v510_v16 }
 0x3e9   :  { %5844 = vpow2.f32 %v5359_v17 }
 0x3ea   :  { %5846 = vpow2.f32 %v5360_v18 }
 0x3f3   :  { %v5845_v20 = vpop.eup %5844 }
 0x3f4   :  { %v5847_v21 = vpop.eup %5846  ;;  %v485_v22 = vadd.f32 1.0, %v5845_v20 }
 0x3f5   :  { %v514_v23 = vadd.f32 1.0, %v5847_v21 }
 0x3f6   :  { %5848 = vrcp.f32 %v485_v22 }
 0x3f7   :  { %5850 = vrcp.f32 %v514_v23 }
 0x400   :  { %v5849_v24 = vpop.eup %5848 }
 0x401   :  { %v5851_v25 = vpop.eup %5850  ;;  %v499_v36 = vsub.f32 1.0, %v5849_v24 }
 0x402   :  { %v524_v42 = vsub.f32 1.0, %v5851_v25 }
 0x457   :  { %v490_v26 = vpop.permute.xlu1 %489 }
 0x458   :  { %v492_v27 = vmul.f32 %v5849_v24, %v490_v26  ;;  %v517_v28 = vmul.f32 %v5851_v25, %v490_v26 }
 0x45a   :  { %519 = vrot.lane.b32.xlu1 %v517_v28, %s6149_s3  ;;  %494 = vrot.lane.b32.xlu0 %v492_v27, %s6149_s3 }
 0x45e   :  { %505 = vrot.lane.b32.xlu1 %v398_v7, %s6152_s30 }
 0x462   :  { %530 = vrot.lane.b32.xlu1 %v398_v7, %s6153_s14 }
 0x4cc   :  { %v495_v29 = vpop.permute.xlu0 %494  ;;  %v520_v30 = vpop.permute.xlu1 %519 }
 0x4cd   :  { %v497_v31 = vadd.f32 %v495_v29, %v405_v12  ;;  %v522_v32 = vadd.f32 %v520_v30, %v407_v13 }
 0x4cf   :  { %5852 = vtanh.f32 %v497_v31 }
 0x4d0   :  { %5854 = vtanh.f32 %v522_v32  ;;  %v506_v35 = vpop.permute.xlu1 %505 }
 0x4d1   :  { %v508_v38 = vmul.f32 %v5849_v24, %v506_v35 }
 0x4d4   :  { %v531_v40 = vpop.permute.xlu1 %530 }
 0x4d5   :  { %v533_v44 = vmul.f32 %v5851_v25, %v531_v40 }
 0x4d9   :  { %v5853_v33 = vpop.eup %5852 }
 0x4da   :  { %501 = vrot.lane.b32.xlu0 %v5853_v33, %s6150_s4  ;;  %v5855_v34 = vpop.eup %5854  ;;  %v693_v33 = vld [vmem:[#allocation2 + $0xc] sm:$0xf] }
 0x4de   :  { %526 = vrot.lane.b32.xlu0 %v5855_v34, %s6150_s4  ;;  %v695_v34 = vld [vmem:[#allocation2 + $0x10] sm:$0xf] }
 0x54c   :  { %v502_v37 = vpop.permute.xlu0 %501 }
 0x54d   :  { %v504_v39 = vmul.f32 %v502_v37, %v499_v36 }
 0x54f   :  { %v509_v41 = vadd.f32 %v508_v38, %v504_v39 }
 0x550   :  { %v527_v43 = vpop.permute.xlu0 %526 }
 0x551   :  { %v529_v45 = vmul.f32 %v527_v43, %v524_v42  ;;  %536 = vrot.lane.b32.xlu0 %v509_v41, %s6150_s4 }
 0x553   :  { %v534_v46 = vadd.f32 %v533_v44, %v529_v45 }
 0x555   :  { %540 = vrot.lane.b32.xlu1 %v534_v46, %s6151_s29 }
 0x5c3   :  { %v537_v47 = vpop.permute.xlu0 %536 }
 0x5c4   :  { %545 = vst.msk [vmem:[#allocation3 + $0x4] sm:$0xf] %vm399_vm4, %v537_v47 }
 0x5c7   :  { %v541_v48 = vpop.permute.xlu1 %540 }
 0x5c8   :  { %v543_v49 = vsel %vm397_vm5, %v537_v47, %v541_v48  ;;  %547 = vst.msk [vmem:[#allocation3 + $0x18] sm:$0xf] %vm402_vm3, %v541_v48 }
 0x5c9   :  { %5545 = vmatmul.mubr.msk.f32.vlgmr.msra.gmra.mrb[2].mxu1 %vm133_vm1, %v543_v49 }
 0x5ca   :  { %5735 = vmatpush3.bf16.msra.mxu1 %v6296_v10  ;;  %5566 = vmatprep.mubr.msk.f32.mxu1 %vm6146_vm0, %v6147_v2 }
 0x5cb   :  { %5736 = vmatprep.subr.bf16.mxu1 %v6145_v1 }
 0x5ce   :  { %5738 = vmatpush3.bf16.msra.mxu1 %v6299_v15 }
 0x5cf   :  { %5745 = vmatprep.subr.bf16.mxu1 %v6145_v1 }
 0x69c   :  { %v621_v50 = vpop.f32.mrb[2].mxu1 }
 0x69d   :  { %v622_v51 = vadd.f32 %v6325_v19, %v621_v50  ;;  %v5546_v52 = vpop.f32.mrb[3].mxu1 }
 0x69f   :  { %633 = vrot.lane.b32.xlu0 %v622_v51, %s6148_s27  ;;  %v625_v55 = vadd.f32 %v622_v51, %v549_v53  ;;  %v654_v56 = vadd.f32 %v622_v51, %v551_v54 }
 0x6a1   :  { %v5362_v57 = vmul.f32 -1.442695, %v625_v55  ;;  %v5363_v58 = vmul.f32 -1.442695, %v654_v56 }
 0x6a3   :  { %5856 = vpow2.f32 %v5362_v57 }
 0x6a4   :  { %5858 = vpow2.f32 %v5363_v58 }
 0x6ad   :  { %v5857_v59 = vpop.eup %5856 }
 0x6ae   :  { %v5859_v60 = vpop.eup %5858  ;;  %v629_v61 = vadd.f32 1.0, %v5857_v59 }
 0x6af   :  { %v658_v62 = vadd.f32 1.0, %v5859_v60 }
 0x6b0   :  { %5860 = vrcp.f32 %v629_v61 }
 0x6b1   :  { %5862 = vrcp.f32 %v658_v62 }
 0x6ba   :  { %v5861_v63 = vpop.eup %5860 }
 0x6bb   :  { %v5863_v0 = vpop.eup %5862  ;;  %v643_v14 = vsub.f32 1.0, %v5861_v63 }
 0x6bc   :  { %v668_v22 = vsub.f32 1.0, %v5863_v0 }
 0x711   :  { %v634_v3 = vpop.permute.xlu0 %633 }
 0x712   :  { %v636_v4 = vmul.f32 %v5861_v63, %v634_v3  ;;  %v661_v5 = vmul.f32 %v5863_v0, %v634_v3 }
 0x714   :  { %663 = vrot.lane.b32.xlu0 %v661_v5, %s6149_s3  ;;  %638 = vrot.lane.b32.xlu1 %v636_v4, %s6149_s3 }
 0x718   :  { %649 = vrot.lane.b32.xlu0 %v543_v49, %s6152_s30 }
 0x71c   :  { %674 = vrot.lane.b32.xlu0 %v543_v49, %s6153_s14 }
 0x786   :  { %v639_v6 = vpop.permute.xlu1 %638  ;;  %v664_v7 = vpop.permute.xlu0 %663 }
 0x787   :  { %v641_v8 = vadd.f32 %v639_v6, %v549_v53  ;;  %v666_v9 = vadd.f32 %v664_v7, %v551_v54 }
 0x789   :  { %5864 = vtanh.f32 %v641_v8 }
 0x78a   :  { %5866 = vtanh.f32 %v666_v9  ;;  %v650_v13 = vpop.permute.xlu0 %649 }
 0x78b   :  { %v652_v17 = vmul.f32 %v5861_v63, %v650_v13 }
 0x78e   :  { %v675_v20 = vpop.permute.xlu0 %674 }
 0x78f   :  { %v677_v24 = vmul.f32 %v5863_v0, %v675_v20 }
 0x793   :  { %v5865_v11 = vpop.eup %5864 }
 0x794   :  { %645 = vrot.lane.b32.xlu1 %v5865_v11, %s6150_s4  ;;  %v5867_v12 = vpop.eup %5866  ;;  %v836_v11 = vld [vmem:[#allocation2 + $0x10] sm:$0xf] }
 0x798   :  { %670 = vrot.lane.b32.xlu1 %v5867_v12, %s6150_s4  ;;  %v837_v12 = vld [vmem:[#allocation2 + $0xc] sm:$0xf] }
 0x806   :  { %v646_v16 = vpop.permute.xlu1 %645 }
 0x807   :  { %v648_v18 = vmul.f32 %v646_v16, %v643_v14 }
 0x809   :  { %v653_v21 = vadd.f32 %v652_v17, %v648_v18 }
 0x80a   :  { %v671_v23 = vpop.permute.xlu1 %670 }
 0x80b   :  { %v673_v25 = vmul.f32 %v671_v23, %v668_v22  ;;  %680 = vrot.lane.b32.xlu1 %v653_v21, %s6150_s4 }
 0x80d   :  { %v678_v26 = vadd.f32 %v677_v24, %v673_v25 }
 0x80f   :  { %684 = vrot.lane.b32.xlu0 %v678_v26, %s6151_s29 }
 0x87d   :  { %v681_v27 = vpop.permute.xlu1 %680 }
 0x87e   :  { %689 = vst.msk [vmem:[#allocation3 + $0x8] sm:$0xf] %vm399_vm4, %v681_v27 }
 0x881   :  { %v685_v28 = vpop.permute.xlu0 %684 }
 0x882   :  { %v687_v29 = vsel %vm397_vm5, %v681_v27, %v685_v28  ;;  %691 = vst.msk [vmem:[#allocation3 + $0x14] sm:$0xf] %vm402_vm3, %v685_v28 }
 0x883   :  { %5556 = vmatmul.mubr.msk.f32.vlgmr.msra.gmra.mrb[6].mxu0 %vm133_vm1, %v687_v29 }
 0x884   :  { %5741 = vmatpush3.bf16.msra.mxu0 %v6296_v10  ;;  %5577 = vmatprep.mubr.msk.f32.mxu0 %vm6146_vm0, %v6147_v2 }
 0x885   :  { %5742 = vmatprep.subr.bf16.mxu0 %v6145_v1 }
 0x888   :  { %5744 = vmatpush3.bf16.msra.mxu0 %v6299_v15 }
 0x889   :  { %5751 = vmatprep.subr.bf16.mxu0 %v6145_v1 }
 0x956   :  { %v765_v30 = vpop.f32.mrb[6].mxu0 }
 0x957   :  { %v766_v31 = vadd.f32 %v6325_v19, %v765_v30  ;;  %v5557_v32 = vpop.f32.mrb[7].mxu0 }
 0x959   :  { %777 = vrot.lane.b32.xlu1 %v766_v31, %s6148_s27  ;;  %v769_v35 = vadd.f32 %v766_v31, %v693_v33  ;;  %v798_v36 = vadd.f32 %v766_v31, %v695_v34 }
 0x95b   :  { %v5365_v37 = vmul.f32 -1.442695, %v769_v35  ;;  %v5366_v38 = vmul.f32 -1.442695, %v798_v36 }
 0x95d   :  { %5868 = vpow2.f32 %v5365_v37 }
 0x95e   :  { %5870 = vpow2.f32 %v5366_v38 }
 0x967   :  { %v5869_v39 = vpop.eup %5868 }
 0x968   :  { %v5871_v40 = vpop.eup %5870  ;;  %v773_v41 = vadd.f32 1.0, %v5869_v39 }
 0x969   :  { %v802_v42 = vadd.f32 1.0, %v5871_v40 }
 0x96a   :  { %5872 = vrcp.f32 %v773_v41 }
 0x96b   :  { %5874 = vrcp.f32 %v802_v42 }
 0x974   :  { %v5873_v43 = vpop.eup %5872 }
 0x975   :  { %v5875_v44 = vpop.eup %5874  ;;  %v787_v55 = vsub.f32 1.0, %v5873_v43 }
 0x976   :  { %v812_v61 = vsub.f32 1.0, %v5875_v44 }
 0x9cb   :  { %v778_v45 = vpop.permute.xlu1 %777 }
 0x9cc   :  { %v780_v46 = vmul.f32 %v5873_v43, %v778_v45  ;;  %v805_v47 = vmul.f32 %v5875_v44, %v778_v45 }
 0x9ce   :  { %807 = vrot.lane.b32.xlu1 %v805_v47, %s6149_s3  ;;  %782 = vrot.lane.b32.xlu0 %v780_v46, %s6149_s3 }
 0x9d2   :  { %793 = vrot.lane.b32.xlu1 %v687_v29, %s6152_s30 }
 0x9d6   :  { %818 = vrot.lane.b32.xlu1 %v687_v29, %s6153_s14 }
 0xa40   :  { %v783_v48 = vpop.permute.xlu0 %782  ;;  %v808_v49 = vpop.permute.xlu1 %807 }
 0xa41   :  { %v785_v50 = vadd.f32 %v783_v48, %v693_v33  ;;  %v810_v51 = vadd.f32 %v808_v49, %v695_v34 }
 0xa43   :  { %5876 = vtanh.f32 %v785_v50 }
 0xa44   :  { %5878 = vtanh.f32 %v810_v51  ;;  %v794_v54 = vpop.permute.xlu1 %793 }
 0xa45   :  { %v796_v57 = vmul.f32 %v5873_v43, %v794_v54 }
 0xa48   :  { %v819_v59 = vpop.permute.xlu1 %818 }
 0xa49   :  { %v821_v63 = vmul.f32 %v5875_v44, %v819_v59 }
 0xa4d   :  { %v5877_v52 = vpop.eup %5876 }
 0xa4e   :  { %789 = vrot.lane.b32.xlu0 %v5877_v52, %s6150_s4  ;;  %v5879_v53 = vpop.eup %5878  ;;  %v976_v52 = vld [vmem:[#allocation2 + $0x14] sm:$0xf] }
 0xa52   :  { %814 = vrot.lane.b32.xlu0 %v5879_v53, %s6150_s4  ;;  %v977_v53 = vld [vmem:[#allocation2 + $0x8] sm:$0xf] }
 0xac0   :  { %v790_v56 = vpop.permute.xlu0 %789 }
 0xac1   :  { %v792_v58 = vmul.f32 %v790_v56, %v787_v55 }
 0xac3   :  { %v797_v60 = vadd.f32 %v796_v57, %v792_v58 }
 0xac4   :  { %v815_v62 = vpop.permute.xlu0 %814 }
 0xac5   :  { %v817_v0 = vmul.f32 %v815_v62, %v812_v61  ;;  %824 = vrot.lane.b32.xlu0 %v797_v60, %s6150_s4 }
 0xac7   :  { %v822_v3 = vadd.f32 %v821_v63, %v817_v0 }
 0xac9   :  { %828 = vrot.lane.b32.xlu1 %v822_v3, %s6151_s29 }
 0xb37   :  { %v825_v4 = vpop.permute.xlu0 %824 }
 0xb38   :  { %833 = vst.msk [vmem:[#allocation3 + $0xc] sm:$0xf] %vm399_vm4, %v825_v4 }
 0xb3b   :  { %v829_v5 = vpop.permute.xlu1 %828 }
 0xb3c   :  { %v831_v6 = vsel %vm397_vm5, %v825_v4, %v829_v5  ;;  %835 = vst.msk [vmem:[#allocation3 + $0x10] sm:$0xf] %vm402_vm3, %v829_v5 }
 0xb3d   :  { %5567 = vmatmul.mubr.msk.f32.vlgmr.msra.gmra.mrb[4].mxu1 %vm133_vm1, %v831_v6 }
 0xb3e   :  { %5747 = vmatpush3.bf16.msra.mxu1 %v6296_v10  ;;  %5588 = vmatprep.mubr.msk.f32.mxu1 %vm6146_vm0, %v6147_v2 }
 0xb3f   :  { %5748 = vmatprep.subr.bf16.mxu1 %v6145_v1 }
 0xb42   :  { %5750 = vmatpush3.bf16.msra.mxu1 %v6299_v15 }
 0xc10   :  { %v907_v7 = vpop.f32.mrb[4].mxu1 }
 0xc11   :  { %v908_v8 = vadd.f32 %v6325_v19, %v907_v7  ;;  %v5568_v9 = vpop.f32.mrb[5].mxu1 }
 0xc13   :  { %919 = vrot.lane.b32.xlu0 %v908_v8, %s6148_s27  ;;  %v911_v13 = vadd.f32 %v908_v8, %v836_v11  ;;  %v940_v14 = vadd.f32 %v908_v8, %v837_v12 }
 0xc15   :  { %v5368_v16 = vmul.f32 -1.442695, %v911_v13  ;;  %v5369_v17 = vmul.f32 -1.442695, %v940_v14 }
 0xc17   :  { %5880 = vpow2.f32 %v5368_v16 }
 0xc18   :  { %5882 = vpow2.f32 %v5369_v17 }
 0xc21   :  { %v5881_v18 = vpop.eup %5880 }
 0xc22   :  { %v5883_v20 = vpop.eup %5882  ;;  %v915_v21 = vadd.f32 1.0, %v5881_v18 }
 0xc23   :  { %v944_v22 = vadd.f32 1.0, %v5883_v20 }
 0xc24   :  { %5884 = vrcp.f32 %v915_v21 }
 0xc25   :  { %5886 = vrcp.f32 %v944_v22 }
 0xc2e   :  { %v5885_v23 = vpop.eup %5884 }
 0xc2f   :  { %v5887_v24 = vpop.eup %5886  ;;  %v929_v35 = vsub.f32 1.0, %v5885_v23 }
 0xc30   :  { %v954_v41 = vsub.f32 1.0, %v5887_v24 }
 0xc85   :  { %v920_v25 = vpop.permute.xlu0 %919 }
 0xc86   :  { %v922_v26 = vmul.f32 %v5885_v23, %v920_v25  ;;  %v947_v27 = vmul.f32 %v5887_v24, %v920_v25 }
 0xc88   :  { %949 = vrot.lane.b32.xlu0 %v947_v27, %s6149_s3  ;;  %924 = vrot.lane.b32.xlu1 %v922_v26, %s6149_s3 }
 0xc8c   :  { %935 = vrot.lane.b32.xlu0 %v831_v6, %s6152_s30 }
 0xc90   :  { %960 = vrot.lane.b32.xlu0 %v831_v6, %s6153_s14 }
 0xcfa   :  { %v925_v28 = vpop.permute.xlu1 %924  ;;  %v950_v29 = vpop.permute.xlu0 %949 }
 0xcfb   :  { %v927_v30 = vadd.f32 %v925_v28, %v836_v11  ;;  %v952_v31 = vadd.f32 %v950_v29, %v837_v12 }
 0xcfd   :  { %5888 = vtanh.f32 %v927_v30  ;;  %v1116_v30 = vld [vmem:[#allocation2 + $0x18] sm:$0xf] }
 0xcfe   :  { %5890 = vtanh.f32 %v952_v31  ;;  %v936_v34 = vpop.permute.xlu0 %935  ;;  %v1117_v31 = vld [vmem:[#allocation2 + $0x4] sm:$0xf] }
 0xcff   :  { %v938_v37 = vmul.f32 %v5885_v23, %v936_v34 }
 0xd02   :  { %v961_v39 = vpop.permute.xlu0 %960 }
 0xd03   :  { %v963_v43 = vmul.f32 %v5887_v24, %v961_v39 }
 0xd07   :  { %v5889_v32 = vpop.eup %5888 }
 0xd08   :  { %931 = vrot.lane.b32.xlu1 %v5889_v32, %s6150_s4  ;;  %v5891_v33 = vpop.eup %5890 }
 0xd0c   :  { %956 = vrot.lane.b32.xlu1 %v5891_v33, %s6150_s4 }
 0xd7a   :  { %v932_v36 = vpop.permute.xlu1 %931 }
 0xd7b   :  { %v934_v38 = vmul.f32 %v932_v36, %v929_v35 }
 0xd7d   :  { %v939_v40 = vadd.f32 %v938_v37, %v934_v38 }
 0xd7e   :  { %v957_v42 = vpop.permute.xlu1 %956 }
 0xd7f   :  { %v959_v44 = vmul.f32 %v957_v42, %v954_v41  ;;  %966 = vrot.lane.b32.xlu1 %v939_v40, %s6150_s4 }
 0xd81   :  { %v964_v45 = vadd.f32 %v963_v43, %v959_v44 }
 0xd83   :  { %970 = vrot.lane.b32.xlu0 %v964_v45, %s6151_s29 }
 0xdf1   :  { %v967_v46 = vpop.permute.xlu1 %966 }
 0xdf2   :  { %974 = vst.msk [vmem:[#allocation3 + $0x10] sm:$0xf] %vm399_vm4, %v967_v46 }
 0xdf5   :  { %v971_v47 = vpop.permute.xlu0 %970 }
 0xdf6   :  { %v973_v48 = vsel %vm397_vm5, %v967_v46, %v971_v47  ;;  %975 = vst.msk [vmem:[#allocation3 + $0xc] sm:$0xf] %vm402_vm3, %v971_v47 }
 0xdf7   :  { %5578 = vmatmul.mubr.msk.f32.vlgmr.msra.gmra.mrb[8].mxu0 %vm133_vm1, %v973_v48 }
 0xdf8   :  { %5753 = vmatpush3.bf16.msra.mxu0 %v6296_v10  ;;  %5599 = vmatprep.mubr.msk.f32.mxu0 %vm6146_vm0, %v6147_v2 }
 0xdf9   :  { %5754 = vmatprep.subr.bf16.mxu0 %v6145_v1 }
 0xdfc   :  { %5756 = vmatpush3.bf16.msra.mxu0 %v6299_v15 }
 0xdfd   :  { %5765 = vmatprep.subr.bf16.mxu0 %v6145_v1 }
 0xeca   :  { %v1047_v49 = vpop.f32.mrb[8].mxu0 }
 0xecb   :  { %v1048_v50 = vadd.f32 %v6325_v19, %v1047_v49  ;;  %v5579_v51 = vpop.f32.mrb[9].mxu0 }
 0xecd   :  { %1059 = vrot.lane.b32.xlu1 %v1048_v50, %s6148_s27  ;;  %v1051_v54 = vadd.f32 %v1048_v50, %v976_v52  ;;  %v1080_v55 = vadd.f32 %v1048_v50, %v977_v53 }
 0xecf   :  { %v5371_v10 = vmul.f32 -1.442695, %v1051_v54  ;;  %v5372_v56 = vmul.f32 -1.442695, %v1080_v55 }
 0xed1   :  { %5892 = vpow2.f32 %v5371_v10 }
 0xed2   :  { %5894 = vpow2.f32 %v5372_v56 }
 0xedb   :  { %v5893_v57 = vpop.eup %5892 }
 0xedc   :  { %v5895_v58 = vpop.eup %5894  ;;  %v1055_v59 = vadd.f32 1.0, %v5893_v57 }
 0xedd   :  { %v1084_v15 = vadd.f32 1.0, %v5895_v58 }
 0xede   :  { %5896 = vrcp.f32 %v1055_v59 }
 0xedf   :  { %5898 = vrcp.f32 %v1084_v15 }
 0xee8   :  { %v5897_v60 = vpop.eup %5896 }
 0xee9   :  { %v5899_v61 = vpop.eup %5898  ;;  %v1069_v11 = vsub.f32 1.0, %v5897_v60 }
 0xeea   :  { %v1094_v18 = vsub.f32 1.0, %v5899_v61 }
 0xf3f   :  { %v1060_v62 = vpop.permute.xlu1 %1059 }
 0xf40   :  { %v1062_v63 = vmul.f32 %v5897_v60, %v1060_v62  ;;  %v1087_v0 = vmul.f32 %v5899_v61, %v1060_v62 }
 0xf42   :  { %1089 = vrot.lane.b32.xlu1 %v1087_v0, %s6149_s3  ;;  %1064 = vrot.lane.b32.xlu0 %v1062_v63, %s6149_s3 }
 0xf46   :  { %1075 = vrot.lane.b32.xlu1 %v973_v48, %s6152_s30 }
 0xf4a   :  { %1100 = vrot.lane.b32.xlu1 %v973_v48, %s6153_s14 }
 0xfb4   :  { %v1065_v3 = vpop.permute.xlu0 %1064  ;;  %v1090_v4 = vpop.permute.xlu1 %1089 }
 0xfb5   :  { %v1067_v5 = vadd.f32 %v1065_v3, %v976_v52  ;;  %v1092_v6 = vadd.f32 %v1090_v4, %v977_v53 }
 0xfb7   :  { %5900 = vtanh.f32 %v1067_v5  ;;  %v1256_v5 = vld [vmem:[#allocation2 + $0x1c] sm:$0xf] }
 0xfb8   :  { %5902 = vtanh.f32 %v1092_v6  ;;  %v1076_v9 = vpop.permute.xlu1 %1075  ;;  %v1257_v6 = vld [vmem:[#allocation2] sm:$0xf] }
 0xfb9   :  { %v1078_v13 = vmul.f32 %v5897_v60, %v1076_v9 }
 0xfbc   :  { %v1101_v16 = vpop.permute.xlu1 %1100 }
 0xfbd   :  { %v1103_v21 = vmul.f32 %v5899_v61, %v1101_v16 }
 0xfc1   :  { %v5901_v7 = vpop.eup %5900 }
 0xfc2   :  { %1071 = vrot.lane.b32.xlu0 %v5901_v7, %s6150_s4  ;;  %v5903_v8 = vpop.eup %5902 }
 0xfc6   :  { %1096 = vrot.lane.b32.xlu0 %v5903_v8, %s6150_s4 }
0x1034   :  { %v1072_v12 = vpop.permute.xlu0 %1071 }
0x1035   :  { %v1074_v14 = vmul.f32 %v1072_v12, %v1069_v11 }
0x1037   :  { %v1079_v17 = vadd.f32 %v1078_v13, %v1074_v14 }
0x1038   :  { %v1097_v20 = vpop.permute.xlu0 %1096 }
0x1039   :  { %v1099_v22 = vmul.f32 %v1097_v20, %v1094_v18  ;;  %1106 = vrot.lane.b32.xlu0 %v1079_v17, %s6150_s4 }
0x103b   :  { %v1104_v23 = vadd.f32 %v1103_v21, %v1099_v22 }
0x103d   :  { %1110 = vrot.lane.b32.xlu1 %v1104_v23, %s6151_s29 }
0x10ab   :  { %v1107_v24 = vpop.permute.xlu0 %1106 }
0x10ac   :  { %1114 = vst.msk [vmem:[#allocation3 + $0x14] sm:$0xf] %vm399_vm4, %v1107_v24 }
0x10af   :  { %v1111_v25 = vpop.permute.xlu1 %1110 }
0x10b0   :  { %v1113_v26 = vsel %vm397_vm5, %v1107_v24, %v1111_v25  ;;  %1115 = vst.msk [vmem:[#allocation3 + $0x8] sm:$0xf] %vm402_vm3, %v1111_v25 }
0x10b1   :  { %5589 = vmatmul.mubr.msk.f32.vlgmr.msra.gmra.mrb[6].mxu1 %vm133_vm1, %v1113_v26 }
0x1184   :  { %v1187_v27 = vpop.f32.mrb[6].mxu1 }
0x1185   :  { %v1188_v28 = vadd.f32 %v6325_v19, %v1187_v27  ;;  %v5590_v29 = vpop.f32.mrb[7].mxu1 }
0x1187   :  { %1199 = vrot.lane.b32.xlu0 %v1188_v28, %s6148_s27  ;;  %v1191_v32 = vadd.f32 %v1188_v28, %v1116_v30  ;;  %v1220_v33 = vadd.f32 %v1188_v28, %v1117_v31 }
0x1189   :  { %v5374_v34 = vmul.f32 -1.442695, %v1191_v32  ;;  %v5375_v35 = vmul.f32 -1.442695, %v1220_v33  ;;  %v1404_v32 = vld [vmem:[#allocation11 + $0x8] sm:$0xff] }
0x118b   :  { %5904 = vpow2.f32 %v5374_v34 }
0x118c   :  { %5906 = vpow2.f32 %v5375_v35 }
0x1195   :  { %v5905_v36 = vpop.eup %5904 }
0x1196   :  { %v5907_v37 = vpop.eup %5906  ;;  %v1195_v38 = vadd.f32 1.0, %v5905_v36 }
0x1197   :  { %v1224_v39 = vadd.f32 1.0, %v5907_v37 }
0x1198   :  { %5908 = vrcp.f32 %v1195_v38 }
0x1199   :  { %5910 = vrcp.f32 %v1224_v39 }
0x11a2   :  { %v5909_v40 = vpop.eup %5908 }
0x11a3   :  { %v5911_v41 = vpop.eup %5910  ;;  %v1209_v52 = vsub.f32 1.0, %v5909_v40 }
0x11a4   :  { %v1234_v57 = vsub.f32 1.0, %v5911_v41 }
0x11f9   :  { %v1200_v42 = vpop.permute.xlu0 %1199 }
0x11fa   :  { %v1202_v43 = vmul.f32 %v5909_v40, %v1200_v42  ;;  %v1227_v44 = vmul.f32 %v5911_v41, %v1200_v42 }
0x11fc   :  { %1229 = vrot.lane.b32.xlu0 %v1227_v44, %s6149_s3  ;;  %1204 = vrot.lane.b32.xlu1 %v1202_v43, %s6149_s3 }
0x1200   :  { %1215 = vrot.lane.b32.xlu0 %v1113_v26, %s6152_s30 }
0x1204   :  { %1240 = vrot.lane.b32.xlu0 %v1113_v26, %s6153_s14 }
0x126e   :  { %v1205_v45 = vpop.permute.xlu1 %1204  ;;  %v1230_v46 = vpop.permute.xlu0 %1229 }
0x126f   :  { %v1207_v47 = vadd.f32 %v1205_v45, %v1116_v30  ;;  %v1232_v48 = vadd.f32 %v1230_v46, %v1117_v31  ;;  %v1403_v31 = vld [vmem:[#allocation11] sm:$0xff]  ;;  %v1397_v46 = vld [vmem:[#allocation3 + $0x8] sm:$0x3] }
0x1270   :  { %v5757_v35 = vpack.c.bf16 %v1404_v32, %v1403_v31 }
0x1271   :  { %5912 = vtanh.f32 %v1207_v47  ;;  %v1399_v47 = vld [vmem:[#allocation3 + $0x10] sm:$0x3] }
0x1272   :  { %5914 = vtanh.f32 %v1232_v48  ;;  %v1216_v51 = vpop.permute.xlu0 %1215  ;;  %5758 = vmatprep.subr.bf16.mxu1 %v5757_v35 }
0x1273   :  { %v1218_v54 = vmul.f32 %v5909_v40, %v1216_v51  ;;  %5760 = vmatpush3.bf16.msra.mxu1 %v5757_v35  ;;  %v1405_v40 = vld [vmem:[#allocation11 + $0x10] sm:$0xff]  ;;  %v1400_v51 = vld [vmem:[#allocation3 + $0x14] sm:$0x3] }
0x1276   :  { %v1241_v10 = vpop.permute.xlu0 %1240 }
0x1277   :  { %v1243_v59 = vmul.f32 %v5911_v41, %v1241_v10  ;;  %v1406_v41 = vld [vmem:[#allocation11 + $0x18] sm:$0xff] }
0x1278   :  { %v5761_v44 = vpack.c.bf16 %v1406_v41, %v1405_v40 }
0x127a   :  { %5762 = vmatprep.subr.bf16.mxu1 %v5761_v44 }
0x127b   :  { %v5913_v49 = vpop.eup %5912  ;;  %5764 = vmatpush3.bf16.msra.mxu1 %v5761_v44 }
0x127c   :  { %1211 = vrot.lane.b32.xlu1 %v5913_v49, %s6150_s4  ;;  %v5915_v50 = vpop.eup %5914  ;;  %5771 = vmatprep.subr.bf16.mxu1 %v6145_v1 }
0x1280   :  { %1236 = vrot.lane.b32.xlu1 %v5915_v50, %s6150_s4  ;;  %v1398_v50 = vld [vmem:[#allocation3 + $0xc] sm:$0x3] }
0x12ee   :  { %v1212_v53 = vpop.permute.xlu1 %1211 }
0x12ef   :  { %v1214_v55 = vmul.f32 %v1212_v53, %v1209_v52  ;;  %v6154_v53 = vmov 1983009808  }
0x12f1   :  { %v1219_v56 = vadd.f32 %v1218_v54, %v1214_v55  ;;  %v1427_v54 = vunpack.c.l.s4 %v6154_v53  ;;  %v1429_v55 = vlaneseq }
0x12f2   :  { %v1237_v58 = vpop.permute.xlu1 %1236 }
0x12f3   :  { %v1239_v15 = vmul.f32 %v1237_v58, %v1234_v57  ;;  %1246 = vrot.lane.b32.xlu1 %v1219_v56, %s6150_s4  ;;  %v1410_v56 = vld [vmem:[#allocation3 + $0xa] sm:$0x3]  ;;  %v1428_v57 = vunpack.c.0.s8 %v1427_v54  ;;  %v6478_v58 = vshrl.u32 %v1429_v55, 7 }
0x12f5   :  { %v1244_v60 = vadd.f32 %v1243_v59, %v1239_v15  ;;  %v1411_v15 = vld [vmem:[#allocation3 + $0xe] sm:$0x3] }
0x12f7   :  { %1250 = vrot.lane.b32.xlu0 %v1244_v60, %s6151_s29  ;;  %v1425_v60 = vcombine.low %v1410_v56, %v1411_v15 }
0x1365   :  { %v1247_v61 = vpop.permute.xlu1 %1246 }
0x1366   :  { %1254 = vst.msk [vmem:[#allocation3 + $0x18] sm:$0xf] %vm399_vm4, %v1247_v61 }
0x1369   :  { %v1251_v62 = vpop.permute.xlu0 %1250 }
0x136a   :  { %v1253_v63 = vsel %vm397_vm5, %v1247_v61, %v1251_v62  ;;  %1255 = vst.msk [vmem:[#allocation3 + $0x4] sm:$0xf] %vm402_vm3, %v1251_v62  ;;  %v1413_v61 = vld [vmem:[#allocation3 + $0x16] sm:$0x3] }
0x136b   :  { %5600 = vmatmul.mubr.msk.f32.vlgmr.msra.gmra.mrb[10].mxu0 %vm133_vm1, %v1253_v63 }
0x136c   :  { %5621 = vmatprep.mubr.msk.f32.mxu0 %vm6146_vm0, %v6147_v2 }
0x136d   :  { %v1401_v49 = vld [vmem:[#allocation3 + $0x18] sm:$0x3]  ;;  %v1414_v62 = vld [vmem:[#allocation3 + $0x1a] sm:$0x3] }
0x1371   :  { %v1396_v48 = vld [vmem:[#allocation3 + $0x4] sm:$0x3]  ;;  %v1409_v59 = vld [vmem:[#allocation3 + $0x6] sm:$0x3] }
0x143e   :  { %v1327_v0 = vpop.f32.mrb[10].mxu0 }
0x143f   :  { %v1328_v3 = vadd.f32 %v6325_v19, %v1327_v0  ;;  %v5601_v4 = vpop.f32.mrb[11].mxu0 }
0x1441   :  { %1339 = vrot.lane.b32.xlu1 %v1328_v3, %s6148_s27  ;;  %v1331_v7 = vadd.f32 %v1328_v3, %v1256_v5  ;;  %v1360_v8 = vadd.f32 %v1328_v3, %v1257_v6 }
0x1443   :  { %v5377_v9 = vmul.f32 -1.442695, %v1331_v7  ;;  %v5378_v11 = vmul.f32 -1.442695, %v1360_v8  ;;  %v3872_v8 = vcombine.low %v1409_v59, %v1411_v15 }
0x1445   :  { %5916 = vpow2.f32 %v5377_v9  ;;  %v1412_v9 = vld [vmem:[#allocation3 + $0x12] sm:$0x3] }
0x1446   :  { %5918 = vpow2.f32 %v5378_v11  ;;  %v1441_v11 = vcombine.low %v1412_v9, %v1413_v61 }
0x144f   :  { %v5917_v12 = vpop.eup %5916 }
0x1450   :  { %v5919_v13 = vpop.eup %5918  ;;  %v1335_v14 = vadd.f32 1.0, %v5917_v12  ;;  %v3880_v12 = vcombine.low %v1412_v9, %v1414_v62 }
0x1451   :  { %v1364_v16 = vadd.f32 1.0, %v5919_v13 }
0x1452   :  { %5920 = vrcp.f32 %v1335_v14 }
0x1453   :  { %5922 = vrcp.f32 %v1364_v16 }
0x145c   :  { %v5921_v17 = vpop.eup %5920 }
0x145d   :  { %v5923_v18 = vpop.eup %5922  ;;  %v1349_v38 = vsub.f32 1.0, %v5921_v17 }
0x145e   :  { %v1374_v29 = vsub.f32 1.0, %v5923_v18 }
0x14b3   :  { %v1340_v19 = vpop.permute.xlu1 %1339 }
0x14b4   :  { %v1342_v20 = vmul.f32 %v5921_v17, %v1340_v19  ;;  %v1367_v21 = vmul.f32 %v5923_v18, %v1340_v19 }
0x14b6   :  { %1369 = vrot.lane.b32.xlu0 %v1367_v21, %s6149_s3  ;;  %1344 = vrot.lane.b32.xlu1 %v1342_v20, %s6149_s3 }
0x14ba   :  { %1380 = vrot.lane.b32.xlu1 %v1253_v63, %s6153_s14 }
0x14be   :  { %1355 = vrot.lane.b32.xlu1 %v1253_v63, %s6152_s30  ;;  %v6155_v63 = vmov 1934713408  }
0x14bf   :  { %v1597_v0 = vunpack.c.l.s4 %v6155_v63 }
0x14c1   :  { %v1598_v16 = vunpack.c.0.s8 %v1597_v0 }
0x1528   :  { %v1370_v22 = vpop.permute.xlu0 %1369  ;;  %v1345_v23 = vpop.permute.xlu1 %1344 }
0x1529   :  { %v1372_v24 = vadd.f32 %v1370_v22, %v1257_v6  ;;  %v1347_v25 = vadd.f32 %v1345_v23, %v1256_v5  ;;  %v6484_v6 = vsub.s32 %v1428_v57, %v6478_v58 }
0x152b   :  { %5924 = vtanh.f32 %v1372_v24  ;;  %v1439_v14 = vrot.slane %v1425_v60, %v6484_v6  ;;  %v3879_v22 = vrot.slane %v3872_v8, %v6484_v6  ;;  %v1449_v24 = vrot.slane %v1441_v11, %v6484_v6 }
0x152c   :  { %5926 = vtanh.f32 %v1347_v25  ;;  %v1381_v28 = vpop.permute.xlu1 %1380  ;;  %v3887_v25 = vrot.slane %v3880_v12, %v6484_v6 }
0x152d   :  { %v1383_v33 = vmul.f32 %v5923_v18, %v1381_v28 }
0x1530   :  { %v1356_v36 = vpop.permute.xlu1 %1355 }
0x1531   :  { %v1358_v42 = vmul.f32 %v5921_v17, %v1356_v36 }
0x1535   :  { %v5925_v26 = vpop.eup %5924 }
0x1536   :  { %1376 = vrot.lane.b32.xlu0 %v5925_v26, %s6150_s4  ;;  %v5927_v27 = vpop.eup %5926 }
0x153a   :  { %1351 = vrot.lane.b32.xlu0 %v5927_v27, %s6150_s4  ;;  %v6495_v27 = vsub.s32 %v1598_v16, %v6478_v58 }
0x15a8   :  { %v1377_v30 = vpop.permute.xlu0 %1376 }
0x15a9   :  { %v1379_v34 = vmul.f32 %v1377_v30, %v1374_v29 }
0x15ab   :  { %v1384_v37 = vadd.f32 %v1383_v33, %v1379_v34 }
0x15ac   :  { %v1352_v39 = vpop.permute.xlu0 %1351 }
0x15ad   :  { %v1354_v43 = vmul.f32 %v1352_v39, %v1349_v38  ;;  %1391 = vrot.lane.b32.xlu0 %v1384_v37, %s6151_s29 }
0x15af   :  { %v1359_v45 = vadd.f32 %v1358_v42, %v1354_v43 }
0x15b1   :  { %1386 = vrot.lane.b32.xlu1 %v1359_v45, %s6150_s4 }
0x15cb   :  { %1695 = vxpose.xlu0.b32.start.end [1/1] (short) (narrow) %v1397_v46, 32 }
0x15d8   :  { %1759 = vxpose.xlu0.b32.start.end [1/1] (short) (narrow) %v1399_v47, 32 }
0x15da   :  { %1663 = vxpose.xlu1.b32.start.end [1/1] (short) (narrow) %v1396_v48, 32 }
0x15e5   :  { %1823 = vxpose.xlu0.b32.start.end [1/1] (short) (narrow) %v1401_v49, 32 }
0x15e7   :  { %1727 = vxpose.xlu1.b32.start.end [1/1] (short) (narrow) %v1398_v50, 32 }
0x15f4   :  { %1791 = vxpose.xlu1.b32.start.end [1/1] (short) (narrow) %v1400_v51, 32 }
0x161f   :  { %v1392_v52 = vpop.permute.xlu0 %1391 }
0x1620   :  { %1394 = vst.msk [vmem:[#allocation3] sm:$0xf] %vm402_vm3, %v1392_v52 }
0x1623   :  { %v1387_v10 = vpop.permute.xlu1 %1386 }
0x1624   :  { %1389 = vst.msk [vmem:[#allocation3 + $0x1c] sm:$0xf] %vm399_vm4, %v1387_v10 }
0x1627   :  { %v6480_v3 = vld [vmem:[#allocation3] sm:$0x3]  ;;  %v1408_v4 = vld [vmem:[#allocation3 + $0x2] sm:$0x3] }
0x1628   :  { %1631 = vxpose.xlu0.b32.start.end [1/1] (short) (narrow) %v6480_v3, 32  ;;  %v1424_v5 = vcombine.low %v1408_v4, %v1409_v59  ;;  %v3864_v7 = vcombine.low %v1408_v4, %v1410_v56 }
0x162a   :  { %v1432_v13 = vrot.slane %v1424_v5, %v6484_v6  ;;  %v3871_v17 = vrot.slane %v3864_v7, %v6484_v6 }
0x162b   :  { %v1402_v18 = vld [vmem:[#allocation3 + $0x1c] sm:$0x3]  ;;  %v1415_v19 = vld [vmem:[#allocation3 + $0x1e] sm:$0x3] }
0x162c   :  { %1855 = vxpose.xlu1.b32.start.end [1/1] (short) (narrow) %v1402_v18, 32  ;;  %v1440_v20 = vcombine.low %v1432_v13, %v1439_v14  ;;  %v1442_v21 = vcombine.low %v1414_v62, %v1415_v19  ;;  %v3888_v23 = vcombine.low %v1413_v61, %v1415_v19  ;;  %v3896_v29 = vcombine.low %v3871_v17, %v3879_v22 }
0x162e   :  { %5610 = vmatprep.mubr.msk.f32.mxu1 %vm133_vm1, %v1440_v20  ;;  %v1456_v26 = vrot.slane %v1442_v21, %v6484_v6  ;;  %v3895_v28 = vrot.slane %v3888_v23, %v6484_v6  ;;  %v6500_v32 = vrot.slane %v3896_v29, %v6495_v27 }
0x1630   :  { %v1457_v30 = vcombine.low %v1449_v24, %v1456_v26  ;;  %v3904_v31 = vcombine.low %v3887_v25, %v3895_v28 }
0x1632   :  { %5611 = vmatmul.mubr.msk.f32.vlgmr.msra.gmra.mrb[8].mxu1 %vm133_vm1, %v1457_v30  ;;  %v6503_v33 = vrot.slane %v3904_v31, %v6495_v27 }
0x1633   :  { %5632 = vmatprep.mubr.msk.f32.mxu1 %vm6146_vm0, %v6147_v2 }
0x1634   :  { %v3912_v34 = vcombine.low %v6500_v32, %v6503_v33  ;;  %v3913_v35 = vcombine.high %v6500_v32, %v6503_v33 }
0x164b   :  { %v1711_v36 = vpop.trf.xlu0 }
0x164f   :  { %v6511_v38 = vpop.trf.xlu0 }
0x1653   :  { %v6515_v40 = vpop.trf.xlu0 }
0x1657   :  { %v6519_v42 = vpop.trf.xlu0 }
0x165a   :  { %v1679_v37 = vpop.trf.xlu1 }
0x165b   :  { %v1775_v44 = vpop.trf.xlu0 }
0x165e   :  { %v6513_v39 = vpop.trf.xlu1 }
0x165f   :  { %v6523_v46 = vpop.trf.xlu0 }
0x1662   :  { %v6517_v41 = vpop.trf.xlu1 }
0x1663   :  { %v6527_v48 = vpop.trf.xlu0 }
0x1666   :  { %v6521_v43 = vpop.trf.xlu1 }
0x1667   :  { %v6531_v50 = vpop.trf.xlu0 }
0x166a   :  { %v1743_v45 = vpop.trf.xlu1 }
0x166b   :  { %v1839_v53 = vpop.trf.xlu0  ;;  %v1903_v0 = vcombine.low %v1679_v37, %v1743_v45  ;;  %v1904_v12 = vcombine.high %v1679_v37, %v1743_v45 }
0x166c   :  { %v1919_v63 = vcombine.low %v1775_v44, %v1839_v53  ;;  %v1920_v7 = vcombine.high %v1775_v44, %v1839_v53 }
0x166d   :  { %v1911_v13 = vrot.slane %v1903_v0, %v6484_v6  ;;  %v1918_v22 = vrot.slane %v1904_v12, %v6484_v6 }
0x166e   :  { %v6525_v47 = vpop.trf.xlu1  ;;  %v1927_v11 = vrot.slane %v1919_v63, %v6484_v6  ;;  %v1934_v18 = vrot.slane %v1920_v7, %v6484_v6 }
0x166f   :  { %v6537_v55 = vpop.trf.xlu0  ;;  %v2039_v37 = vcombine.low %v6513_v39, %v6525_v47 }
0x1670   :  { %v2055_v25 = vcombine.low %v6523_v46, %v6537_v55 }
0x1672   :  { %v6529_v49 = vpop.trf.xlu1 }
0x1673   :  { %v6541_v56 = vpop.trf.xlu0 }
0x1676   :  { %v6533_v51 = vpop.trf.xlu1 }
0x1677   :  { %v6545_v59 = vpop.trf.xlu0 }
0x167a   :  { %v1807_v52 = vpop.trf.xlu1 }
0x167e   :  { %v6535_v54 = vpop.trf.xlu1 }
0x1682   :  { %v6539_v10 = vpop.trf.xlu1 }
0x1686   :  { %v6543_v57 = vpop.trf.xlu1 }
0x16a8   :  { %v1647_v15 = vpop.trf.xlu0 }
0x16a9   :  { %v1887_v61 = vcombine.low %v1647_v15, %v1711_v36  ;;  %v1888_v8 = vcombine.high %v1647_v15, %v1711_v36 }
0x16ab   :  { %v1895_v9 = vrot.slane %v1887_v61, %v6484_v6  ;;  %v1902_v19 = vrot.slane %v1888_v8, %v6484_v6 }
0x16ac   :  { %v1871_v60 = vpop.trf.xlu1  ;;  %v1648_v21 = vpop.trf.xlu0 }
0x16ad   :  { %v1935_v62 = vcombine.low %v1807_v52, %v1871_v60  ;;  %v1936_v4 = vcombine.high %v1807_v52, %v1871_v60  ;;  %v1951_v20 = vcombine.low %v1895_v9, %v1911_v13  ;;  %v1952_v29 = vcombine.high %v1895_v9, %v1911_v13 }
0x16ae   :  { %v1967_v30 = vcombine.low %v1902_v19, %v1918_v22  ;;  %v2023_v31 = vcombine.low %v1648_v21, %v6511_v38  ;;  %v2063_v60 = vrot.slane %v2055_v25, %v6484_v6  ;;  %v1968_v61 = vcombine.high %v1902_v19, %v1918_v22 }
0x16af   :  { %v1943_v5 = vrot.slane %v1935_v62, %v6484_v6  ;;  %v1950_v14 = vrot.slane %v1936_v4, %v6484_v6  ;;  %v1959_v36 = vrot.slane %v1951_v20, %v6495_v27  ;;  %v1966_v4 = vrot.slane %v1952_v29, %v6495_v27 }
0x16b0   :  { %v1872_v17 = vpop.trf.xlu1  ;;  %v2031_v63 = vrot.slane %v2023_v31, %v6484_v6  ;;  %v1975_v0 = vrot.slane %v1967_v30, %v6495_v27  ;;  %v2056_v13 = vcombine.high %v6523_v46, %v6537_v55  ;;  %v2040_v19 = vcombine.high %v6513_v39, %v6525_v47  ;;  %v1649_v39 = vpop.trf.xlu0 }
0x16b1   :  { %v1983_v16 = vcombine.low %v1927_v11, %v1943_v5  ;;  %v1999_v23 = vcombine.low %v1934_v18, %v1950_v14  ;;  %v2071_v24 = vcombine.low %v6535_v54, %v1872_v17  ;;  %v1984_v26 = vcombine.high %v1927_v11, %v1943_v5 }
0x16b2   :  { %v2000_v44 = vcombine.high %v1934_v18, %v1950_v14  ;;  %v2047_v5 = vrot.slane %v2039_v37, %v6484_v6  ;;  %v2072_v7 = vcombine.high %v6535_v54, %v1872_v17  ;;  %v2024_v14 = vcombine.high %v1648_v21, %v6511_v38 }
0x16b3   :  { %v1991_v28 = vrot.slane %v1983_v16, %v6495_v27  ;;  %v2079_v45 = vrot.slane %v2071_v24, %v6484_v6  ;;  %v2007_v15 = vrot.slane %v1999_v23, %v6495_v27  ;;  %v1998_v62 = vrot.slane %v1984_v26, %v6495_v27 }
0x16b4   :  { %v2014_v12 = vrot.slane %v2000_v44, %v6495_v27  ;;  %v2087_v16 = vcombine.low %v2031_v63, %v2047_v5  ;;  %v1982_v18 = vrot.slane %v1968_v61, %v6495_v27  ;;  %v2086_v54 = vrot.slane %v2072_v7, %v6484_v6  ;;  %v1873_v20 = vpop.trf.xlu1 }
0x16b5   :  { %v2016_v52 = vcombine.high %v1959_v36, %v1991_v28  ;;  %v2015_v53 = vcombine.low %v1959_v36, %v1991_v28  ;;  %v2119_v8 = vcombine.low %v2063_v60, %v2079_v45  ;;  %v2020_v9 = vcombine.high %v1975_v0, %v2007_v15 }
0x16b6   :  { %v2017_v11 = vcombine.low %v1966_v4, %v1998_v62  ;;  %v2120_v17 = vcombine.high %v2063_v60, %v2079_v45  ;;  %v2022_v22 = vcombine.high %v1982_v18, %v2014_v12  ;;  %v2018_v23 = vcombine.high %v1966_v4, %v1998_v62 }
0x16b7   :  { %2463 = vxpose.xlu1.b32.start.end [1/1] (short) (narrow) %v2016_v52, 8  ;;  %2431 = vxpose.xlu0.b32.start.end [1/1] (short) (narrow) %v2015_v53, 8  ;;  %v2127_v24 = vrot.slane %v2119_v8, %v6495_v27  ;;  %v2070_v46 = vrot.slane %v2056_v13, %v6484_v6  ;;  %v2038_v38 = vrot.slane %v2024_v14, %v6484_v6 }
0x16b8   :  { %v2088_v55 = vcombine.high %v2031_v63, %v2047_v5  ;;  %v2095_v21 = vrot.slane %v2087_v16, %v6495_v27  ;;  %v2054_v25 = vrot.slane %v2040_v19, %v6484_v6  ;;  %v2207_v47 = vcombine.low %v6539_v10, %v1873_v20 }
0x16b9   :  { %v2135_v26 = vcombine.low %v2070_v46, %v2086_v54  ;;  %v2019_v28 = vcombine.low %v1975_v0, %v2007_v15  ;;  %v2134_v30 = vrot.slane %v2120_v17, %v6495_v27  ;;  %v2191_v31 = vcombine.low %v6527_v48, %v6541_v56  ;;  %v1874_v17 = vpop.trf.xlu1 }
0x16ba   :  { %v2152_v29 = vcombine.high %v2095_v21, %v2127_v24  ;;  %v2103_v36 = vcombine.low %v2038_v38, %v2054_v25  ;;  %v2159_v37 = vcombine.low %v1649_v39, %v6515_v40  ;;  %v2102_v44 = vrot.slane %v2088_v55, %v6495_v27 }
0x16bb   :  { %2591 = vxpose.xlu1.b32.start.end [1/1] (short) (narrow) %v2020_v9, 8  ;;  %2495 = vxpose.xlu0.b32.start.end [1/1] (short) (narrow) %v2017_v11, 8  ;;  %v2175_v45 = vcombine.low %v6517_v41, %v6529_v49  ;;  %v2136_v52 = vcombine.high %v2070_v46, %v2086_v54  ;;  %v2215_v53 = vrot.slane %v2207_v47, %v6484_v6 }
0x16bc   :  { %v2021_v15 = vcombine.low %v1982_v18, %v2014_v12  ;;  %v2154_v60 = vcombine.high %v2102_v44, %v2134_v30  ;;  %v2143_v61 = vrot.slane %v2135_v26, %v6495_v27  ;;  %v2199_v62 = vrot.slane %v2191_v31, %v6484_v6 }
0x16bd   :  { %v2104_v63 = vcombine.high %v2038_v38, %v2054_v25  ;;  %v2167_v0 = vrot.slane %v2159_v37, %v6484_v6  ;;  %v2111_v4 = vrot.slane %v2103_v36, %v6495_v27  ;;  %v2183_v5 = vrot.slane %v2175_v45, %v6484_v6 }
0x16be   :  { %v2208_v7 = vcombine.high %v6539_v10, %v1873_v20  ;;  %v2255_v8 = vcombine.low %v2199_v62, %v2215_v53  ;;  %v2151_v11 = vcombine.low %v2095_v21, %v2127_v24  ;;  %v2150_v12 = vrot.slane %v2136_v52, %v6495_v27 }
0x16bf   :  { %2655 = vxpose.xlu1.b32.start.end [1/1] (short) (narrow) %v2022_v22, 8  ;;  %2527 = vxpose.xlu0.b32.start.end [1/1] (short) (narrow) %v2018_v23, 8  ;;  %v2156_v9 = vcombine.high %v2111_v4, %v2143_v61  ;;  %v2192_v13 = vcombine.high %v6527_v48, %v6541_v56  ;;  %v2160_v14 = vcombine.high %v1649_v39, %v6515_v40 }
0x16c0   :  { %v2223_v16 = vcombine.low %v2167_v0, %v2183_v5  ;;  %v2118_v18 = vrot.slane %v2104_v63, %v6495_v27  ;;  %v2176_v19 = vcombine.high %v6517_v41, %v6529_v49  ;;  %v2222_v10 = vrot.slane %v2208_v7, %v6484_v6  ;;  %v1650_v41 = vpop.trf.xlu0 }
0x16c1   :  { %v2256_v54 = vcombine.high %v2199_v62, %v2215_v53  ;;  %v2153_v22 = vcombine.low %v2102_v44, %v2134_v30  ;;  %v2263_v23 = vrot.slane %v2255_v8, %v6495_v27  ;;  %v2206_v48 = vrot.slane %v2192_v13, %v6484_v6 }
0x16c2   :  { %v2158_v20 = vcombine.high %v2118_v18, %v2150_v12  ;;  %v2174_v40 = vrot.slane %v2160_v14, %v6484_v6  ;;  %v2224_v56 = vcombine.high %v2167_v0, %v2183_v5  ;;  %v2231_v24 = vrot.slane %v2223_v16, %v6495_v27 }
0x16c3   :  { %2559 = vxpose.xlu0.b32.start.end [1/1] (short) (narrow) %v2019_v28, 8  ;;  %2719 = vxpose.xlu1.b32.start.end [1/1] (short) (narrow) %v2152_v29, 8  ;;  %v2190_v46 = vrot.slane %v2176_v19, %v6484_v6  ;;  %v2343_v49 = vcombine.low %v6543_v57, %v1874_v17  ;;  %v2271_v38 = vcombine.low %v2206_v48, %v2222_v10 }
0x16c4   :  { %v2155_v55 = vcombine.low %v2111_v4, %v2143_v61  ;;  %v2288_v21 = vcombine.high %v2231_v24, %v2263_v23  ;;  %v2270_v25 = vrot.slane %v2256_v54, %v6495_v27  ;;  %v2327_v39 = vcombine.low %v6531_v50, %v6545_v59 }
0x16c5   :  { %v2239_v47 = vcombine.low %v2174_v40, %v2190_v46  ;;  %v2295_v26 = vcombine.low %v1650_v41, %v6519_v42  ;;  %v2238_v28 = vrot.slane %v2224_v56, %v6495_v27  ;;  %v2311_v29 = vcombine.low %v6521_v43, %v6533_v51 }
0x16c6   :  { %v2272_v30 = vcombine.high %v2206_v48, %v2222_v10  ;;  %v2351_v31 = vrot.slane %v2343_v49, %v6484_v6  ;;  %v2157_v36 = vcombine.low %v2118_v18, %v2150_v12  ;;  %v2279_v44 = vrot.slane %v2271_v38, %v6495_v27 }
0x16c7   :  { %2623 = vxpose.xlu0.b32.start.end [1/1] (short) (narrow) %v2021_v15, 8  ;;  %2783 = vxpose.xlu1.b32.start.end [1/1] (short) (narrow) %v2154_v60, 8  ;;  %v2290_v37 = vcombine.high %v2238_v28, %v2270_v25  ;;  %v2335_v45 = vrot.slane %v2327_v39, %v6484_v6  ;;  %v2240_v52 = vcombine.high %v2174_v40, %v2190_v46 }
0x16c8   :  { %v2303_v53 = vrot.slane %v2295_v26, %v6484_v6  ;;  %v2247_v15 = vrot.slane %v2239_v47, %v6495_v27  ;;  %v2319_v60 = vrot.slane %v2311_v29, %v6484_v6  ;;  %v2344_v61 = vcombine.high %v6543_v57, %v1874_v17 }
0x16c9   :  { %v2391_v62 = vcombine.low %v2335_v45, %v2351_v31  ;;  %v2287_v0 = vcombine.low %v2231_v24, %v2263_v23  ;;  %v2286_v4 = vrot.slane %v2272_v30, %v6495_v27  ;;  %v2328_v5 = vcombine.high %v6531_v50, %v6545_v59  ;;  %v5381_v30 = vld [vmem:[%s6992_s6] ss:$0 sm:$0xff] }
0x16ca   :  { %v2292_v63 = vcombine.high %v2247_v15, %v2279_v44  ;;  %v2296_v7 = vcombine.high %v1650_v41, %v6519_v42  ;;  %v2359_v8 = vcombine.low %v2303_v53, %v2319_v60  ;;  %v2358_v57 = vrot.slane %v2344_v61, %v6484_v6 }
0x16cb   :  { %2847 = vxpose.xlu1.b32.start.end [1/1] (short) (narrow) %v2156_v9, 8  ;;  %2687 = vxpose.xlu0.b32.start.end [1/1] (short) (narrow) %v2151_v11, 8  ;;  %v2254_v9 = vrot.slane %v2240_v52, %v6495_v27  ;;  %v2312_v11 = vcombine.high %v6521_v43, %v6533_v51  ;;  %v2392_v12 = vcombine.high %v2335_v45, %v2351_v31 }
0x16cc   :  { %v2289_v14 = vcombine.low %v2238_v28, %v2270_v25  ;;  %v2399_v16 = vrot.slane %v2391_v62, %v6495_v27  ;;  %v2342_v18 = vrot.slane %v2328_v5, %v6484_v6  ;;  %v2310_v50 = vrot.slane %v2296_v7, %v6484_v6 }
0x16cd   :  { %v2294_v13 = vcombine.high %v2254_v9, %v2286_v4  ;;  %v2360_v42 = vcombine.high %v2303_v53, %v2319_v60  ;;  %v2367_v59 = vrot.slane %v2359_v8, %v6495_v27  ;;  %v2326_v19 = vrot.slane %v2312_v11, %v6484_v6 }
0x16ce   :  { %v2407_v10 = vcombine.low %v2342_v18, %v2358_v57  ;;  %v2291_v43 = vcombine.low %v2247_v15, %v2279_v44  ;;  %v2406_v54 = vrot.slane %v2392_v12, %v6495_v27  ;;  %v2293_v23 = vcombine.low %v2254_v9, %v2286_v4 }
0x16cf   :  { %2911 = vxpose.xlu1.b32.start.end [1/1] (short) (narrow) %v2158_v20, 8  ;;  %2751 = vxpose.xlu0.b32.start.end [1/1] (short) (narrow) %v2153_v22, 8  ;;  %v2424_v51 = vcombine.high %v2367_v59, %v2399_v16  ;;  %v2375_v17 = vcombine.low %v2310_v50, %v2326_v19  ;;  %v2374_v20 = vrot.slane %v2360_v42, %v6495_v27 }
0x16d0   :  { %v2408_v22 = vcombine.high %v2342_v18, %v2358_v57  ;;  %v2415_v40 = vrot.slane %v2407_v10, %v6495_v27  ;;  %v2376_v56 = vcombine.high %v2310_v50, %v2326_v19  ;;  %v2423_v41 = vcombine.low %v2367_v59, %v2399_v16 }
0x16d1   :  { %v2426_v48 = vcombine.high %v2374_v20, %v2406_v54  ;;  %v2383_v24 = vrot.slane %v2375_v17, %v6495_v27 }
0x16d2   :  { %v2422_v49 = vrot.slane %v2408_v22, %v6495_v27  ;;  %v2390_v38 = vrot.slane %v2376_v56, %v6495_v27 }
0x16d3   :  { %2815 = vxpose.xlu0.b32.start.end [1/1] (short) (narrow) %v2155_v55, 8  ;;  %2975 = vxpose.xlu1.b32.start.end [1/1] (short) (narrow) %v2288_v21, 8  ;;  %v2428_v46 = vcombine.high %v2383_v24, %v2415_v40  ;;  %v2425_v21 = vcombine.low %v2374_v20, %v2406_v54  ;;  %v2427_v25 = vcombine.low %v2383_v24, %v2415_v40 }
0x16d4   :  { %v2430_v55 = vcombine.high %v2390_v38, %v2422_v49  ;;  %v2429_v39 = vcombine.low %v2390_v38, %v2422_v49 }
0x16d7   :  { %2879 = vxpose.xlu0.b32.start.end [1/1] (short) (narrow) %v2157_v36, 8  ;;  %3039 = vxpose.xlu1.b32.start.end [1/1] (short) (narrow) %v2290_v37, 8 }
0x16db   :  { %3103 = vxpose.xlu1.b32.start.end [1/1] (short) (narrow) %v2292_v63, 8  ;;  %2943 = vxpose.xlu0.b32.start.end [1/1] (short) (narrow) %v2287_v0, 8 }
0x16df   :  { %3167 = vxpose.xlu1.b32.start.end [1/1] (short) (narrow) %v2294_v13, 8  ;;  %3007 = vxpose.xlu0.b32.start.end [1/1] (short) (narrow) %v2289_v14, 8 }
0x16e3   :  { %3071 = vxpose.xlu0.b32.start.end [1/1] (short) (narrow) %v2291_v43, 8  ;;  %3231 = vxpose.xlu1.b32.start.end [1/1] (short) (narrow) %v2424_v51, 8 }
0x16e7   :  { %3135 = vxpose.xlu0.b32.start.end [1/1] (short) (narrow) %v2293_v23, 8  ;;  %3295 = vxpose.xlu1.b32.start.end [1/1] (short) (narrow) %v2426_v48, 8 }
0x16eb   :  { %3359 = vxpose.xlu1.b32.start.end [1/1] (short) (narrow) %v2428_v46, 8  ;;  %3199 = vxpose.xlu0.b32.start.end [1/1] (short) (narrow) %v2423_v41, 8 }
0x16ef   :  { %3423 = vxpose.xlu1.b32.start.end [1/1] (short) (narrow) %v2430_v55, 8  ;;  %3263 = vxpose.xlu0.b32.start.end [1/1] (short) (narrow) %v2425_v21, 8 }
0x16f3   :  { %3327 = vxpose.xlu0.b32.start.end [1/1] (short) (narrow) %v2427_v25, 8 }
0x16f7   :  { %3391 = vxpose.xlu0.b32.start.end [1/1] (short) (narrow) %v2429_v39, 8 }
0x1705   :  { %v5612_v47 = vpop.f32.mrb[8].mxu1 }
0x1706   :  { %v1556_v26 = vcombine.high %v5612_v47, %v5612_v47  ;;  %v1563_v28 = vrot.slane %v5612_v47, %v6484_v6  ;;  %v1528_v29 = vpop.f32.mrb[9].mxu1 }
0x1707   :  { %v1539_v31 = vcombine.high %v1528_v29, %v1528_v29  ;;  %v1546_v36 = vrot.slane %v1528_v29, %v6484_v6 }
0x1708   :  { %v1570_v37 = vrot.slane %v1556_v26, %v6484_v6  ;;  %v1571_v44 = vcombine.high %v1563_v28, %v1563_v28  ;;  %v1591_v15 = vadd.f32 %v5381_v30, %v1563_v28 }
0x1709   :  { %v1553_v45 = vrot.slane %v1539_v31, %v6484_v6  ;;  %v1554_v52 = vcombine.high %v1546_v36, %v1546_v36  ;;  %v1587_v62 = vadd.f32 %v5381_v30, %v1546_v36 }
0x170a   :  { %v1572_v53 = vcombine.high %v1570_v37, %v1570_v37  ;;  %v1592_v60 = vadd.f32 %v5381_v30, %v1571_v44  ;;  %v1593_v0 = vadd.f32 %v5381_v30, %v1570_v37 }
0x170b   :  { %v1555_v61 = vcombine.high %v1553_v45, %v1553_v45  ;;  %v1588_v63 = vadd.f32 %v5381_v30, %v1554_v52  ;;  %v1589_v7 = vadd.f32 %v5381_v30, %v1553_v45 }
0x170c   :  { %v1594_v4 = vadd.f32 %v5381_v30, %v1572_v53  ;;  %v1613_v5 = vcombine.low %v1591_v15, %v1592_v60 }
0x170d   :  { %v1590_v8 = vadd.f32 %v5381_v30, %v1555_v61  ;;  %v1595_v9 = vcombine.low %v1587_v62, %v1588_v63 }
0x170e   :  { %v1622_v11 = vcombine.low %v1593_v0, %v1594_v4  ;;  %v1620_v12 = vrot.slane %v1613_v5, %v6495_v27 }
0x170f   :  { %v1604_v57 = vcombine.low %v1589_v7, %v1590_v8  ;;  %v1602_v14 = vrot.slane %v1595_v9, %v6495_v27 }
0x1710   :  { %v1629_v13 = vrot.slane %v1622_v11, %v6495_v27 }
0x1711   :  { %v1611_v16 = vrot.slane %v1604_v57, %v6495_v27 }
0x1712   :  { %v3660_v18 = vcombine.low %v1620_v12, %v1629_v13  ;;  %v5384_v50 = vcombine.high %v1620_v12, %v1629_v13 }
0x1713   :  { %v3659_v42 = vcombine.low %v1602_v14, %v1611_v16  ;;  %v5383_v59 = vcombine.high %v1602_v14, %v1611_v16 }
0x1714   :  { %v6659_v19 = vrot.slane %v3660_v18, %v6484_v6  ;;  %v6662_v10 = vrot.slane %v5384_v50, %v6484_v6 }
0x1715   :  { %v6665_v43 = vrot.slane %v3659_v42, %v6484_v6  ;;  %v6668_v51 = vrot.slane %v5383_v59, %v6484_v6 }
0x1717   :  { %v3675_v54 = vcombine.low %v6665_v43, %v6659_v19  ;;  %v3768_v17 = vcombine.low %v6668_v51, %v6662_v10 }
0x1737   :  { %v2447_v20 = vpop.trf.xlu0  ;;  %v2479_v22 = vpop.trf.xlu1 }
0x173b   :  { %v2511_v23 = vpop.trf.xlu0  ;;  %v2607_v48 = vpop.trf.xlu1 }
0x173c   :  { %v3455_v31 = vcombine.low %v2447_v20, %v2511_v23 }
0x173e   :  { %v3462_v61 = vrot.slane %v3455_v31, %v6484_v6 }
0x173f   :  { %v2543_v40 = vpop.trf.xlu0  ;;  %v2671_v56 = vpop.trf.xlu1 }
0x1740   :  { %v3463_v47 = vcombine.low %v2479_v22, %v2543_v40  ;;  %v3479_v26 = vcombine.low %v2607_v48, %v2671_v56 }
0x1742   :  { %v3470_v44 = vrot.slane %v3463_v47, %v6484_v6  ;;  %v3486_v45 = vrot.slane %v3479_v26, %v6484_v6 }
0x1743   :  { %v2575_v24 = vpop.trf.xlu0  ;;  %v2735_v46 = vpop.trf.xlu1 }
0x1744   :  { %v3487_v4 = vcombine.low %v3462_v61, %v3470_v44 }
0x1746   :  { %v3494_v13 = vrot.slane %v3487_v4, %v6495_v27 }
0x1747   :  { %v2639_v41 = vpop.trf.xlu0  ;;  %v2799_v49 = vpop.trf.xlu1 }
0x1748   :  { %v3471_v39 = vcombine.low %v2575_v24, %v2639_v41  ;;  %v3513_v37 = vcombine.low %v2735_v46, %v2799_v49 }
0x174a   :  { %v3478_v36 = vrot.slane %v3471_v39, %v6484_v6  ;;  %v3520_v63 = vrot.slane %v3513_v37, %v6484_v6 }
0x174b   :  { %v2703_v38 = vpop.trf.xlu0  ;;  %v2863_v55 = vpop.trf.xlu1 }
0x174c   :  { %v3495_v62 = vcombine.low %v3478_v36, %v3486_v45 }
0x174e   :  { %v3502_v57 = vrot.slane %v3495_v62, %v6495_v27 }
0x174f   :  { %v2767_v21 = vpop.trf.xlu0  ;;  %v2927_v25 = vpop.trf.xlu1 }
0x1750   :  { %v3505_v28 = vcombine.low %v2703_v38, %v2767_v21  ;;  %v3529_v53 = vcombine.low %v2863_v55, %v2927_v25  ;;  %v3503_v42 = vcombine.low %v3494_v13, %v3502_v57  ;;  %v3504_v59 = vcombine.high %v3494_v13, %v3502_v57 }
0x1752   :  { %v3512_v52 = vrot.slane %v3505_v28, %v6484_v6  ;;  %v3536_v7 = vrot.slane %v3529_v53, %v6484_v6 }
0x1753   :  { %v2831_v29 = vpop.trf.xlu0  ;;  %v2991_v30 = vpop.trf.xlu1 }
0x1754   :  { %v3537_v5 = vcombine.low %v3512_v52, %v3520_v63 }
0x1756   :  { %v3544_v14 = vrot.slane %v3537_v5, %v6495_v27 }
0x1757   :  { %v2895_v15 = vpop.trf.xlu0  ;;  %v3055_v60 = vpop.trf.xlu1 }
0x1758   :  { %v3521_v0 = vcombine.low %v2831_v29, %v2895_v15  ;;  %v3563_v28 = vcombine.low %v2991_v30, %v3055_v60 }
0x175a   :  { %v3528_v8 = vrot.slane %v3521_v0, %v6484_v6  ;;  %v3570_v53 = vrot.slane %v3563_v28, %v6484_v6 }
0x175b   :  { %v2959_v9 = vpop.trf.xlu0  ;;  %v3119_v11 = vpop.trf.xlu1 }
0x175c   :  { %v3545_v12 = vcombine.low %v3528_v8, %v3536_v7 }
0x175e   :  { %v3552_v16 = vrot.slane %v3545_v12, %v6495_v27 }
0x175f   :  { %v3023_v18 = vpop.trf.xlu0  ;;  %v3183_v50 = vpop.trf.xlu1 }
0x1760   :  { %v3553_v20 = vcombine.low %v3544_v14, %v3552_v16  ;;  %v3554_v22 = vcombine.high %v3544_v14, %v3552_v16  ;;  %v3555_v21 = vcombine.low %v2959_v9, %v3023_v18  ;;  %v3579_v25 = vcombine.low %v3119_v11, %v3183_v50 }
0x1762   :  { %v5766_v23 = vpack.c.bf16 %v3553_v20, %v3503_v42  ;;  %v5772_v48 = vpack.c.bf16 %v3554_v22, %v3504_v59  ;;  %v3562_v36 = vrot.slane %v3555_v21, %v6484_v6  ;;  %v3586_v37 = vrot.slane %v3579_v25, %v6484_v6 }
0x1763   :  { %v3087_v40 = vpop.trf.xlu0  ;;  %v3247_v56 = vpop.trf.xlu1 }
0x1764   :  { %5767 = vmatpush3.bf16.msra.mxu0 %v5766_v23  ;;  %5773 = vmatpush3.bf16.msra.mxu1 %v5772_v48  ;;  %v3587_v63 = vcombine.low %v3562_v36, %v3570_v53 }
0x1765   :  { %5768 = vmatprep.subr.bf16.mxu0 %v6145_v1  ;;  %5774 = vmatprep.subr.bf16.mxu1 %v6145_v1 }
0x1766   :  { %v3594_v7 = vrot.slane %v3587_v63, %v6495_v27 }
0x1767   :  { %v3151_v24 = vpop.trf.xlu0  ;;  %v3311_v46 = vpop.trf.xlu1 }
0x1768   :  { %v3571_v55 = vcombine.low %v3087_v40, %v3151_v24  ;;  %v3613_v31 = vcombine.low %v3247_v56, %v3311_v46 }
0x176a   :  { %v3578_v29 = vrot.slane %v3571_v55, %v6484_v6  ;;  %v3620_v61 = vrot.slane %v3613_v31, %v6484_v6  ;;  %v4481_v55 = vld [vmem:[%s6994_s8 + $0x8] sm:$0xff] }
0x176b   :  { %v3215_v41 = vpop.trf.xlu0  ;;  %v3375_v49 = vpop.trf.xlu1 }
0x176c   :  { %v3595_v15 = vcombine.low %v3578_v29, %v3586_v37 }
0x176e   :  { %v3602_v4 = vrot.slane %v3595_v15, %v6495_v27 }
0x176f   :  { %v3279_v38 = vpop.trf.xlu0  ;;  %v3439_v26 = vpop.trf.xlu1 }
0x1770   :  { %v3605_v39 = vcombine.low %v3215_v41, %v3279_v38  ;;  %v3629_v45 = vcombine.low %v3375_v49, %v3439_v26  ;;  %v3603_v11 = vcombine.low %v3594_v7, %v3602_v4  ;;  %v3604_v57 = vcombine.high %v3594_v7, %v3602_v4  ;;  %v4480_v38 = vld [vmem:[%s6994_s8] sm:$0xff] }
0x1771   :  { %v4223_v41 = vmul.f32 %v6480_v3, %v6480_v3  ;;  %v6735_v21 = vpack.c.bf16 %v4481_v55, %v4480_v38  ;;  %v6786_v7 = vld [vmem:[%s6996_s10] ss:$0 sm:$0xff] }
0x1772   :  { %v3612_v44 = vrot.slane %v3605_v39, %v6484_v6  ;;  %v3636_v30 = vrot.slane %v3629_v45, %v6484_v6 }
0x1773   :  { %v3343_v47 = vpop.trf.xlu0  ;;  %v4231_v49 = vsel %vm4198_vm7, %v4223_v41, 0.0 }
0x1774   :  { %v3637_v0 = vcombine.low %v3612_v44, %v3620_v61 }
0x1776   :  { %v3644_v8 = vrot.slane %v3637_v0, %v6495_v27 }
0x1777   :  { %v3407_v52 = vpop.trf.xlu0 }
0x1778   :  { %v3621_v62 = vcombine.low %v3343_v47, %v3407_v52 }
0x177a   :  { %v3628_v60 = vrot.slane %v3621_v62, %v6484_v6 }
0x177c   :  { %v3645_v5 = vcombine.low %v3628_v60, %v3636_v30 }
0x177e   :  { %v3652_v9 = vrot.slane %v3645_v5, %v6495_v27 }
0x1780   :  { %v3653_v12 = vcombine.low %v3644_v8, %v3652_v9  ;;  %v3654_v13 = vcombine.high %v3644_v8, %v3652_v9 }
0x1782   :  { %v5769_v14 = vpack.c.bf16 %v3653_v12, %v3603_v11  ;;  %v5775_v16 = vpack.c.bf16 %v3654_v13, %v3604_v57 }
0x1784   :  { %5770 = vmatpush3.bf16.msra.mxu0 %v5769_v14  ;;  %5776 = vmatpush3.bf16.msra.mxu1 %v5775_v16 }
0x1785   :  { %5635 = vmatprep.subr.mxu0 %v6147_v2  ;;  %5640 = vmatprep.subr.mxu1 %v6147_v2 }
0x1787   :  { %5622 = vmatmul.mubr.msk.f32.vlgmr.msra.gmra.mrb[12].mxu0 %vm133_vm1, %v3675_v54  ;;  %5633 = vmatmul.mubr.msk.f32.vlgmr.msra.gmra.mrb[10].mxu1 %vm133_vm1, %v3768_v17 }
0x1788   :  { %5636 = vmatpush3.msra.mxu0 %v3912_v34  ;;  %5641 = vmatpush3.msra.mxu1 %v3913_v35 }
0x1789   :  { %5637 = vmatprep.mubr.msk.f32.mxu0 %vm6146_vm0, %v6147_v2  ;;  %5642 = vmatprep.mubr.msk.f32.mxu1 %vm6146_vm0, %v6147_v2 }
0x178a   :  { %5777 = vmatprep.subr.bf16.mxu0 %v6145_v1  ;;  %5780 = vmatprep.subr.bf16.mxu1 %v6145_v1 }
0x185a   :  { %v3744_v19 = vpop.f32.mrb[12].mxu0  ;;  %v3837_v10 = vpop.f32.mrb[10].mxu1 }
0x185b   :  { %v5623_v43 = vpop.f32.mrb[13].mxu0  ;;  %v5634_v51 = vpop.f32.mrb[11].mxu1  ;;  %v3845_v34 = vsel %vm3841_vm6, %v3837_v10, -inf  ;;  %v3842_v32 = vsel %vm3841_vm6, %v3744_v19, -inf }
0x185c   :  { %3846 = vmax.xlane.f32.xlu1 %v3845_v34  ;;  %3843 = vmax.xlane.f32.xlu0 %v3842_v32  ;;  %v4426_v43 = vsub.s32 0, %v6478_v58  ;;  %v4438_v51 = vsub.s32 1, %v6478_v58  ;;  %v4423_v32 = vld [vmem:[%s6993_s7] sm:$0x3] }
0x18e9   :  { %v3847_v33 = vpop.xlane.xlu1 %3846  ;;  %v3844_v35 = vpop.xlane.xlu0 %3843 }
0x18ea   :  { %v3849_v54 = vsub.f32 %v3837_v10, %v3847_v33  ;;  %v3848_v17 = vsub.f32 %v3744_v19, %v3844_v35 }
0x18ec   :  { %v3852_v18 = vmul.f32 1.442695, %v3849_v54  ;;  %v3850_v50 = vmul.f32 1.442695, %v3848_v17  ;;  %v6795_v54 = vrot.slane %v4423_v32, %v4426_v43  ;;  %v6797_v17 = vrot.slane %v4423_v32, %v4438_v51 }
0x18ee   :  { %5928 = vpow2.f32 %v3852_v18 }
0x18ef   :  { %5930 = vpow2.f32 %v3850_v50 }
0x18f8   :  { %v5929_v42 = vpop.eup %5928 }
0x18f9   :  { %v5931_v59 = vpop.eup %5930  ;;  %v3857_v20 = vsel %vm3841_vm6, %v5929_v42, 0.0 }
0x18fa   :  { %3858 = vadd.xlane.f32.xlu0 %v3857_v20  ;;  %v3854_v22 = vsel %vm3841_vm6, %v5931_v59, 0.0 }
0x18fb   :  { %3855 = vadd.xlane.f32.xlu1 %v3854_v22 }
0x1987   :  { %v3859_v23 = vpop.xlane.xlu0 %3858 }
0x1988   :  { %v3856_v48 = vpop.xlane.xlu1 %3855  ;;  %5932 = vrcp.f32 %v3859_v23  ;;  %v6804_v23 = vld [vmem:[%s6995_s9] ss:$0 sm:$0xff] }
0x1989   :  { %5934 = vrcp.f32 %v3856_v48 }
0x1992   :  { %v5933_v40 = vpop.eup %5932 }
0x1993   :  { %v5935_v56 = vpop.eup %5934  ;;  %v3863_v24 = vmul.f32 %v5933_v40, %v5929_v42 }
0x1994   :  { %v3862_v46 = vmul.f32 %v5935_v56, %v5931_v59 }
0x1995   :  { %4019 = vxpose.xlu0.b32.start.end [1/1] (short) (narrow) %v3863_v24, 8 }
0x1996   :  { %3914 = vxpose.xlu1.b32.start.end [1/1] (short) (narrow) %v3862_v46, 8 }
0x19bd   :  { %4232 = vadd.xlane.f32.xlu1 %v4231_v49 }
0x1a15   :  { %v4035_v25 = vpop.trf.xlu0 }
0x1a16   :  { %v3930_v39 = vpop.trf.xlu1  ;;  %5643 = vmatmul.mubr.msk.f32.vlgmr.msra.gmra.mrb[12].mxu1 %vm3841_vm6, %v4035_v25 }
0x1a17   :  { %5638 = vmatmul.mubr.msk.f32.vlgmr.msra.gmra.mrb[14].mxu0 %vm3841_vm6, %v3930_v39  ;;  %5782 = vmatpush3.bf16.msra.mxu1 %v6735_v21 }
0x1a18   :  { %5779 = vmatpush3.bf16.msra.mxu0 %v6735_v21  ;;  %5649 = vmatprep.mubr.msk.f32.mxu0 %vm6146_vm0, %v6147_v2 }
0x1a19   :  { %5656 = vmatprep.mubr.msk.f32.mxu1 %vm6146_vm0, %v6147_v2  ;;  %5783 = vmatprep.subr.bf16.mxu0 %v6145_v1 }
0x1a1a   :  { %5786 = vmatprep.subr.bf16.mxu1 %v6145_v1 }
0x1a1b   :  { %5650 = vmatmul.mubr.f32.vlgmr.msra.gmra.mrb[16].mxu0 %v6147_v2 }
0x1a1c   :  { %5785 = vmatpush3.bf16.msra.mxu0 %v6735_v21  ;;  %5663 = vmatprep.mubr.msk.f32.mxu0 %vm6146_vm0, %v6147_v2 }
0x1a1d   :  { %5789 = vmatprep.subr.bf16.mxu0 %v6145_v1 }
0x1a4a   :  { %v4233_v9 = vpop.xlane.xlu1 %4232 }
0x1a4b   :  { %v4287_v11 = vmax.f32 %v4233_v9, 1e-12 }
0x1a4d   :  { %5936 = vrsqrt.f32 %v4287_v11 }
0x1a57   :  { %v5937_v10 = vpop.eup %5936 }
0x1ae9   :  { %v4120_v47 = vpop.f32.mrb[12].mxu1 }
0x1aea   :  { %v4015_v26 = vpop.f32.mrb[14].mxu0  ;;  %v4139_v28 = vcombine.high %v4120_v47, %v6147_v2  ;;  %v6754_v29 = vrot.slane %v4120_v47, %v6484_v6  ;;  %v5644_v31 = vpop.f32.mrb[13].mxu1 }
0x1aeb   :  { %v4124_v36 = vcombine.high %v4015_v26, %v6147_v2  ;;  %v6758_v37 = vrot.slane %v4015_v26, %v6484_v6  ;;  %v5639_v44 = vpop.f32.mrb[15].mxu0  ;;  %v6036_v31 = vld [vmem:[#allocation3 + $0x4] sm:$0x3] }
0x1aec   :  { %v6761_v45 = vrot.slane %v4139_v28, %v6484_v6 }
0x1aed   :  { %v6764_v52 = vrot.slane %v4124_v36, %v6484_v6  ;;  %v4154_v53 = vcombine.low %v6758_v37, %v6754_v29  ;;  %v4155_v15 = vcombine.high %v6758_v37, %v6754_v29 }
0x1aee   :  { %v4557_v61 = vpop.f32.mrb[16].mxu0 }
0x1aef   :  { %v6771_v62 = vrot.slane %v4154_v53, %v6495_v27  ;;  %v4170_v63 = vcombine.low %v6764_v52, %v6761_v45  ;;  %v4171_v0 = vcombine.high %v6764_v52, %v6761_v45  ;;  %v5651_v30 = vpop.f32.mrb[17].mxu0  ;;  %v4558_v8 = vadd.f32 %v6786_v7, %v4557_v61 }
0x1af1   :  { %v4255_v6 = vmul.f32 %v6771_v62, %v6771_v62  ;;  %v4190_v60 = vmul.f32 %v6771_v62, %v6480_v3  ;;  %v4186_v28 = vcombine.high %v6771_v62, %v6147_v2 }
0x1af3   :  { %v4263_v4 = vsel %vm4198_vm7, %v4255_v6, 0.0  ;;  %v4199_v5 = vsel %vm4198_vm7, %v4190_v60, 0.0  ;;  %v4191_v36 = vmul.f32 %v6036_v31, %v4186_v28 }
0x1af4   :  { %4264 = vadd.xlane.f32.xlu1 %v4263_v4  ;;  %4200 = vadd.xlane.f32.xlu0 %v4199_v5  ;;  %v4224_v4 = vmul.f32 %v6036_v31, %v6036_v31 }
0x1af5   :  { %v4202_v44 = vsel %vm4198_vm7, %v4191_v36, 0.0 }
0x1af6   :  { %v4234_v5 = vsel %vm4198_vm7, %v4224_v4, 0.0 }
0x1b0a   :  { %4570 = vrot.lane.b32.xlu0 %v4558_v8, %s6148_s27 }
0x1b81   :  { %v4265_v57 = vpop.xlane.xlu1 %4264  ;;  %v4201_v12 = vpop.xlane.xlu0 %4200 }
0x1b82   :  { %v4311_v3 = vmax.f32 %v4265_v57, 1e-12  ;;  %v4335_v13 = vadd.f32 %v4265_v57, %v4233_v9  ;;  %v4343_v14 = vmul.f32 2.0, %v4201_v12  ;;  %v4303_v33 = vmul.f32 %v5937_v10, %v4201_v12 }
0x1b84   :  { %v4351_v16 = vsub.f32 %v4335_v13, %v4343_v14  ;;  %5938 = vrsqrt.f32 %v4311_v3 }
0x1b85   :  { %v4571_v38 = vpop.permute.xlu0 %4570 }
0x1b86   :  { %v4359_v19 = vmax.f32 %v4351_v16, 0.0 }
0x1b88   :  { %5940 = vrsqrt.f32 %v4359_v19  ;;  %vm4369_vm8 = vcmp.eq.f32.partialorder %v4359_v19, inf  ;;  %v4372_v42 = vand.u32 2147483648, %v4359_v19  ;;  %vm4371_vm9 = vcmp.eq.f32.partialorder %v4359_v19, 0.0 }
0x1b8e   :  { %v5939_v34 = vpop.eup %5938 }
0x1b8f   :  { %v4327_v18 = vmul.f32 %v5939_v34, %v4303_v33 }
0x1b91   :  { %v4428_v58 = vmul.f32 %v6795_v54, %v4327_v18 }
0x1b92   :  { %v5941_v35 = vpop.eup %5940 }
0x1b93   :  { %v4368_v50 = vmul.f32 %v5941_v35, %v4359_v19 }
0x1b95   :  { %v4370_v59 = vsel %vm4369_vm8, %v4359_v19, %v4368_v50 }
0x1b96   :  { %v4373_v20 = vsel %vm4371_vm9, %v4372_v42, %v4370_v59  ;;  %vm5323_vm9 = vcmask 123904  }
0x1b97   :  { %v4440_v22 = vmul.f32 %v6797_v17, %v4373_v20 }
0x1b99   :  { %v4448_v48 = vadd.f32 %v4440_v22, %v4428_v58 }
0x1b9b   :  { %v4463_v40 = vadd.f32 %v6804_v23, %v4448_v48 }
0x1b9d   :  { %4472 = vst.msk [vmem:[#allocation4] sm:$0x3] %vm4471_vm10, %v4463_v40 }
0x1ba4   :  { %v4561_v56 = vld [vmem:[#allocation4] sm:$0x3] }
0x1ba5   :  { %v4562_v24 = vadd.f32 %v4561_v56, %v4558_v8  ;;  %v4256_v8 = vmul.f32 %v4186_v28, %v4186_v28 }
0x1ba7   :  { %v5390_v46 = vmul.f32 -1.442695, %v4562_v24  ;;  %v4266_v62 = vsel %vm4198_vm7, %v4256_v8, 0.0 }
0x1ba9   :  { %5942 = vpow2.f32 %v5390_v46 }
0x1bb3   :  { %v5943_v41 = vpop.eup %5942 }
0x1bb4   :  { %v4566_v49 = vadd.f32 1.0, %v5943_v41 }
0x1bb6   :  { %5944 = vrcp.f32 %v4566_v49 }
0x1bc0   :  { %v5945_v55 = vpop.eup %5944 }
0x1bc1   :  { %v4573_v25 = vmul.f32 %v5945_v55, %v4571_v38  ;;  %v4580_v53 = vsub.f32 1.0, %v5945_v55  ;;  %v4586_v30 = vmul.f32 0.0, %v5945_v55 }
0x1bc3   :  { %4575 = vrot.lane.b32.xlu1 %v4573_v25, %s6149_s3 }
0x1c35   :  { %v4576_v39 = vpop.permute.xlu1 %4575 }
0x1c36   :  { %v4578_v47 = vadd.f32 %v4576_v39, %v4561_v56 }
0x1c38   :  { %5946 = vtanh.f32 %v4578_v47  ;;  %v6835_v47 = vrot.slane %v4155_v15, %v6495_v27 }
0x1c3a   :  { %v4257_v36 = vmul.f32 %v6835_v47, %v6835_v47 }
0x1c42   :  { %v5947_v26 = vpop.eup %5946 }
0x1c43   :  { %4582 = vrot.lane.b32.xlu1 %v5947_v26, %s6150_s4  ;;  %v6037_v26 = vld [vmem:[#allocation3 + $0x8] sm:$0x3] }
0x1c44   :  { %v4192_v28 = vmul.f32 %v6037_v26, %v6835_v47 }
0x1c46   :  { %v4205_v31 = vsel %vm4198_vm7, %v4192_v28, 0.0  ;;  %v4187_v28 = vcombine.high %v6835_v47, %v6147_v2 }
0x1c67   :  { %4203 = vadd.xlane.f32.xlu1 %v4202_v44  ;;  %v4269_v44 = vsel %vm4198_vm7, %v4257_v36, 0.0 }
0x1cb5   :  { %v4583_v61 = vpop.permute.xlu1 %4582 }
0x1cb6   :  { %v4585_v6 = vmul.f32 %v4583_v61, %v4580_v53 }
0x1cb8   :  { %v6813_v60 = vadd.f32 %v4586_v30, %v4585_v6 }
0x1cba   :  { %4589 = vrot.lane.b32.xlu0 %v6813_v60, %s6150_s4 }
0x1cd9   :  { %4235 = vadd.xlane.f32.xlu0 %v4234_v5  ;;  %v4225_v5 = vmul.f32 %v6037_v26, %v6037_v26 }
0x1cdb   :  { %v4237_v8 = vsel %vm4198_vm7, %v4225_v5, 0.0  ;;  %v4258_v5 = vmul.f32 %v4187_v28, %v4187_v28 }
0x1cdd   :  { %4267 = vadd.xlane.f32.xlu0 %v4266_v62  ;;  %v4272_v47 = vsel %vm4198_vm7, %v4258_v5, 0.0 }
0x1cf4   :  { %v4204_v57 = vpop.xlane.xlu1 %4203 }
0x1cf5   :  { %v4344_v13 = vmul.f32 2.0, %v4204_v57 }
0x1d2c   :  { %v4590_v9 = vpop.permute.xlu0 %4589 }
0x1d2d   :  { %5657 = vmatmul.mubr.msk.f32.vlgmr.msra.gmra.mrb[14].mxu1 %vm397_vm5, %v4590_v9 }
0x1d2e   :  { %5788 = vmatpush3.bf16.msra.mxu1 %v6735_v21  ;;  %5670 = vmatprep.mubr.msk.f32.mxu1 %vm6146_vm0, %v6147_v2 }
0x1d2f   :  { %5792 = vmatprep.subr.bf16.mxu1 %v6145_v1 }
0x1d66   :  { %v4236_v11 = vpop.xlane.xlu0 %4235 }
0x1d67   :  { %v4288_v12 = vmax.f32 %v4236_v11, 1e-12 }
0x1d69   :  { %5948 = vrsqrt.f32 %v4288_v12 }
0x1d6a   :  { %v4268_v3 = vpop.xlane.xlu0 %4267 }
0x1d6b   :  { %v4312_v14 = vmax.f32 %v4268_v3, 1e-12  ;;  %v4336_v16 = vadd.f32 %v4268_v3, %v4236_v11 }
0x1d6d   :  { %v4352_v19 = vsub.f32 %v4336_v16, %v4344_v13  ;;  %5950 = vrsqrt.f32 %v4312_v14 }
0x1d6f   :  { %v4360_v10 = vmax.f32 %v4352_v19, 0.0 }
0x1d71   :  { %5952 = vrsqrt.f32 %v4360_v10  ;;  %vm4376_vm11 = vcmp.eq.f32.partialorder %v4360_v10, inf  ;;  %v4379_v18 = vand.u32 2147483648, %v4360_v10  ;;  %vm4378_vm12 = vcmp.eq.f32.partialorder %v4360_v10, 0.0 }
0x1d73   :  { %v5949_v43 = vpop.eup %5948 }
0x1d74   :  { %v4304_v34 = vmul.f32 %v5949_v43, %v4204_v57 }
0x1d77   :  { %v5951_v51 = vpop.eup %5950 }
0x1d78   :  { %v4328_v33 = vmul.f32 %v5951_v51, %v4304_v34 }
0x1d7a   :  { %v4429_v59 = vmul.f32 %v6795_v54, %v4328_v33 }
0x1d7b   :  { %v5953_v32 = vpop.eup %5952 }
0x1d7c   :  { %v4375_v35 = vmul.f32 %v5953_v32, %v4360_v10 }
0x1d7e   :  { %v4377_v50 = vsel %vm4376_vm11, %v4360_v10, %v4375_v35 }
0x1d7f   :  { %v4380_v42 = vsel %vm4378_vm12, %v4379_v18, %v4377_v50 }
0x1d80   :  { %v4441_v20 = vmul.f32 %v6797_v17, %v4380_v42 }
0x1d82   :  { %v4449_v58 = vadd.f32 %v4441_v20, %v4429_v59 }
0x1d84   :  { %v4464_v22 = vadd.f32 %v6804_v23, %v4449_v58 }
0x1d86   :  { %4473 = vst.msk [vmem:[#allocation4 + $0x2] sm:$0x3] %vm4471_vm10, %v4464_v22 }
0x1d8d   :  { %v4664_v24 = vld [vmem:[#allocation4 + $0x2] sm:$0x3] }
0x1e00   :  { %v4659_v48 = vpop.f32.mrb[14].mxu1 }
0x1e01   :  { %v4660_v40 = vadd.f32 %v6786_v7, %v4659_v48  ;;  %v5658_v56 = vpop.f32.mrb[15].mxu1 }
0x1e03   :  { %4673 = vrot.lane.b32.xlu1 %v4660_v40, %s6148_s27  ;;  %v4665_v46 = vadd.f32 %v4664_v24, %v4660_v40 }
0x1e05   :  { %v5392_v41 = vmul.f32 -1.442695, %v4665_v46 }
0x1e07   :  { %5954 = vpow2.f32 %v5392_v41 }
0x1e11   :  { %v5955_v49 = vpop.eup %5954 }
0x1e12   :  { %v4669_v38 = vadd.f32 1.0, %v5955_v49 }
0x1e14   :  { %5956 = vrcp.f32 %v4669_v38 }
0x1e1e   :  { %v5957_v55 = vpop.eup %5956 }
0x1e1f   :  { %v4683_v29 = vsub.f32 1.0, %v5957_v55  ;;  %v4689_v15 = vmul.f32 %v5957_v55, %v6813_v60 }
0x1e75   :  { %v4674_v25 = vpop.permute.xlu1 %4673 }
0x1e76   :  { %v4676_v39 = vmul.f32 %v5957_v55, %v4674_v25 }
0x1e78   :  { %4678 = vrot.lane.b32.xlu0 %v4676_v39, %s6149_s3 }
0x1e97   :  { %4206 = vadd.xlane.f32.xlu0 %v4205_v31  ;;  %v6038_v31 = vld [vmem:[#allocation3 + $0xc] sm:$0x3] }
0x1e98   :  { %v4193_v36 = vmul.f32 %v6038_v31, %v4187_v28 }
0x1e9b   :  { %4270 = vadd.xlane.f32.xlu0 %v4269_v44  ;;  %v4208_v44 = vsel %vm4198_vm7, %v4193_v36, 0.0 }
0x1eea   :  { %v4679_v53 = vpop.permute.xlu0 %4678 }
0x1eeb   :  { %v4681_v61 = vadd.f32 %v4679_v53, %v4664_v24 }
0x1eed   :  { %5958 = vtanh.f32 %v4681_v61 }
0x1ef7   :  { %v5959_v30 = vpop.eup %5958 }
0x1ef8   :  { %4685 = vrot.lane.b32.xlu1 %v5959_v30, %s6150_s4 }
0x1f24   :  { %v4207_v60 = vpop.xlane.xlu0 %4206 }
0x1f25   :  { %v4345_v57 = vmul.f32 2.0, %v4207_v60 }
0x1f28   :  { %v4271_v9 = vpop.xlane.xlu0 %4270 }
0x1f29   :  { %v4313_v13 = vmax.f32 %v4271_v9, 1e-12 }
0x1f6a   :  { %v4686_v37 = vpop.permute.xlu1 %4685 }
0x1f6b   :  { %v4688_v6 = vmul.f32 %v4686_v37, %v4683_v29 }
0x1f6d   :  { %v6844_v4 = vadd.f32 %v4689_v15, %v4688_v6  ;;  %v4226_v15 = vmul.f32 %v6038_v31, %v6038_v31 }
0x1f6f   :  { %4692 = vrot.lane.b32.xlu1 %v6844_v4, %s6150_s4  ;;  %v4240_v6 = vsel %vm4198_vm7, %v4226_v15, 0.0 }
0x1f93   :  { %4238 = vadd.xlane.f32.xlu1 %v4237_v8 }
0x1fe1   :  { %v4693_v62 = vpop.permute.xlu1 %4692 }
0x1fe2   :  { %5664 = vmatmul.mubr.msk.f32.vlgmr.msra.gmra.mrb[18].mxu0 %vm397_vm5, %v4693_v62 }
0x1fe3   :  { %5791 = vmatpush3.bf16.msra.mxu0 %v6735_v21  ;;  %5677 = vmatprep.mubr.msk.f32.mxu0 %vm6146_vm0, %v6147_v2 }
0x1fe4   :  { %5795 = vmatprep.subr.bf16.mxu0 %v6145_v1 }
0x2020   :  { %v4239_v11 = vpop.xlane.xlu1 %4238 }
0x2021   :  { %v4289_v12 = vmax.f32 %v4239_v11, 1e-12  ;;  %v4337_v3 = vadd.f32 %v4271_v9, %v4239_v11 }
0x2023   :  { %5960 = vrsqrt.f32 %v4289_v12  ;;  %v4353_v14 = vsub.f32 %v4337_v3, %v4345_v57 }
0x2024   :  { %5962 = vrsqrt.f32 %v4313_v13 }
0x2025   :  { %v4361_v16 = vmax.f32 %v4353_v14, 0.0 }
0x2027   :  { %5964 = vrsqrt.f32 %v4361_v16  ;;  %vm4383_vm13 = vcmp.eq.f32.partialorder %v4361_v16, inf  ;;  %v4386_v33 = vand.u32 2147483648, %v4361_v16  ;;  %vm4385_vm14 = vcmp.eq.f32.partialorder %v4361_v16, 0.0 }
0x202d   :  { %v5961_v19 = vpop.eup %5960 }
0x202e   :  { %v4305_v10 = vmul.f32 %v5961_v19, %v4207_v60  ;;  %v5963_v43 = vpop.eup %5962 }
0x2030   :  { %v4329_v34 = vmul.f32 %v5963_v43, %v4305_v10 }
0x2031   :  { %v5965_v51 = vpop.eup %5964 }
0x2032   :  { %v4382_v32 = vmul.f32 %v5965_v51, %v4361_v16  ;;  %v4430_v50 = vmul.f32 %v6795_v54, %v4329_v34 }
0x2034   :  { %v4384_v35 = vsel %vm4383_vm13, %v4361_v16, %v4382_v32 }
0x2035   :  { %v4387_v18 = vsel %vm4385_vm14, %v4386_v33, %v4384_v35 }
0x2036   :  { %v4442_v42 = vmul.f32 %v6797_v17, %v4387_v18 }
0x2038   :  { %v4450_v59 = vadd.f32 %v4442_v42, %v4430_v50 }
0x203a   :  { %v4465_v20 = vadd.f32 %v6804_v23, %v4450_v59 }
0x203c   :  { %4474 = vst.msk [vmem:[#allocation4 + $0x4] sm:$0x3] %vm4471_vm10, %v4465_v20 }
0x2043   :  { %v4767_v40 = vld [vmem:[#allocation4 + $0x4] sm:$0x3] }
0x20b5   :  { %v4762_v58 = vpop.f32.mrb[18].mxu0 }
0x20b6   :  { %v4763_v22 = vadd.f32 %v6786_v7, %v4762_v58  ;;  %v5665_v48 = vpop.f32.mrb[19].mxu0 }
0x20b8   :  { %4776 = vrot.lane.b32.xlu0 %v4763_v22, %s6148_s27  ;;  %v4768_v56 = vadd.f32 %v4767_v40, %v4763_v22 }
0x20ba   :  { %v5394_v24 = vmul.f32 -1.442695, %v4768_v56 }
0x20bc   :  { %5966 = vpow2.f32 %v5394_v24 }
0x20c6   :  { %v5967_v46 = vpop.eup %5966 }
0x20c7   :  { %v4772_v41 = vadd.f32 1.0, %v5967_v46 }
0x20c9   :  { %5968 = vrcp.f32 %v4772_v41 }
0x20d3   :  { %v5969_v49 = vpop.eup %5968 }
0x20d4   :  { %v4786_v53 = vsub.f32 1.0, %v5969_v49  ;;  %v4792_v30 = vmul.f32 %v5969_v49, %v6844_v4 }
0x212a   :  { %v4777_v38 = vpop.permute.xlu0 %4776 }
0x212b   :  { %v4779_v55 = vmul.f32 %v5969_v49, %v4777_v38  ;;  %v6888_v49 = vrot.slane %v4170_v63, %v6495_v27  ;;  %v6039_v38 = vld [vmem:[#allocation3 + $0x10] sm:$0x3] }
0x212d   :  { %4781 = vrot.lane.b32.xlu1 %v4779_v55, %s6149_s3  ;;  %v4194_v55 = vmul.f32 %v6039_v38, %v6888_v49 }
0x219f   :  { %v4782_v25 = vpop.permute.xlu1 %4781 }
0x21a0   :  { %v4784_v39 = vadd.f32 %v4782_v25, %v4767_v40  ;;  %v4211_v25 = vsel %vm4198_vm7, %v4194_v55, 0.0 }
0x21a2   :  { %5970 = vtanh.f32 %v4784_v39  ;;  %v4259_v39 = vmul.f32 %v6888_v49, %v6888_v49 }
0x21ac   :  { %v5971_v26 = vpop.eup %5970 }
0x21ad   :  { %4788 = vrot.lane.b32.xlu1 %v5971_v26, %s6150_s4  ;;  %v4275_v26 = vsel %vm4198_vm7, %v4259_v39, 0.0 }
0x21d1   :  { %4209 = vadd.xlane.f32.xlu1 %v4208_v44 }
0x221f   :  { %v4789_v61 = vpop.permute.xlu1 %4788 }
0x2220   :  { %v4791_v29 = vmul.f32 %v4789_v61, %v4786_v53 }
0x2222   :  { %v6866_v37 = vadd.f32 %v4792_v30, %v4791_v29  ;;  %v4227_v29 = vmul.f32 %v6039_v38, %v6039_v38  ;;  %v6040_v38 = vld [vmem:[#allocation3 + $0x14] sm:$0x3] }
0x2224   :  { %4795 = vrot.lane.b32.xlu0 %v6866_v37, %s6150_s4  ;;  %v4243_v15 = vsel %vm4198_vm7, %v4227_v29, 0.0 }
0x2243   :  { %4241 = vadd.xlane.f32.xlu0 %v4240_v6 }
0x2247   :  { %4273 = vadd.xlane.f32.xlu0 %v4272_v47 }
0x225e   :  { %v4210_v62 = vpop.xlane.xlu1 %4209 }
0x225f   :  { %v4346_v11 = vmul.f32 2.0, %v4210_v62 }
0x2296   :  { %v4796_v8 = vpop.permute.xlu0 %4795 }
0x2297   :  { %5671 = vmatmul.mubr.msk.f32.vlgmr.msra.gmra.mrb[16].mxu1 %vm397_vm5, %v4796_v8 }
0x2298   :  { %5794 = vmatpush3.bf16.msra.mxu1 %v6735_v21  ;;  %5684 = vmatprep.mubr.msk.f32.mxu1 %vm6146_vm0, %v6147_v2 }
0x2299   :  { %5798 = vmatprep.subr.bf16.mxu1 %v6145_v1 }
0x22d0   :  { %v4242_v4 = vpop.xlane.xlu0 %4241 }
0x22d1   :  { %v4290_v60 = vmax.f32 %v4242_v4, 1e-12 }
0x22d3   :  { %5972 = vrsqrt.f32 %v4290_v60 }
0x22d4   :  { %v4274_v9 = vpop.xlane.xlu0 %4273 }
0x22d5   :  { %v4314_v57 = vmax.f32 %v4274_v9, 1e-12  ;;  %v4338_v12 = vadd.f32 %v4274_v9, %v4242_v4 }
0x22d7   :  { %v4354_v3 = vsub.f32 %v4338_v12, %v4346_v11  ;;  %5974 = vrsqrt.f32 %v4314_v57 }
0x22d9   :  { %v4362_v13 = vmax.f32 %v4354_v3, 0.0 }
0x22db   :  { %5976 = vrsqrt.f32 %v4362_v13  ;;  %vm4390_vm15 = vcmp.eq.f32.partialorder %v4362_v13, inf  ;;  %v4393_v1 = vand.u32 2147483648, %v4362_v13  ;;  %vm4392_vm1 = vcmp.eq.f32.partialorder %v4362_v13, 0.0 }
0x22dd   :  { %v5973_v14 = vpop.eup %5972 }
0x22de   :  { %v4306_v19 = vmul.f32 %v5973_v14, %v4210_v62 }
0x22e1   :  { %v5975_v16 = vpop.eup %5974 }
0x22e2   :  { %v4330_v43 = vmul.f32 %v5975_v16, %v4306_v19 }
0x22e4   :  { %v4431_v33 = vmul.f32 %v6795_v54, %v4330_v43 }
0x22e5   :  { %v5977_v10 = vpop.eup %5976 }
0x22e6   :  { %v4389_v51 = vmul.f32 %v5977_v10, %v4362_v13 }
0x22e8   :  { %v4391_v34 = vsel %vm4390_vm15, %v4362_v13, %v4389_v51 }
0x22e9   :  { %v4394_v32 = vsel %vm4392_vm1, %v4393_v1, %v4391_v34 }
0x22ea   :  { %v4443_v35 = vmul.f32 %v6797_v17, %v4394_v32 }
0x22ec   :  { %v4451_v18 = vadd.f32 %v4443_v35, %v4431_v33 }
0x22ee   :  { %v4466_v50 = vadd.f32 %v6804_v23, %v4451_v18 }
0x22f0   :  { %4475 = vst.msk [vmem:[#allocation4 + $0x6] sm:$0x3] %vm4471_vm10, %v4466_v50 }
0x22f7   :  { %v4870_v58 = vld [vmem:[#allocation4 + $0x6] sm:$0x3] }
0x236a   :  { %v4865_v42 = vpop.f32.mrb[16].mxu1 }
0x236b   :  { %v4866_v59 = vadd.f32 %v6786_v7, %v4865_v42  ;;  %v5672_v20 = vpop.f32.mrb[17].mxu1 }
0x236d   :  { %4879 = vrot.lane.b32.xlu1 %v4866_v59, %s6148_s27  ;;  %v4871_v22 = vadd.f32 %v4870_v58, %v4866_v59 }
0x236f   :  { %v5396_v48 = vmul.f32 -1.442695, %v4871_v22 }
0x2371   :  { %5978 = vpow2.f32 %v5396_v48 }
0x237b   :  { %v5979_v40 = vpop.eup %5978 }
0x237c   :  { %v4875_v56 = vadd.f32 1.0, %v5979_v40 }
0x237e   :  { %5980 = vrcp.f32 %v4875_v56 }
0x2388   :  { %v5981_v24 = vpop.eup %5980 }
0x2389   :  { %v4889_v63 = vsub.f32 1.0, %v5981_v24  ;;  %v4895_v53 = vmul.f32 %v5981_v24, %v6866_v37 }
0x23df   :  { %v4880_v46 = vpop.permute.xlu1 %4879 }
0x23e0   :  { %v4882_v41 = vmul.f32 %v5981_v24, %v4880_v46 }
0x23e2   :  { %4884 = vrot.lane.b32.xlu0 %v4882_v41, %s6149_s3  ;;  %v4188_v41 = vcombine.high %v6888_v49, %v6147_v2 }
0x23e4   :  { %v4195_v55 = vmul.f32 %v6040_v38, %v4188_v41 }
0x2401   :  { %4212 = vadd.xlane.f32.xlu0 %v4211_v25  ;;  %v4214_v25 = vsel %vm4198_vm7, %v4195_v55, 0.0 }
0x2405   :  { %4276 = vadd.xlane.f32.xlu0 %v4275_v26 }
0x2454   :  { %v4885_v28 = vpop.permute.xlu0 %4884 }
0x2455   :  { %v4887_v31 = vadd.f32 %v4885_v28, %v4870_v58 }
0x2457   :  { %5982 = vtanh.f32 %v4887_v31 }
0x2461   :  { %v5983_v36 = vpop.eup %5982 }
0x2462   :  { %4891 = vrot.lane.b32.xlu1 %v5983_v36, %s6150_s4 }
0x248e   :  { %v4213_v5 = vpop.xlane.xlu0 %4212 }
0x248f   :  { %v4347_v8 = vmul.f32 2.0, %v4213_v5 }
0x2492   :  { %v4277_v37 = vpop.xlane.xlu0 %4276 }
0x2493   :  { %v4315_v60 = vmax.f32 %v4277_v37, 1e-12 }
0x24d4   :  { %v4892_v44 = vpop.permute.xlu1 %4891 }
0x24d5   :  { %v4894_v61 = vmul.f32 %v4892_v44, %v4889_v63  ;;  %v4228_v63 = vmul.f32 %v6040_v38, %v6040_v38 }
0x24d7   :  { %v6897_v30 = vadd.f32 %v4895_v53, %v4894_v61  ;;  %v4246_v44 = vsel %vm4198_vm7, %v4228_v63, 0.0  ;;  %v4260_v53 = vmul.f32 %v4188_v41, %v4188_v41 }
0x24d9   :  { %4898 = vrot.lane.b32.xlu1 %v6897_v30, %s6150_s4  ;;  %v4278_v49 = vsel %vm4198_vm7, %v4260_v53, 0.0 }
0x24fd   :  { %4244 = vadd.xlane.f32.xlu1 %v4243_v15 }
0x254b   :  { %v4899_v6 = vpop.permute.xlu1 %4898 }
0x254c   :  { %5678 = vmatmul.mubr.msk.f32.vlgmr.msra.gmra.mrb[20].mxu0 %vm397_vm5, %v4899_v6 }
0x254d   :  { %5797 = vmatpush3.bf16.msra.mxu0 %v6735_v21  ;;  %5691 = vmatprep.mubr.msk.f32.mxu0 %vm6146_vm0, %v6147_v2 }
0x258a   :  { %v4245_v47 = vpop.xlane.xlu1 %4244 }
0x258b   :  { %v4291_v4 = vmax.f32 %v4245_v47, 1e-12  ;;  %v4339_v62 = vadd.f32 %v4277_v37, %v4245_v47 }
0x258d   :  { %5984 = vrsqrt.f32 %v4291_v4  ;;  %v4355_v9 = vsub.f32 %v4339_v62, %v4347_v8 }
0x258e   :  { %5986 = vrsqrt.f32 %v4315_v60 }
0x258f   :  { %v4363_v11 = vmax.f32 %v4355_v9, 0.0 }
0x2591   :  { %5988 = vrsqrt.f32 %v4363_v11  ;;  %vm4397_vm2 = vcmp.eq.f32.partialorder %v4363_v11, inf  ;;  %v4400_v19 = vand.u32 2147483648, %v4363_v11  ;;  %vm4399_vm3 = vcmp.eq.f32.partialorder %v4363_v11, 0.0 }
0x2597   :  { %v5985_v57 = vpop.eup %5984 }
0x2598   :  { %v4307_v12 = vmul.f32 %v5985_v57, %v4213_v5  ;;  %v5987_v3 = vpop.eup %5986 }
0x259a   :  { %v4331_v14 = vmul.f32 %v5987_v3, %v4307_v12 }
0x259b   :  { %v5989_v13 = vpop.eup %5988 }
0x259c   :  { %v4396_v16 = vmul.f32 %v5989_v13, %v4363_v11  ;;  %v4432_v51 = vmul.f32 %v6795_v54, %v4331_v14 }
0x259e   :  { %v4398_v10 = vsel %vm4397_vm2, %v4363_v11, %v4396_v16 }
0x259f   :  { %v4401_v43 = vsel %vm4399_vm3, %v4400_v19, %v4398_v10 }
0x25a0   :  { %v4444_v1 = vmul.f32 %v6797_v17, %v4401_v43 }
0x25a2   :  { %v4452_v34 = vadd.f32 %v4444_v1, %v4432_v51 }
0x25a4   :  { %v4467_v32 = vadd.f32 %v6804_v23, %v4452_v34 }
0x25a6   :  { %4476 = vst.msk [vmem:[#allocation4 + $0x8] sm:$0x3] %vm4471_vm10, %v4467_v32 }
0x25ad   :  { %v4973_v50 = vld [vmem:[#allocation4 + $0x8] sm:$0x3] }
0x261f   :  { %v4968_v33 = vpop.f32.mrb[20].mxu0 }
0x2620   :  { %v4969_v35 = vadd.f32 %v6786_v7, %v4968_v33  ;;  %v5679_v18 = vpop.f32.mrb[21].mxu0 }
0x2622   :  { %4982 = vrot.lane.b32.xlu0 %v4969_v35, %s6148_s27  ;;  %v4974_v42 = vadd.f32 %v4973_v50, %v4969_v35 }
0x2624   :  { %v5398_v59 = vmul.f32 -1.442695, %v4974_v42 }
0x2626   :  { %5990 = vpow2.f32 %v5398_v59 }
0x2630   :  { %v5991_v20 = vpop.eup %5990 }
0x2631   :  { %v4978_v58 = vadd.f32 1.0, %v5991_v20  ;;  %v6939_v20 = vrot.slane %v4171_v0, %v6495_v27 }
0x2633   :  { %5992 = vrcp.f32 %v4978_v58  ;;  %v6041_v58 = vld [vmem:[#allocation3 + $0x18] sm:$0x3] }
0x2634   :  { %v4229_v55 = vmul.f32 %v6041_v58, %v6041_v58 }
0x263d   :  { %v5993_v22 = vpop.eup %5992 }
0x263e   :  { %v4992_v39 = vsub.f32 1.0, %v5993_v22  ;;  %v4998_v28 = vmul.f32 %v5993_v22, %v6897_v30 }
0x2694   :  { %v4983_v48 = vpop.permute.xlu0 %4982 }
0x2695   :  { %v4985_v40 = vmul.f32 %v5993_v22, %v4983_v48  ;;  %v4196_v22 = vmul.f32 %v6041_v58, %v6939_v20 }
0x2697   :  { %4987 = vrot.lane.b32.xlu1 %v4985_v40, %s6149_s3  ;;  %v4217_v48 = vsel %vm4198_vm7, %v4196_v22, 0.0  ;;  %v4261_v40 = vmul.f32 %v6939_v20, %v6939_v20 }
0x2709   :  { %v4988_v56 = vpop.permute.xlu1 %4987 }
0x270a   :  { %v4990_v24 = vadd.f32 %v4988_v56, %v4973_v50  ;;  %v4281_v56 = vsel %vm4198_vm7, %v4261_v40, 0.0 }
0x270c   :  { %5994 = vtanh.f32 %v4990_v24 }
0x2716   :  { %v5995_v46 = vpop.eup %5994 }
0x2717   :  { %4994 = vrot.lane.b32.xlu1 %v5995_v46, %s6150_s4 }
0x273b   :  { %4215 = vadd.xlane.f32.xlu1 %v4214_v25  ;;  %v4249_v25 = vsel %vm4198_vm7, %v4229_v55, 0.0 }
0x2789   :  { %v4995_v26 = vpop.permute.xlu1 %4994 }
0x278a   :  { %v4997_v31 = vmul.f32 %v4995_v26, %v4992_v39 }
0x278c   :  { %v6918_v36 = vadd.f32 %v4998_v28, %v4997_v31 }
0x278e   :  { %5001 = vrot.lane.b32.xlu0 %v6918_v36, %s6150_s4 }
0x27ad   :  { %4247 = vadd.xlane.f32.xlu0 %v4246_v44 }
0x27b1   :  { %4279 = vadd.xlane.f32.xlu0 %v4278_v49 }
0x27c8   :  { %v4216_v29 = vpop.xlane.xlu1 %4215 }
0x27c9   :  { %v4348_v5 = vmul.f32 2.0, %v4216_v29 }
0x2800   :  { %v5002_v61 = vpop.permute.xlu0 %5001 }
0x2801   :  { %5685 = vmatmul.mubr.msk.f32.vlgmr.msra.gmra.mrb[18].mxu1 %vm397_vm5, %v5002_v61 }
0x2802   :  { %5800 = vmatpush3.bf16.msra.mxu1 %v6735_v21  ;;  %5698 = vmatprep.mubr.msk.f32.mxu1 %vm6146_vm0, %v6147_v2 }
0x283a   :  { %v4248_v30 = vpop.xlane.xlu0 %4247 }
0x283b   :  { %v4292_v15 = vmax.f32 %v4248_v30, 1e-12 }
0x283d   :  { %5996 = vrsqrt.f32 %v4292_v15 }
0x283e   :  { %v4280_v6 = vpop.xlane.xlu0 %4279 }
0x283f   :  { %v4316_v37 = vmax.f32 %v4280_v6, 1e-12  ;;  %v4340_v47 = vadd.f32 %v4280_v6, %v4248_v30 }
0x2841   :  { %v4356_v8 = vsub.f32 %v4340_v47, %v4348_v5  ;;  %5998 = vrsqrt.f32 %v4316_v37 }
0x2843   :  { %v4364_v4 = vmax.f32 %v4356_v8, 0.0 }
0x2845   :  { %6000 = vrsqrt.f32 %v4364_v4  ;;  %vm4404_vm4 = vcmp.eq.f32.partialorder %v4364_v4, inf  ;;  %v4407_v12 = vand.u32 2147483648, %v4364_v4  ;;  %vm4406_vm0 = vcmp.eq.f32.partialorder %v4364_v4, 0.0 }
0x2847   :  { %v5997_v62 = vpop.eup %5996 }
0x2848   :  { %v4308_v9 = vmul.f32 %v5997_v62, %v4216_v29 }
0x284b   :  { %v5999_v60 = vpop.eup %5998 }
0x284c   :  { %v4332_v21 = vmul.f32 %v5999_v60, %v4308_v9 }
0x284e   :  { %v4433_v14 = vmul.f32 %v6795_v54, %v4332_v21 }
0x284f   :  { %v6001_v11 = vpop.eup %6000 }
0x2850   :  { %v4403_v57 = vmul.f32 %v6001_v11, %v4364_v4 }
0x2852   :  { %v4405_v3 = vsel %vm4404_vm4, %v4364_v4, %v4403_v57 }
0x2853   :  { %v4408_v13 = vsel %vm4406_vm0, %v4407_v12, %v4405_v3 }
0x2854   :  { %v4445_v16 = vmul.f32 %v6797_v17, %v4408_v13 }
0x2856   :  { %v4453_v19 = vadd.f32 %v4445_v16, %v4433_v14 }
0x2858   :  { %v4468_v10 = vadd.f32 %v6804_v23, %v4453_v19 }
0x285a   :  { %4477 = vst.msk [vmem:[#allocation4 + $0xa] sm:$0x3] %vm4471_vm10, %v4468_v10 }
0x2861   :  { %v5076_v34 = vld [vmem:[#allocation4 + $0xa] sm:$0x3] }
0x28d4   :  { %v5071_v43 = vpop.f32.mrb[18].mxu1 }
0x28d5   :  { %v5072_v51 = vadd.f32 %v6786_v7, %v5071_v43  ;;  %v5686_v1 = vpop.f32.mrb[19].mxu1 }
0x28d7   :  { %5085 = vrot.lane.b32.xlu1 %v5072_v51, %s6148_s27  ;;  %v5077_v32 = vadd.f32 %v5076_v34, %v5072_v51 }
0x28d9   :  { %v5400_v33 = vmul.f32 -1.442695, %v5077_v32 }
0x28db   :  { %6002 = vpow2.f32 %v5400_v33  ;;  %v4189_v33 = vcombine.high %v6939_v20, %v6147_v2 }
0x28e5   :  { %v6003_v35 = vpop.eup %6002 }
0x28e6   :  { %v5081_v18 = vadd.f32 1.0, %v6003_v35  ;;  %v6042_v35 = vld [vmem:[#allocation3 + $0x1c] sm:$0x3] }
0x28e7   :  { %v4230_v40 = vmul.f32 %v6042_v35, %v6042_v35 }
0x28e8   :  { %6004 = vrcp.f32 %v5081_v18  ;;  %v4197_v18 = vmul.f32 %v6042_v35, %v4189_v33 }
0x28f2   :  { %v6005_v50 = vpop.eup %6004 }
0x28f3   :  { %v5095_v27 = vsub.f32 1.0, %v6005_v50  ;;  %v5101_v52 = vmul.f32 %v6005_v50, %v6918_v36 }
0x2949   :  { %v5086_v42 = vpop.permute.xlu1 %5085 }
0x294a   :  { %v5088_v59 = vmul.f32 %v6005_v50, %v5086_v42  ;;  %v4220_v50 = vsel %vm4198_vm7, %v4197_v18, 0.0 }
0x294c   :  { %5090 = vrot.lane.b32.xlu0 %v5088_v59, %s6149_s3 }
0x296b   :  { %4218 = vadd.xlane.f32.xlu0 %v4217_v48 }
0x296f   :  { %4282 = vadd.xlane.f32.xlu0 %v4281_v56  ;;  %v4252_v56 = vsel %vm4198_vm7, %v4230_v40, 0.0 }
0x29be   :  { %v5091_v24 = vpop.permute.xlu0 %5090 }
0x29bf   :  { %v5093_v46 = vadd.f32 %v5091_v24, %v5076_v34  ;;  %v4262_v24 = vmul.f32 %v4189_v33, %v4189_v33 }
0x29c1   :  { %6006 = vtanh.f32 %v5093_v46  ;;  %v4284_v2 = vsel %vm4198_vm7, %v4262_v24, 0.0 }
0x29cb   :  { %v6007_v41 = vpop.eup %6006 }
0x29cc   :  { %5097 = vrot.lane.b32.xlu1 %v6007_v41, %s6150_s4 }
0x29f8   :  { %v4219_v26 = vpop.xlane.xlu0 %4218 }
0x29f9   :  { %v4349_v63 = vmul.f32 2.0, %v4219_v26 }
0x29fc   :  { %v4283_v28 = vpop.xlane.xlu0 %4282 }
0x29fd   :  { %v4317_v49 = vmax.f32 %v4283_v28, 1e-12 }
0x2a3e   :  { %v5098_v45 = vpop.permute.xlu1 %5097 }
0x2a3f   :  { %v5100_v0 = vmul.f32 %v5098_v45, %v5095_v27 }
0x2a41   :  { %v5102_v38 = vadd.f32 %v5101_v52, %v5100_v0 }
0x2a43   :  { %5104 = vrot.lane.b32.xlu1 %v5102_v38, %s6150_s4 }
0x2a67   :  { %4250 = vadd.xlane.f32.xlu1 %v4249_v25 }
0x2ab5   :  { %v5105_v39 = vpop.permute.xlu1 %5104 }
0x2ab6   :  { %5692 = vmatmul.mubr.msk.f32.vlgmr.msra.gmra.mrb[22].mxu0 %vm397_vm5, %v5105_v39 }
0x2af4   :  { %v4251_v31 = vpop.xlane.xlu1 %4250 }
0x2af5   :  { %v4293_v44 = vmax.f32 %v4251_v31, 1e-12  ;;  %v4341_v53 = vadd.f32 %v4283_v28, %v4251_v31 }
0x2af7   :  { %6008 = vrsqrt.f32 %v4293_v44  ;;  %v4357_v36 = vsub.f32 %v4341_v53, %v4349_v63 }
0x2af8   :  { %6010 = vrsqrt.f32 %v4317_v49 }
0x2af9   :  { %v4365_v61 = vmax.f32 %v4357_v36, 0.0 }
0x2afb   :  { %6012 = vrsqrt.f32 %v4365_v61  ;;  %vm4411_vm6 = vcmp.eq.f32.partialorder %v4365_v61, inf  ;;  %v4414_v47 = vand.u32 2147483648, %v4365_v61  ;;  %vm4413_vm8 = vcmp.eq.f32.partialorder %v4365_v61, 0.0 }
0x2b01   :  { %v6009_v30 = vpop.eup %6008 }
0x2b02   :  { %v4309_v29 = vmul.f32 %v6009_v30, %v4219_v26  ;;  %v6011_v15 = vpop.eup %6010 }
0x2b04   :  { %v4333_v5 = vmul.f32 %v6011_v15, %v4309_v29 }
0x2b05   :  { %v6013_v6 = vpop.eup %6012 }
0x2b06   :  { %v4410_v37 = vmul.f32 %v6013_v6, %v4365_v61  ;;  %v4434_v62 = vmul.f32 %v6795_v54, %v4333_v5 }
0x2b08   :  { %v4412_v8 = vsel %vm4411_vm6, %v4365_v61, %v4410_v37 }
0x2b09   :  { %v4415_v4 = vsel %vm4413_vm8, %v4414_v47, %v4412_v8 }
0x2b0a   :  { %v4446_v60 = vmul.f32 %v6797_v17, %v4415_v4 }
0x2b0c   :  { %v4454_v9 = vadd.f32 %v4446_v60, %v4434_v62 }
0x2b0e   :  { %v4469_v11 = vadd.f32 %v6804_v23, %v4454_v9 }
0x2b10   :  { %4478 = vst.msk [vmem:[#allocation4 + $0xc] sm:$0x3] %vm4471_vm10, %v4469_v11 }
0x2b17   :  { %v5179_v3 = vld [vmem:[#allocation4 + $0xc] sm:$0x3] }
0x2b89   :  { %v5174_v21 = vpop.f32.mrb[22].mxu0 }
0x2b8a   :  { %v5175_v57 = vadd.f32 %v6786_v7, %v5174_v21  ;;  %v5693_v12 = vpop.f32.mrb[23].mxu0 }
0x2b8c   :  { %5188 = vrot.lane.b32.xlu0 %v5175_v57, %s6148_s27  ;;  %v5180_v13 = vadd.f32 %v5179_v3, %v5175_v57 }
0x2b8e   :  { %v5402_v14 = vmul.f32 -1.442695, %v5180_v13 }
0x2b90   :  { %6014 = vpow2.f32 %v5402_v14 }
0x2b9a   :  { %v6015_v16 = vpop.eup %6014 }
0x2b9b   :  { %v5184_v19 = vadd.f32 1.0, %v6015_v16 }
0x2b9d   :  { %6016 = vrcp.f32 %v5184_v19 }
0x2ba7   :  { %v6017_v10 = vpop.eup %6016 }
0x2ba8   :  { %v5198_v42 = vsub.f32 1.0, %v6017_v10  ;;  %v5204_v58 = vmul.f32 %v6017_v10, %v5102_v38 }
0x2bfe   :  { %v5189_v43 = vpop.permute.xlu0 %5188 }
0x2bff   :  { %v5191_v51 = vmul.f32 %v6017_v10, %v5189_v43 }
0x2c01   :  { %5193 = vrot.lane.b32.xlu1 %v5191_v51, %s6149_s3  ;;  %v5406_v51 = vld [vmem:[#allocation5] ss:$0 sm:$0xff] }
0x2c73   :  { %v5194_v1 = vpop.permute.xlu1 %5193 }
0x2c74   :  { %v5196_v34 = vadd.f32 %v5194_v1, %v5179_v3 }
0x2c76   :  { %6018 = vtanh.f32 %v5196_v34 }
0x2c80   :  { %v6019_v32 = vpop.eup %6018 }
0x2c81   :  { %5200 = vrot.lane.b32.xlu1 %v6019_v32, %s6150_s4 }
0x2ca5   :  { %4221 = vadd.xlane.f32.xlu1 %v4220_v50 }
0x2cf3   :  { %v5201_v59 = vpop.permute.xlu1 %5200 }
0x2cf4   :  { %v5203_v22 = vmul.f32 %v5201_v59, %v5198_v42 }
0x2cf6   :  { %v6962_v48 = vadd.f32 %v5204_v58, %v5203_v22 }
0x2cf8   :  { %5207 = vrot.lane.b32.xlu0 %v6962_v48, %s6150_s4 }
0x2d17   :  { %4253 = vadd.xlane.f32.xlu0 %v4252_v56 }
0x2d1b   :  { %4285 = vadd.xlane.f32.xlu0 %v4284_v2 }
0x2d32   :  { %v4222_v41 = vpop.xlane.xlu1 %4221 }
0x2d33   :  { %v4350_v52 = vmul.f32 2.0, %v4222_v41 }
0x2d6a   :  { %v5208_v20 = vpop.permute.xlu0 %5207 }
0x2d6b   :  { %5699 = vmatmul.mubr.msk.f32.vlgmr.msra.gmra.mrb[20].mxu1 %vm397_vm5, %v5208_v20 }
0x2da4   :  { %v4254_v46 = vpop.xlane.xlu0 %4253 }
0x2da5   :  { %v4294_v27 = vmax.f32 %v4254_v46, 1e-12 }
0x2da7   :  { %6020 = vrsqrt.f32 %v4294_v27 }
0x2da8   :  { %v4286_v45 = vpop.xlane.xlu0 %4285 }
0x2da9   :  { %v4318_v0 = vmax.f32 %v4286_v45, 1e-12  ;;  %v4342_v38 = vadd.f32 %v4286_v45, %v4254_v46 }
0x2dab   :  { %v4358_v55 = vsub.f32 %v4342_v38, %v4350_v52  ;;  %6022 = vrsqrt.f32 %v4318_v0 }
0x2dad   :  { %v4366_v25 = vmax.f32 %v4358_v55, 0.0 }
0x2daf   :  { %6024 = vrsqrt.f32 %v4366_v25  ;;  %vm4418_vm7 = vcmp.eq.f32.partialorder %v4366_v25, inf  ;;  %v4421_v53 = vand.u32 2147483648, %v4366_v25  ;;  %vm4420_vm5 = vcmp.eq.f32.partialorder %v4366_v25, 0.0 }
0x2db1   :  { %v6021_v39 = vpop.eup %6020 }
0x2db2   :  { %v4310_v28 = vmul.f32 %v6021_v39, %v4222_v41 }
0x2db5   :  { %v6023_v26 = vpop.eup %6022 }
0x2db6   :  { %v4334_v63 = vmul.f32 %v6023_v26, %v4310_v28 }
0x2db8   :  { %v4435_v61 = vmul.f32 %v6795_v54, %v4334_v63 }
0x2db9   :  { %v6025_v31 = vpop.eup %6024 }
0x2dba   :  { %v4417_v44 = vmul.f32 %v6025_v31, %v4366_v25 }
0x2dbc   :  { %v4419_v49 = vsel %vm4418_vm7, %v4366_v25, %v4417_v44 }
0x2dbd   :  { %v4422_v36 = vsel %vm4420_vm5, %v4421_v53, %v4419_v49 }
0x2dbe   :  { %v4447_v30 = vmul.f32 %v6797_v17, %v4422_v36 }
0x2dc0   :  { %v4455_v29 = vadd.f32 %v4447_v30, %v4435_v61 }
0x2dc2   :  { %v4470_v15 = vadd.f32 %v6804_v23, %v4455_v29 }
0x2dc4   :  { %4479 = vst.msk [vmem:[#allocation4 + $0xe] sm:$0x3] %vm4471_vm10, %v4470_v15  ;;  %vm5341_vm10 = vcmask 1024  }
0x2dcb   :  { %v5282_v47 = vld [vmem:[#allocation4 + $0xe] sm:$0x3] }
0x2e3e   :  { %v5277_v6 = vpop.f32.mrb[20].mxu1 }
0x2e3f   :  { %v5278_v5 = vadd.f32 %v6786_v7, %v5277_v6  ;;  %v5700_v37 = vpop.f32.mrb[21].mxu1  ;;  %v5405_v7 = vld [vmem:[%s6997_s11] ss:$0 sm:$0xff] }
0x2e41   :  { %5291 = vrot.lane.b32.xlu1 %v5278_v5, %s6148_s27  ;;  %v5283_v8 = vadd.f32 %v5282_v47, %v5278_v5 }
0x2e43   :  { %v5404_v4 = vmul.f32 -1.442695, %v5283_v8 }
0x2e45   :  { %6026 = vpow2.f32 %v5404_v4 }
0x2e4f   :  { %v6027_v62 = vpop.eup %6026 }
0x2e50   :  { %v5287_v60 = vadd.f32 1.0, %v6027_v62 }
0x2e52   :  { %6028 = vrcp.f32 %v5287_v60 }
0x2e5c   :  { %v6029_v54 = vpop.eup %6028 }
0x2e5d   :  { %v5301_v57 = vsub.f32 1.0, %v6029_v54  ;;  %v5307_v13 = vmul.f32 %v6029_v54, %v6962_v48 }
0x2eb3   :  { %v5292_v17 = vpop.permute.xlu1 %5291 }
0x2eb4   :  { %v5294_v9 = vmul.f32 %v6029_v54, %v5292_v17 }
0x2eb6   :  { %5296 = vrot.lane.b32.xlu0 %v5294_v9, %s6149_s3 }
0x2f28   :  { %v5297_v23 = vpop.permute.xlu0 %5296 }
0x2f29   :  { %v5299_v11 = vadd.f32 %v5297_v23, %v5282_v47 }
0x2f2b   :  { %6030 = vtanh.f32 %v5299_v11 }
0x2f35   :  { %v6031_v21 = vpop.eup %6030 }
0x2f36   :  { %5303 = vrot.lane.b32.xlu1 %v6031_v21, %s6150_s4 }
0x2f3a   :  { %5315 = vrot.lane.b32.xlu1 %v5405_v7, %s6152_s30 }
0x2fa8   :  { %v5304_v12 = vpop.permute.xlu1 %5303 }
0x2fa9   :  { %v5306_v3 = vmul.f32 %v5304_v12, %v5301_v57 }
0x2fab   :  { %v5308_v14 = vadd.f32 %v5307_v13, %v5306_v3 }
0x2fac   :  { %v5316_v16 = vpop.permute.xlu1 %5315 }
0x2fad   :  { %v5318_v19 = vmul.f32 %v5316_v16, %v5308_v14 }
0x2faf   :  { %5320 = vrot.lane.b32.xlu0 %v5318_v19, %s6150_s4 }
0x3021   :  { %v5321_v10 = vpop.permute.xlu0 %5320 }
0x3022   :  { %v5324_v43 = vsel %vm5323_vm9, %v5321_v10, 0.0 }
0x3023   :  { %5325 = vadd.xlane.f32.xlu1 %v5324_v43 }
0x30b0   :  { %v5326_v1 = vpop.xlane.xlu1 %5325 }
0x30b1   :  { %v5334_v34 = vadd.f32 %v5406_v51, %v5326_v1 }
0x30b3   :  { %v5407_v32 = vmul.f32 -1.442695, %v5334_v34 }
0x30b5   :  { %6032 = vpow2.f32 %v5407_v32 }
0x30bf   :  { %v6033_v33 = vpop.eup %6032 }
0x30c0   :  { %v5338_v35 = vadd.f32 1.0, %v6033_v33 }
0x30c2   :  { %6034 = vrcp.f32 %v5338_v35 }
0x30cc   :  { %v6035_v18 = vpop.eup %6034 }
0x30cd   :  { %5342 = vst.msk [vmem:[%s6999_s13] sm:$0x3] %vm5341_vm10, %v6035_v18 }
0x30ce   :  { %5347 = vsyncpa [#allocation7], 1 }
0x30cf   :  { %5348 = vsyncpa [#allocation9], 1 }
0x30d0   :  { %5349 = vsyncpa [#allocation12], 1 }

</bundles_post_ra>
